<compile_context>
chip_gen: v6e
topology: v6e:2x2x1
jax: 0.10.0
libtpu: 0.0.40
codegen_flags: <defaults>
</compile_context>

<pallas_src>
import functools

import jax
import jax.numpy as jnp
from jax.experimental import pallas as pl
from jax.experimental.pallas import tpu as pltpu


# ----------------------------------------------------------------------------
# Kernels
# ----------------------------------------------------------------------------
def _mlp_max_kernel(x_ref, w1_ref, b1_ref, w2_ref, b2_ref, w3_ref, b3_ref,
                    out_ref, *, relu_last):
    """One (batch, point-tile) step: 3 pointwise convs (folded BN + 3x3 trans)
    in bf16/f32-acc, then running max over points into the resident out block."""
    n = pl.program_id(1)

    @pl.when(n == 0)
    def _():
        out_ref[...] = jnp.full(out_ref.shape, -jnp.inf, dtype=out_ref.dtype)

    x = x_ref[...].astype(jnp.bfloat16)                               # (TILE_N, 3)
    # layer 1: trans already folded into w1_ref (per batch), K=3 bf16 matmul
    h = jnp.dot(x, w1_ref[...], preferred_element_type=jnp.float32) + b1_ref[...]
    h = jnp.maximum(h, 0.0)                                           # relu(bn1(conv1))
    # layer 2: 64 -> 128
    h = jnp.dot(h.astype(jnp.bfloat16), w2_ref[...],
                preferred_element_type=jnp.float32) + b2_ref[...]
    h = jnp.maximum(h, 0.0)                                           # relu(bn2(conv2))
    # layer 3: 128 -> 1024
    h = jnp.dot(h.astype(jnp.bfloat16), w3_ref[...],
                preferred_element_type=jnp.float32) + b3_ref[...]
    if relu_last:                                                     # STN applies relu on bn3(conv3)
        h = jnp.maximum(h, 0.0)
    # running max over the point dimension (output block resident across n)
    out_ref[...] = jnp.maximum(out_ref[...],
                               jnp.max(h, axis=0, keepdims=True))


def _stn_fc_kernel(g_ref, w1_ref, b1_ref, w2_ref, b2_ref, w3_ref, b3_ref,
                   out_ref):
    """STN3d head: fc1/fc2 (+BN, relu) -> fc3 (padded to 128 lanes) -> + identity."""
    h = jnp.dot(g_ref[...], w1_ref[...], preferred_element_type=jnp.float32) + b1_ref[...]
    h = jnp.maximum(h, 0.0)
    h = jnp.dot(h, w2_ref[...], preferred_element_type=jnp.float32) + b2_ref[...]
    h = jnp.maximum(h, 0.0)
    h = jnp.dot(h, w3_ref[...], preferred_element_type=jnp.float32) + b3_ref[...]
    # flattened 3x3 identity: ones at columns 0,4,8 only (mask out lane padding)
    col = jax.lax.broadcasted_iota(jnp.int32, h.shape, 1)
    iden = jnp.where((col % 4 == 0) & (col < 9), 1.0, 0.0).astype(jnp.float32)
    out_ref[...] = h + iden


# ----------------------------------------------------------------------------
# Pallas wrappers
# ----------------------------------------------------------------------------
def mlp_max(x_bnc, w1_eff, b1, w2, b2, w3, b3, *, relu_last, tile_n):
    """x_bnc: (B, Np, 3) f32 (Np multiple of tile_n), w1_eff: (B, 3, 64) bf16
    with the per-batch 3x3 transform folded in.  Returns (B, 1024) f32."""
    B, Np, Cin = x_bnc.shape
    C1 = w1_eff.shape[-1]
    Cout = w3.shape[-1]
    assert Np % tile_n == 0
    n_tiles = Np // tile_n

    kernel = functools.partial(_mlp_max_kernel, relu_last=relu_last)
    bcast = lambda a: pl.BlockSpec(a.shape, lambda b, n: (0, 0))      # resident weights

    out = pl.pallas_call(
        kernel,
        out_shape=jax.ShapeDtypeStruct((B, 1, Cout), jnp.float32),
        grid_spec=pltpu.PrefetchScalarGridSpec(
            num_scalar_prefetch=0,
            grid=(B, n_tiles),
            in_specs=[
                pl.BlockSpec((None, tile_n, Cin), lambda b, n: (b, n, 0)),  # x tile
                pl.BlockSpec((None, Cin, C1), lambda b, n: (b, 0, 0)),      # per-batch w1
                bcast(b1), bcast(w2), bcast(b2), bcast(w3), bcast(b3),
            ],
            out_specs=pl.BlockSpec((None, 1, Cout), lambda b, n: (b, 0, 0)),
        ),
        compiler_params=pltpu.CompilerParams(
            dimension_semantics=("parallel", "arbitrary"),
            vmem_limit_bytes=48 * 1024 * 1024),
    )(x_bnc, w1_eff, b1, w2, b2, w3, b3)
    return out.reshape(B, Cout)


def stn_fc(g, w1, b1, w2, b2, w3, b3):
    """g: (B, 1024). Returns (B, 128) = fc head (fc3 lane-padded) + identity."""
    B = g.shape[0]
    Cout = w3.shape[1]
    full = lambda a: pl.BlockSpec(a.shape, lambda i: (0,) * a.ndim)
    return pl.pallas_call(
        _stn_fc_kernel,
        out_shape=jax.ShapeDtypeStruct((B, Cout), jnp.float32),
        grid_spec=pltpu.PrefetchScalarGridSpec(
            num_scalar_prefetch=0,
            grid=(1,),
            in_specs=[full(g), full(w1), full(b1), full(w2), full(b2),
                      full(w3), full(b3)],
            out_specs=pl.BlockSpec((B, Cout), lambda i: (0, 0)),
        ),
        compiler_params=pltpu.CompilerParams(
            dimension_semantics=("arbitrary",)),
    )(g, w1, b1, w2, b2, w3, b3)


# ----------------------------------------------------------------------------
# Parameter construction (deterministic) + BN folding (plain-JAX glue)
# ----------------------------------------------------------------------------
def _fold_bn(w, b, bnp, eps=1e-5, dtype=jnp.float32):
    """Fold inference-mode BatchNorm into a (Cout, Cin) weight.
    Returns weight (Cin, Cout) in `dtype` and bias (1, Cout) in f32."""
    gamma, beta, mean, var = bnp
    s = gamma / jnp.sqrt(var + eps)
    w_eff = (w * s[:, None]).T.astype(dtype)
    b_eff = ((b - mean) * s + beta).reshape(1, -1).astype(jnp.float32)
    return w_eff, b_eff


def _fold_plain(w, b):
    return w.T.astype(jnp.float32), b.reshape(1, -1).astype(jnp.float32)


def _pad_lanes(w, b, lanes=128):
    pad = lanes - w.shape[1]
    return jnp.pad(w, ((0, 0), (0, pad))), jnp.pad(b, ((0, 0), (0, pad)))


def build_params(key):
    keys = iter(jax.random.split(key, 64))

    def lin(cin, cout):
        w = jax.random.normal(next(keys), (cout, cin), jnp.float32) / jnp.sqrt(cin)
        b = 0.01 * jax.random.normal(next(keys), (cout,), jnp.float32)
        return w, b

    def bn(c):
        gamma = 1.0 + 0.1 * jax.random.normal(next(keys), (c,), jnp.float32)
        beta = 0.1 * jax.random.normal(next(keys), (c,), jnp.float32)
        mean = 0.1 * jax.random.normal(next(keys), (c,), jnp.float32)
        var = 1.0 + 0.1 * jax.random.uniform(next(keys), (c,), jnp.float32)
        return gamma, beta, mean, var

    # STN3d conv stack (w1 kept f32 for trans folding; w2/w3 stored bf16)
    sc1 = _fold_bn(*lin(3, 64), bn(64))
    sc2 = _fold_bn(*lin(64, 128), bn(128), dtype=jnp.bfloat16)
    sc3 = _fold_bn(*lin(128, 1024), bn(1024), dtype=jnp.bfloat16)
    # STN3d FC head (f32; fc3 output padded to 128 lanes for dense stores)
    sf1 = _fold_bn(*lin(1024, 512), bn(512))
    sf2 = _fold_bn(*lin(512, 256), bn(256))
    sf3 = _pad_lanes(*_fold_plain(*lin(256, 9)), lanes=128)
    # PointNetfeat conv stack
    fc1 = _fold_bn(*lin(3, 64), bn(64))
    fc2 = _fold_bn(*lin(64, 128), bn(128), dtype=jnp.bfloat16)
    fc3 = _fold_bn(*lin(128, 1024), bn(1024), dtype=jnp.bfloat16)

    return {
        "stn_conv": (*sc1, *sc2, *sc3),
        "stn_fc": (*sf1, *sf2, *sf3),
        "feat_conv": (*fc1, *fc2, *fc3),
    }


# ----------------------------------------------------------------------------
# Full forward (global_feat=True): returns (global_feature (B,1024), trans (B,3,3))
# ----------------------------------------------------------------------------
def pointnetfeat_forward(x, params, tile_n=512):
    """x: (B, 3, N) float32, matching the PyTorch NCW input convention."""
    B, _, N = x.shape
    x_t = jnp.transpose(x, (0, 2, 1)).astype(jnp.float32)              # (B, N, 3)

    # pad the point dim to a multiple of tile_n with duplicate points
    # (duplicates leave the max-over-points unchanged)
    n_pad = (-N) % tile_n
    if n_pad:
        pad_blk = jnp.broadcast_to(x_t[:, :1, :], (B, n_pad, 3))
        x_t = jnp.concatenate([x_t, pad_blk], axis=1)

    # STN3d: conv stack + max-pool (identity transform => w1 used as-is)
    w1s, b1s, w2s, b2s, w3s, b3s = params["stn_conv"]
    w1s_b = jnp.broadcast_to(w1s.astype(jnp.bfloat16)[None], (B, 3, w1s.shape[1]))
    g_stn = mlp_max(x_t, w1s_b, b1s, w2s, b2s, w3s, b3s,
                    relu_last=True, tile_n=tile_n)                      # (B, 1024)
    trans = stn_fc(g_stn, *params["stn_fc"])[:, :9].reshape(B, 3, 3)    # (B, 3, 3)

    # Main path: fold the per-batch 3x3 transform into the first conv weight
    w1f, b1f, w2f, b2f, w3f, b3f = params["feat_conv"]
    w1f_eff = jnp.einsum("bij,jk->bik", trans, w1f).astype(jnp.bfloat16)  # (B, 3, 64)
    gfeat = mlp_max(x_t, w1f_eff, b1f, w2f, b2f, w3f, b3f,
                    relu_last=False, tile_n=tile_n)                     # (B, 1024)
    return gfeat, trans


# ----------------------------------------------------------------------------
# Pure-JAX reference (same folded params, mirrored bf16/f32-acc precision)
# ----------------------------------------------------------------------------
def _ref_mlp_max(x_bnc, w1_eff, b1, w2, b2, w3, b3, relu_last):
    h = jnp.einsum("bnc,bcd->bnd", x_bnc.astype(jnp.bfloat16), w1_eff,
                   preferred_element_type=jnp.float32) + b1
    h = jnp.maximum(h, 0.0)
    h = jnp.einsum("bnc,cd->bnd", h.astype(jnp.bfloat16), w2,
                   preferred_element_type=jnp.float32) + b2
    h = jnp.maximum(h, 0.0)
    h = jnp.einsum("bnc,cd->bnd", h.astype(jnp.bfloat16), w3,
                   preferred_element_type=jnp.float32) + b3
    if relu_last:
        h = jnp.maximum(h, 0.0)
    return jnp.max(h, axis=1)


def ref_forward(x, params):
    B, _, N = x.shape
    x_t = jnp.transpose(x, (0, 2, 1)).astype(jnp.float32)

    w1s, b1s, w2s, b2s, w3s, b3s = params["stn_conv"]
    w1s_b = jnp.broadcast_to(w1s.astype(jnp.bfloat16)[None], (B, 3, w1s.shape[1]))
    g = _ref_mlp_max(x_t, w1s_b, b1s, w2s, b2s, w3s, b3s, relu_last=True)

    w1, b1, w2, b2, w3, b3 = params["stn_fc"]
    h = jnp.maximum(g @ w1 + b1, 0.0)
    h = jnp.maximum(h @ w2 + b2, 0.0)
    h = (h @ w3 + b3)[:, :9]
    iden = jnp.array([1, 0, 0, 0, 1, 0, 0, 0, 1], jnp.float32)
    trans = (h + iden).reshape(B, 3, 3)

    w1f, b1f, w2f, b2f, w3f, b3f = params["feat_conv"]
    w1f_eff = jnp.einsum("bij,jk->bik", trans, w1f).astype(jnp.bfloat16)
    gfeat = _ref_mlp_max(x_t, w1f_eff, b1f, w2f, b2f, w3f, b3f, relu_last=False)
    return gfeat, trans


if __name__ == "__main__":
    key = jax.random.PRNGKey(0)
    kx, kp = jax.random.split(key)

    B, N = 2, 500                  # small: batch=2, 500 points (pads to 512), 3 coords
    TILE_N = 128                   # exercises the tiled running-max reduction (4 tiles)
    x = jax.random.normal(kx, (B, 3, N), jnp.float32)
    params = build_params(kp)

    fwd = jax.jit(lambda inp: pointnetfeat_forward(inp, params, tile_n=TILE_N))
    gfeat, trans = fwd(x)
    jax.block_until_ready((gfeat, trans))

    g_ref, t_ref = ref_forward(x, params)
    assert gfeat.shape == (B, 1024) and trans.shape == (B, 3, 3)
    assert jnp.allclose(trans, t_ref, atol=3e-2, rtol=3e-2), "trans mismatch"
    assert jnp.allclose(gfeat, g_ref, atol=3e-2, rtol=3e-2), "global feature mismatch"

    print("KERNEL_OK")
</pallas_src>

<mosaic_0001>
module attributes {stable_mosaic.version = 11 : i64} {
  func.func @_stn_fc_kernel(%arg0: i32, %arg1: memref<2x1024xf32, #tpu.memory_space<vmem>>, %arg2: memref<1024x512xf32, #tpu.memory_space<vmem>>, %arg3: memref<1x512xf32, #tpu.memory_space<vmem>>, %arg4: memref<512x256xf32, #tpu.memory_space<vmem>>, %arg5: memref<1x256xf32, #tpu.memory_space<vmem>>, %arg6: memref<256x128xf32, #tpu.memory_space<vmem>>, %arg7: memref<1x128xf32, #tpu.memory_space<vmem>>, %arg8: memref<2x128xf32, #tpu.memory_space<vmem>>) attributes {dimension_semantics = [#tpu.dimension_semantics<arbitrary>], iteration_bounds = array<i64: 1>, scalar_prefetch = 0 : i64, scratch_operands = 0 : i64, tpu.core_type = #tpu.core_type<tc>, window_params = [{pipeline_mode = #tpu.pipeline_mode<synchronous>, transform_indices = @transform_0, window_bounds = array<i64: 2, 1024>}, {pipeline_mode = #tpu.pipeline_mode<synchronous>, transform_indices = @transform_1, window_bounds = array<i64: 1024, 512>}, {pipeline_mode = #tpu.pipeline_mode<synchronous>, transform_indices = @transform_2, window_bounds = array<i64: 1, 512>}, {pipeline_mode = #tpu.pipeline_mode<synchronous>, transform_indices = @transform_3, window_bounds = array<i64: 512, 256>}, {pipeline_mode = #tpu.pipeline_mode<synchronous>, transform_indices = @transform_4, window_bounds = array<i64: 1, 256>}, {pipeline_mode = #tpu.pipeline_mode<synchronous>, transform_indices = @transform_5, window_bounds = array<i64: 256, 128>}, {pipeline_mode = #tpu.pipeline_mode<synchronous>, transform_indices = @transform_6, window_bounds = array<i64: 1, 128>}, {pipeline_mode = #tpu.pipeline_mode<synchronous>, transform_indices = @transform_7, window_bounds = array<i64: 2, 128>}]} {
    %c0 = arith.constant 0 : index
    %c0_0 = arith.constant 0 : index
    %0 = vector.load %arg1[%c0, %c0_0] : memref<2x1024xf32, #tpu.memory_space<vmem>>, vector<2x1024xf32>
    %c0_1 = arith.constant 0 : index
    %c0_2 = arith.constant 0 : index
    %1 = vector.load %arg2[%c0_1, %c0_2] : memref<1024x512xf32, #tpu.memory_space<vmem>>, vector<1024x512xf32>
    %cst = arith.constant dense<0.000000e+00> : vector<2x512xf32>
    %2 = tpu.matmul %0, %1, %cst {dimension_numbers = #tpu.dot_dimension_numbers<[1], [0], [0], [1], [0, 0, 1, 1], [], []>} : vector<2x1024xf32>, vector<1024x512xf32>, vector<2x512xf32> -> vector<2x512xf32>
    %c0_3 = arith.constant 0 : index
    %c0_4 = arith.constant 0 : index
    %3 = vector.load %arg3[%c0_3, %c0_4] : memref<1x512xf32, #tpu.memory_space<vmem>>, vector<1x512xf32>
    %4 = vector.broadcast %3 : vector<1x512xf32> to vector<2x512xf32>
    %5 = arith.addf %2, %4 : vector<2x512xf32>
    %cst_5 = arith.constant 0.000000e+00 : f32
    %6 = vector.broadcast %cst_5 : f32 to vector<2x512xf32>
    %7 = arith.maximumf %5, %6 : vector<2x512xf32>
    %c0_6 = arith.constant 0 : index
    %c0_7 = arith.constant 0 : index
    %8 = vector.load %arg4[%c0_6, %c0_7] : memref<512x256xf32, #tpu.memory_space<vmem>>, vector<512x256xf32>
    %cst_8 = arith.constant dense<0.000000e+00> : vector<2x256xf32>
    %9 = tpu.matmul %7, %8, %cst_8 {dimension_numbers = #tpu.dot_dimension_numbers<[1], [0], [0], [1], [0, 0, 1, 1], [], []>} : vector<2x512xf32>, vector<512x256xf32>, vector<2x256xf32> -> vector<2x256xf32>
    %c0_9 = arith.constant 0 : index
    %c0_10 = arith.constant 0 : index
    %10 = vector.load %arg5[%c0_9, %c0_10] : memref<1x256xf32, #tpu.memory_space<vmem>>, vector<1x256xf32>
    %11 = vector.broadcast %10 : vector<1x256xf32> to vector<2x256xf32>
    %12 = arith.addf %9, %11 : vector<2x256xf32>
    %cst_11 = arith.constant 0.000000e+00 : f32
    %13 = vector.broadcast %cst_11 : f32 to vector<2x256xf32>
    %14 = arith.maximumf %12, %13 : vector<2x256xf32>
    %c0_12 = arith.constant 0 : index
    %c0_13 = arith.constant 0 : index
    %15 = vector.load %arg6[%c0_12, %c0_13] : memref<256x128xf32, #tpu.memory_space<vmem>>, vector<256x128xf32>
    %cst_14 = arith.constant dense<0.000000e+00> : vector<2x128xf32>
    %16 = tpu.matmul %14, %15, %cst_14 {dimension_numbers = #tpu.dot_dimension_numbers<[1], [0], [0], [1], [0, 0, 1, 1], [], []>} : vector<2x256xf32>, vector<256x128xf32>, vector<2x128xf32> -> vector<2x128xf32>
    %c0_15 = arith.constant 0 : index
    %c0_16 = arith.constant 0 : index
    %17 = vector.load %arg7[%c0_15, %c0_16] : memref<1x128xf32, #tpu.memory_space<vmem>>, vector<1x128xf32>
    %18 = vector.broadcast %17 : vector<1x128xf32> to vector<2x128xf32>
    %19 = arith.addf %16, %18 : vector<2x128xf32>
    %20 = tpu.iota {dimensions = array<i32: 1>} : vector<2x128xi32>
    %c4_i32 = arith.constant 4 : i32
    %c0_i32 = arith.constant 0 : i32
    %21 = arith.cmpi eq, %c4_i32, %c0_i32 : i32
    %c1_i32 = arith.constant 1 : i32
    %22 = arith.select %21, %c1_i32, %c4_i32 : i32
    %23 = vector.broadcast %22 : i32 to vector<2x128xi32>
    %24 = arith.remsi %20, %23 : vector<2x128xi32>
    %c0_i32_17 = arith.constant 0 : i32
    %25 = vector.broadcast %c0_i32_17 : i32 to vector<2x128xi32>
    %26 = arith.cmpi ne, %24, %25 : vector<2x128xi32>
    %c0_i32_18 = arith.constant 0 : i32
    %27 = vector.broadcast %c0_i32_18 : i32 to vector<2x128xi32>
    %28 = arith.cmpi slt, %24, %27 : vector<2x128xi32>
    %c0_i32_19 = arith.constant 0 : i32
    %29 = arith.cmpi slt, %22, %c0_i32_19 : i32
    %30 = vector.broadcast %29 : i1 to vector<2x128xi1>
    %31 = vector.broadcast %30 : vector<2x128xi1> to vector<2x128xi1>
    %32 = arith.xori %28, %31 : vector<2x128xi1>
    %33 = arith.andi %32, %26 : vector<2x128xi1>
    %34 = vector.broadcast %22 : i32 to vector<2x128xi32>
    %35 = arith.addi %24, %34 : vector<2x128xi32>
    %36 = arith.select %33, %35, %24 : vector<2x128xi1>, vector<2x128xi32>
    %c0_i32_20 = arith.constant 0 : i32
    %37 = vector.broadcast %c0_i32_20 : i32 to vector<2x128xi32>
    %38 = arith.cmpi eq, %36, %37 : vector<2x128xi32>
    %c9_i32 = arith.constant 9 : i32
    %39 = vector.broadcast %c9_i32 : i32 to vector<2x128xi32>
    %40 = arith.cmpi slt, %20, %39 : vector<2x128xi32>
    %41 = arith.andi %38, %40 : vector<2x128xi1>
    %cst_21 = arith.constant 1.000000e+00 : f32
    %cst_22 = arith.constant 0.000000e+00 : f32
    %42 = vector.broadcast %cst_21 : f32 to vector<2x128xf32>
    %43 = vector.broadcast %cst_22 : f32 to vector<2x128xf32>
    %44 = arith.select %41, %42, %43 : vector<2x128xi1>, vector<2x128xf32>
    %45 = arith.addf %19, %44 : vector<2x128xf32>
    %c0_23 = arith.constant 0 : index
    %c0_24 = arith.constant 0 : index
    %46 = vector.load %arg8[%c0_23, %c0_24] : memref<2x128xf32, #tpu.memory_space<vmem>>, vector<2x128xf32>
    tpu.vector_store %arg8[%c0_23, %c0_24], %45 {strides = array<i32>} : memref<2x128xf32, #tpu.memory_space<vmem>>, vector<2x128xf32>,
    return
  }
  func.func @transform_0(%arg0: i32) -> (i32, i32) {
    %c0_i32 = arith.constant 0 : i32
    %c0_i32_0 = arith.constant 0 : i32
    %c0_i32_1 = arith.constant 0 : i32
    return %c0_i32, %c0_i32_0 : i32, i32
  }
  func.func @transform_1(%arg0: i32) -> (i32, i32) {
    %c0_i32 = arith.constant 0 : i32
    %c0_i32_0 = arith.constant 0 : i32
    %c0_i32_1 = arith.constant 0 : i32
    return %c0_i32, %c0_i32_0 : i32, i32
  }
  func.func @transform_2(%arg0: i32) -> (i32, i32) {
    %c0_i32 = arith.constant 0 : i32
    %c0_i32_0 = arith.constant 0 : i32
    %c0_i32_1 = arith.constant 0 : i32
    return %c0_i32, %c0_i32_0 : i32, i32
  }
  func.func @transform_3(%arg0: i32) -> (i32, i32) {
    %c0_i32 = arith.constant 0 : i32
    %c0_i32_0 = arith.constant 0 : i32
    %c0_i32_1 = arith.constant 0 : i32
    return %c0_i32, %c0_i32_0 : i32, i32
  }
  func.func @transform_4(%arg0: i32) -> (i32, i32) {
    %c0_i32 = arith.constant 0 : i32
    %c0_i32_0 = arith.constant 0 : i32
    %c0_i32_1 = arith.constant 0 : i32
    return %c0_i32, %c0_i32_0 : i32, i32
  }
  func.func @transform_5(%arg0: i32) -> (i32, i32) {
    %c0_i32 = arith.constant 0 : i32
    %c0_i32_0 = arith.constant 0 : i32
    %c0_i32_1 = arith.constant 0 : i32
    return %c0_i32, %c0_i32_0 : i32, i32
  }
  func.func @transform_6(%arg0: i32) -> (i32, i32) {
    %c0_i32 = arith.constant 0 : i32
    %c0_i32_0 = arith.constant 0 : i32
    %c0_i32_1 = arith.constant 0 : i32
    return %c0_i32, %c0_i32_0 : i32, i32
  }
  func.func @transform_7(%arg0: i32) -> (i32, i32) {
    %c0_i32 = arith.constant 0 : i32
    %c0_i32_0 = arith.constant 0 : i32
    %c0_i32_1 = arith.constant 0 : i32
    return %c0_i32, %c0_i32_0 : i32, i32
  }
}

module attributes {stable_mosaic.version = 11 : i64} {
  func.func @_mlp_max_kernel(%arg0: i32, %arg1: i32, %arg2: memref<1x128x3xf32, #tpu.memory_space<vmem>>, %arg3: memref<1x3x64xbf16, #tpu.memory_space<vmem>>, %arg4: memref<1x64xf32, #tpu.memory_space<vmem>>, %arg5: memref<64x128xbf16, #tpu.memory_space<vmem>>, %arg6: memref<1x128xf32, #tpu.memory_space<vmem>>, %arg7: memref<128x1024xbf16, #tpu.memory_space<vmem>>, %arg8: memref<1x1024xf32, #tpu.memory_space<vmem>>, %arg9: memref<1x1x1024xf32, #tpu.memory_space<vmem>>) attributes {dimension_semantics = [#tpu.dimension_semantics<parallel>, #tpu.dimension_semantics<arbitrary>], iteration_bounds = array<i64: 2, 4>, scalar_prefetch = 0 : i64, scratch_operands = 0 : i64, tpu.core_type = #tpu.core_type<tc>, window_params = [{transform_indices = @transform_0, window_bounds = array<i64: 1, 128, 3>}, {transform_indices = @transform_1, window_bounds = array<i64: 1, 3, 64>}, {pipeline_mode = #tpu.pipeline_mode<synchronous>, transform_indices = @transform_2, window_bounds = array<i64: 1, 64>}, {pipeline_mode = #tpu.pipeline_mode<synchronous>, transform_indices = @transform_3, window_bounds = array<i64: 64, 128>}, {pipeline_mode = #tpu.pipeline_mode<synchronous>, transform_indices = @transform_4, window_bounds = array<i64: 1, 128>}, {pipeline_mode = #tpu.pipeline_mode<synchronous>, transform_indices = @transform_5, window_bounds = array<i64: 128, 1024>}, {pipeline_mode = #tpu.pipeline_mode<synchronous>, transform_indices = @transform_6, window_bounds = array<i64: 1, 1024>}, {transform_indices = @transform_7, window_bounds = array<i64: 1, 1, 1024>}]} {
    %c0_i32 = arith.constant 0 : i32
    %0 = arith.cmpi eq, %arg1, %c0_i32 : i32
    %1 = arith.extui %0 : i1 to i32
    %c0_i32_0 = arith.constant 0 : i32
    %2 = arith.cmpi ne, %1, %c0_i32_0 : i32
    scf.if %2 {
      %cst_28 = arith.constant 0xFF800000 : f32
      %38 = vector.broadcast %cst_28 : f32 to vector<1x1024xf32>
      %c0_29 = arith.constant 0 : index
      %c0_30 = arith.constant 0 : index
      %c0_31 = arith.constant 0 : index
      %39 = vector.load %arg9[%c0_29, %c0_30, %c0_31] : memref<1x1x1024xf32, #tpu.memory_space<vmem>>, vector<1x1x1024xf32>
      %40 = vector.shape_cast %39 : vector<1x1x1024xf32> to vector<1x1024xf32>
      %41 = vector.shape_cast %38 : vector<1x1024xf32> to vector<1x1x1024xf32>
      tpu.vector_store %arg9[%c0_29, %c0_30, %c0_31], %41 {strides = array<i32>} : memref<1x1x1024xf32, #tpu.memory_space<vmem>>, vector<1x1x1024xf32>,
    } else {
    }
    %c0 = arith.constant 0 : index
    %c0_1 = arith.constant 0 : index
    %c0_2 = arith.constant 0 : index
    %3 = vector.load %arg2[%c0, %c0_1, %c0_2] : memref<1x128x3xf32, #tpu.memory_space<vmem>>, vector<1x128x3xf32>
    %4 = vector.shape_cast %3 : vector<1x128x3xf32> to vector<128x3xf32>
    %5 = arith.truncf %4 : vector<128x3xf32> to vector<128x3xbf16>
    %c0_3 = arith.constant 0 : index
    %c0_4 = arith.constant 0 : index
    %c0_5 = arith.constant 0 : index
    %6 = vector.load %arg3[%c0_3, %c0_4, %c0_5] : memref<1x3x64xbf16, #tpu.memory_space<vmem>>, vector<1x3x64xbf16>
    %7 = vector.shape_cast %6 : vector<1x3x64xbf16> to vector<3x64xbf16>
    %cst = arith.constant dense<0.000000e+00> : vector<128x64xf32>
    %8 = tpu.matmul %5, %7, %cst {dimension_numbers = #tpu.dot_dimension_numbers<[1], [0], [0], [1], [0, 0, 1, 1], [], []>} : vector<128x3xbf16>, vector<3x64xbf16>, vector<128x64xf32> -> vector<128x64xf32>
    %c0_6 = arith.constant 0 : index
    %c0_7 = arith.constant 0 : index
    %9 = vector.load %arg4[%c0_6, %c0_7] : memref<1x64xf32, #tpu.memory_space<vmem>>, vector<1x64xf32>
    %10 = vector.broadcast %9 : vector<1x64xf32> to vector<128x64xf32>
    %11 = arith.addf %8, %10 : vector<128x64xf32>
    %cst_8 = arith.constant 0.000000e+00 : f32
    %12 = vector.broadcast %cst_8 : f32 to vector<128x64xf32>
    %13 = arith.maximumf %11, %12 : vector<128x64xf32>
    %14 = arith.truncf %13 : vector<128x64xf32> to vector<128x64xbf16>
    %c0_9 = arith.constant 0 : index
    %c0_10 = arith.constant 0 : index
    %15 = vector.load %arg5[%c0_9, %c0_10] : memref<64x128xbf16, #tpu.memory_space<vmem>>, vector<64x128xbf16>
    %cst_11 = arith.constant dense<0.000000e+00> : vector<128x128xf32>
    %16 = tpu.matmul %14, %15, %cst_11 {dimension_numbers = #tpu.dot_dimension_numbers<[1], [0], [0], [1], [0, 0, 1, 1], [], []>} : vector<128x64xbf16>, vector<64x128xbf16>, vector<128x128xf32> -> vector<128x128xf32>
    %c0_12 = arith.constant 0 : index
    %c0_13 = arith.constant 0 : index
    %17 = vector.load %arg6[%c0_12, %c0_13] : memref<1x128xf32, #tpu.memory_space<vmem>>, vector<1x128xf32>
    %18 = vector.broadcast %17 : vector<1x128xf32> to vector<128x128xf32>
    %19 = arith.addf %16, %18 : vector<128x128xf32>
    %cst_14 = arith.constant 0.000000e+00 : f32
    %20 = vector.broadcast %cst_14 : f32 to vector<128x128xf32>
    %21 = arith.maximumf %19, %20 : vector<128x128xf32>
    %22 = arith.truncf %21 : vector<128x128xf32> to vector<128x128xbf16>
    %c0_15 = arith.constant 0 : index
    %c0_16 = arith.constant 0 : index
    %23 = vector.load %arg7[%c0_15, %c0_16] : memref<128x1024xbf16, #tpu.memory_space<vmem>>, vector<128x1024xbf16>
    %cst_17 = arith.constant dense<0.000000e+00> : vector<128x1024xf32>
    %24 = tpu.matmul %22, %23, %cst_17 {dimension_numbers = #tpu.dot_dimension_numbers<[1], [0], [0], [1], [0, 0, 1, 1], [], []>} : vector<128x128xbf16>, vector<128x1024xbf16>, vector<128x1024xf32> -> vector<128x1024xf32>
    %c0_18 = arith.constant 0 : index
    %c0_19 = arith.constant 0 : index
    %25 = vector.load %arg8[%c0_18, %c0_19] : memref<1x1024xf32, #tpu.memory_space<vmem>>, vector<1x1024xf32>
    %26 = vector.broadcast %25 : vector<1x1024xf32> to vector<128x1024xf32>
    %27 = arith.addf %24, %26 : vector<128x1024xf32>
    %cst_20 = arith.constant 0.000000e+00 : f32
    %28 = vector.broadcast %cst_20 : f32 to vector<128x1024xf32>
    %29 = arith.maximumf %27, %28 : vector<128x1024xf32>
    %c0_21 = arith.constant 0 : index
    %c0_22 = arith.constant 0 : index
    %c0_23 = arith.constant 0 : index
    %30 = vector.load %arg9[%c0_21, %c0_22, %c0_23] : memref<1x1x1024xf32, #tpu.memory_space<vmem>>, vector<1x1x1024xf32>
    %31 = vector.shape_cast %30 : vector<1x1x1024xf32> to vector<1x1024xf32>
    %cst_24 = arith.constant dense<0xFF800000> : vector<1024xf32>
    %32 = vector.multi_reduction <maximumf>, %29, %cst_24 [0] : vector<128x1024xf32> to vector<1024xf32>
    %33 = vector.shape_cast %32 : vector<1024xf32> to vector<1x1024xf32>
    %34 = arith.maximumf %31, %33 : vector<1x1024xf32>
    %c0_25 = arith.constant 0 : index
    %c0_26 = arith.constant 0 : index
    %c0_27 = arith.constant 0 : index
    %35 = vector.load %arg9[%c0_25, %c0_26, %c0_27] : memref<1x1x1024xf32, #tpu.memory_space<vmem>>, vector<1x1x1024xf32>
    %36 = vector.shape_cast %35 : vector<1x1x1024xf32> to vector<1x1024xf32>
    %37 = vector.shape_cast %34 : vector<1x1024xf32> to vector<1x1x1024xf32>
    tpu.vector_store %arg9[%c0_25, %c0_26, %c0_27], %37 {strides = array<i32>} : memref<1x1x1024xf32, #tpu.memory_space<vmem>>, vector<1x1x1024xf32>,
    return
  }
  func.func @transform_0(%arg0: i32, %arg1: i32) -> (i32, i32, i32) {
    %c0_i32 = arith.constant 0 : i32
    %c0_i32_0 = arith.constant 0 : i32
    return %arg0, %arg1, %c0_i32 : i32, i32, i32
  }
  func.func @transform_1(%arg0: i32, %arg1: i32) -> (i32, i32, i32) {
    %c0_i32 = arith.constant 0 : i32
    %c0_i32_0 = arith.constant 0 : i32
    %c0_i32_1 = arith.constant 0 : i32
    return %arg0, %c0_i32, %c0_i32_0 : i32, i32, i32
  }
  func.func @transform_2(%arg0: i32, %arg1: i32) -> (i32, i32) {
    %c0_i32 = arith.constant 0 : i32
    %c0_i32_0 = arith.constant 0 : i32
    %c0_i32_1 = arith.constant 0 : i32
    return %c0_i32, %c0_i32_0 : i32, i32
  }
  func.func @transform_3(%arg0: i32, %arg1: i32) -> (i32, i32) {
    %c0_i32 = arith.constant 0 : i32
    %c0_i32_0 = arith.constant 0 : i32
    %c0_i32_1 = arith.constant 0 : i32
    return %c0_i32, %c0_i32_0 : i32, i32
  }
  func.func @transform_4(%arg0: i32, %arg1: i32) -> (i32, i32) {
    %c0_i32 = arith.constant 0 : i32
    %c0_i32_0 = arith.constant 0 : i32
    %c0_i32_1 = arith.constant 0 : i32
    return %c0_i32, %c0_i32_0 : i32, i32
  }
  func.func @transform_5(%arg0: i32, %arg1: i32) -> (i32, i32) {
    %c0_i32 = arith.constant 0 : i32
    %c0_i32_0 = arith.constant 0 : i32
    %c0_i32_1 = arith.constant 0 : i32
    return %c0_i32, %c0_i32_0 : i32, i32
  }
  func.func @transform_6(%arg0: i32, %arg1: i32) -> (i32, i32) {
    %c0_i32 = arith.constant 0 : i32
    %c0_i32_0 = arith.constant 0 : i32
    %c0_i32_1 = arith.constant 0 : i32
    return %c0_i32, %c0_i32_0 : i32, i32
  }
  func.func @transform_7(%arg0: i32, %arg1: i32) -> (i32, i32, i32) {
    %c0_i32 = arith.constant 0 : i32
    %c0_i32_0 = arith.constant 0 : i32
    %c0_i32_1 = arith.constant 0 : i32
    return %arg0, %c0_i32, %c0_i32_0 : i32, i32, i32
  }
}

module attributes {stable_mosaic.version = 11 : i64} {
  func.func @_mlp_max_kernel(%arg0: i32, %arg1: i32, %arg2: memref<1x128x3xf32, #tpu.memory_space<vmem>>, %arg3: memref<1x3x64xbf16, #tpu.memory_space<vmem>>, %arg4: memref<1x64xf32, #tpu.memory_space<vmem>>, %arg5: memref<64x128xbf16, #tpu.memory_space<vmem>>, %arg6: memref<1x128xf32, #tpu.memory_space<vmem>>, %arg7: memref<128x1024xbf16, #tpu.memory_space<vmem>>, %arg8: memref<1x1024xf32, #tpu.memory_space<vmem>>, %arg9: memref<1x1x1024xf32, #tpu.memory_space<vmem>>) attributes {dimension_semantics = [#tpu.dimension_semantics<parallel>, #tpu.dimension_semantics<arbitrary>], iteration_bounds = array<i64: 2, 4>, scalar_prefetch = 0 : i64, scratch_operands = 0 : i64, tpu.core_type = #tpu.core_type<tc>, window_params = [{transform_indices = @transform_0, window_bounds = array<i64: 1, 128, 3>}, {transform_indices = @transform_1, window_bounds = array<i64: 1, 3, 64>}, {pipeline_mode = #tpu.pipeline_mode<synchronous>, transform_indices = @transform_2, window_bounds = array<i64: 1, 64>}, {pipeline_mode = #tpu.pipeline_mode<synchronous>, transform_indices = @transform_3, window_bounds = array<i64: 64, 128>}, {pipeline_mode = #tpu.pipeline_mode<synchronous>, transform_indices = @transform_4, window_bounds = array<i64: 1, 128>}, {pipeline_mode = #tpu.pipeline_mode<synchronous>, transform_indices = @transform_5, window_bounds = array<i64: 128, 1024>}, {pipeline_mode = #tpu.pipeline_mode<synchronous>, transform_indices = @transform_6, window_bounds = array<i64: 1, 1024>}, {transform_indices = @transform_7, window_bounds = array<i64: 1, 1, 1024>}]} {
    %c0_i32 = arith.constant 0 : i32
    %0 = arith.cmpi eq, %arg1, %c0_i32 : i32
    %1 = arith.extui %0 : i1 to i32
    %c0_i32_0 = arith.constant 0 : i32
    %2 = arith.cmpi ne, %1, %c0_i32_0 : i32
    scf.if %2 {
      %cst_27 = arith.constant 0xFF800000 : f32
      %36 = vector.broadcast %cst_27 : f32 to vector<1x1024xf32>
      %c0_28 = arith.constant 0 : index
      %c0_29 = arith.constant 0 : index
      %c0_30 = arith.constant 0 : index
      %37 = vector.load %arg9[%c0_28, %c0_29, %c0_30] : memref<1x1x1024xf32, #tpu.memory_space<vmem>>, vector<1x1x1024xf32>
      %38 = vector.shape_cast %37 : vector<1x1x1024xf32> to vector<1x1024xf32>
      %39 = vector.shape_cast %36 : vector<1x1024xf32> to vector<1x1x1024xf32>
      tpu.vector_store %arg9[%c0_28, %c0_29, %c0_30], %39 {strides = array<i32>} : memref<1x1x1024xf32, #tpu.memory_space<vmem>>, vector<1x1x1024xf32>,
    } else {
    }
    %c0 = arith.constant 0 : index
    %c0_1 = arith.constant 0 : index
    %c0_2 = arith.constant 0 : index
    %3 = vector.load %arg2[%c0, %c0_1, %c0_2] : memref<1x128x3xf32, #tpu.memory_space<vmem>>, vector<1x128x3xf32>
    %4 = vector.shape_cast %3 : vector<1x128x3xf32> to vector<128x3xf32>
    %5 = arith.truncf %4 : vector<128x3xf32> to vector<128x3xbf16>
    %c0_3 = arith.constant 0 : index
    %c0_4 = arith.constant 0 : index
    %c0_5 = arith.constant 0 : index
    %6 = vector.load %arg3[%c0_3, %c0_4, %c0_5] : memref<1x3x64xbf16, #tpu.memory_space<vmem>>, vector<1x3x64xbf16>
    %7 = vector.shape_cast %6 : vector<1x3x64xbf16> to vector<3x64xbf16>
    %cst = arith.constant dense<0.000000e+00> : vector<128x64xf32>
    %8 = tpu.matmul %5, %7, %cst {dimension_numbers = #tpu.dot_dimension_numbers<[1], [0], [0], [1], [0, 0, 1, 1], [], []>} : vector<128x3xbf16>, vector<3x64xbf16>, vector<128x64xf32> -> vector<128x64xf32>
    %c0_6 = arith.constant 0 : index
    %c0_7 = arith.constant 0 : index
    %9 = vector.load %arg4[%c0_6, %c0_7] : memref<1x64xf32, #tpu.memory_space<vmem>>, vector<1x64xf32>
    %10 = vector.broadcast %9 : vector<1x64xf32> to vector<128x64xf32>
    %11 = arith.addf %8, %10 : vector<128x64xf32>
    %cst_8 = arith.constant 0.000000e+00 : f32
    %12 = vector.broadcast %cst_8 : f32 to vector<128x64xf32>
    %13 = arith.maximumf %11, %12 : vector<128x64xf32>
    %14 = arith.truncf %13 : vector<128x64xf32> to vector<128x64xbf16>
    %c0_9 = arith.constant 0 : index
    %c0_10 = arith.constant 0 : index
    %15 = vector.load %arg5[%c0_9, %c0_10] : memref<64x128xbf16, #tpu.memory_space<vmem>>, vector<64x128xbf16>
    %cst_11 = arith.constant dense<0.000000e+00> : vector<128x128xf32>
    %16 = tpu.matmul %14, %15, %cst_11 {dimension_numbers = #tpu.dot_dimension_numbers<[1], [0], [0], [1], [0, 0, 1, 1], [], []>} : vector<128x64xbf16>, vector<64x128xbf16>, vector<128x128xf32> -> vector<128x128xf32>
    %c0_12 = arith.constant 0 : index
    %c0_13 = arith.constant 0 : index
    %17 = vector.load %arg6[%c0_12, %c0_13] : memref<1x128xf32, #tpu.memory_space<vmem>>, vector<1x128xf32>
    %18 = vector.broadcast %17 : vector<1x128xf32> to vector<128x128xf32>
    %19 = arith.addf %16, %18 : vector<128x128xf32>
    %cst_14 = arith.constant 0.000000e+00 : f32
    %20 = vector.broadcast %cst_14 : f32 to vector<128x128xf32>
    %21 = arith.maximumf %19, %20 : vector<128x128xf32>
    %22 = arith.truncf %21 : vector<128x128xf32> to vector<128x128xbf16>
    %c0_15 = arith.constant 0 : index
    %c0_16 = arith.constant 0 : index
    %23 = vector.load %arg7[%c0_15, %c0_16] : memref<128x1024xbf16, #tpu.memory_space<vmem>>, vector<128x1024xbf16>
    %cst_17 = arith.constant dense<0.000000e+00> : vector<128x1024xf32>
    %24 = tpu.matmul %22, %23, %cst_17 {dimension_numbers = #tpu.dot_dimension_numbers<[1], [0], [0], [1], [0, 0, 1, 1], [], []>} : vector<128x128xbf16>, vector<128x1024xbf16>, vector<128x1024xf32> -> vector<128x1024xf32>
    %c0_18 = arith.constant 0 : index
    %c0_19 = arith.constant 0 : index
    %25 = vector.load %arg8[%c0_18, %c0_19] : memref<1x1024xf32, #tpu.memory_space<vmem>>, vector<1x1024xf32>
    %26 = vector.broadcast %25 : vector<1x1024xf32> to vector<128x1024xf32>
    %27 = arith.addf %24, %26 : vector<128x1024xf32>
    %c0_20 = arith.constant 0 : index
    %c0_21 = arith.constant 0 : index
    %c0_22 = arith.constant 0 : index
    %28 = vector.load %arg9[%c0_20, %c0_21, %c0_22] : memref<1x1x1024xf32, #tpu.memory_space<vmem>>, vector<1x1x1024xf32>
    %29 = vector.shape_cast %28 : vector<1x1x1024xf32> to vector<1x1024xf32>
    %cst_23 = arith.constant dense<0xFF800000> : vector<1024xf32>
    %30 = vector.multi_reduction <maximumf>, %27, %cst_23 [0] : vector<128x1024xf32> to vector<1024xf32>
    %31 = vector.shape_cast %30 : vector<1024xf32> to vector<1x1024xf32>
    %32 = arith.maximumf %29, %31 : vector<1x1024xf32>
    %c0_24 = arith.constant 0 : index
    %c0_25 = arith.constant 0 : index
    %c0_26 = arith.constant 0 : index
    %33 = vector.load %arg9[%c0_24, %c0_25, %c0_26] : memref<1x1x1024xf32, #tpu.memory_space<vmem>>, vector<1x1x1024xf32>
    %34 = vector.shape_cast %33 : vector<1x1x1024xf32> to vector<1x1024xf32>
    %35 = vector.shape_cast %32 : vector<1x1024xf32> to vector<1x1x1024xf32>
    tpu.vector_store %arg9[%c0_24, %c0_25, %c0_26], %35 {strides = array<i32>} : memref<1x1x1024xf32, #tpu.memory_space<vmem>>, vector<1x1x1024xf32>,
    return
  }
  func.func @transform_0(%arg0: i32, %arg1: i32) -> (i32, i32, i32) {
    %c0_i32 = arith.constant 0 : i32
    %c0_i32_0 = arith.constant 0 : i32
    return %arg0, %arg1, %c0_i32 : i32, i32, i32
  }
  func.func @transform_1(%arg0: i32, %arg1: i32) -> (i32, i32, i32) {
    %c0_i32 = arith.constant 0 : i32
    %c0_i32_0 = arith.constant 0 : i32
    %c0_i32_1 = arith.constant 0 : i32
    return %arg0, %c0_i32, %c0_i32_0 : i32, i32, i32
  }
  func.func @transform_2(%arg0: i32, %arg1: i32) -> (i32, i32) {
    %c0_i32 = arith.constant 0 : i32
    %c0_i32_0 = arith.constant 0 : i32
    %c0_i32_1 = arith.constant 0 : i32
    return %c0_i32, %c0_i32_0 : i32, i32
  }
  func.func @transform_3(%arg0: i32, %arg1: i32) -> (i32, i32) {
    %c0_i32 = arith.constant 0 : i32
    %c0_i32_0 = arith.constant 0 : i32
    %c0_i32_1 = arith.constant 0 : i32
    return %c0_i32, %c0_i32_0 : i32, i32
  }
  func.func @transform_4(%arg0: i32, %arg1: i32) -> (i32, i32) {
    %c0_i32 = arith.constant 0 : i32
    %c0_i32_0 = arith.constant 0 : i32
    %c0_i32_1 = arith.constant 0 : i32
    return %c0_i32, %c0_i32_0 : i32, i32
  }
  func.func @transform_5(%arg0: i32, %arg1: i32) -> (i32, i32) {
    %c0_i32 = arith.constant 0 : i32
    %c0_i32_0 = arith.constant 0 : i32
    %c0_i32_1 = arith.constant 0 : i32
    return %c0_i32, %c0_i32_0 : i32, i32
  }
  func.func @transform_6(%arg0: i32, %arg1: i32) -> (i32, i32) {
    %c0_i32 = arith.constant 0 : i32
    %c0_i32_0 = arith.constant 0 : i32
    %c0_i32_1 = arith.constant 0 : i32
    return %c0_i32, %c0_i32_0 : i32, i32
  }
  func.func @transform_7(%arg0: i32, %arg1: i32) -> (i32, i32, i32) {
    %c0_i32 = arith.constant 0 : i32
    %c0_i32_0 = arith.constant 0 : i32
    %c0_i32_1 = arith.constant 0 : i32
    return %arg0, %c0_i32, %c0_i32_0 : i32, i32, i32
  }
}

</mosaic_0001>

<bundles_post_ra>
// kernel: _lambda_.3
= control target key start
LH: loop header
LB: loop body
LE: loop exit
PB: predicated region body
PF: predicated region fallthrough
CT: control target
= control target key end

     0   :  { %12 = vsyncpa [#allocation3], 0  ;;  %s3123_s0 = inlined_call_operand.vmem [shape: f32[2,512,3], index: 0, kind: input, shape index: {}]   ;;  %s3124_s1 = inlined_call_operand.vmem [shape: bf16[2,3,64], index: 1, kind: input, shape index: {}]   ;;  %s3125_s2 = inlined_call_operand.hbm [shape: f32[1,64], index: 2, kind: input, shape index: {}]   ;;  %s3126_s3 = inlined_call_operand.hbm [shape: bf16[64,128], index: 3, kind: input, shape index: {}]   ;;  %s3127_s4 = inlined_call_operand.hbm [shape: f32[1,128], index: 4, kind: input, shape index: {}]   ;;  %s3128_s5 = inlined_call_operand.hbm [shape: bf16[128,1024], index: 5, kind: input, shape index: {}]   ;;  %s3129_s6 = inlined_call_operand.hbm [shape: f32[1,1024], index: 6, kind: input, shape index: {}]   ;;  %s3130_s7 = inlined_call_operand.vmem [shape: f32[2,1,1024], index: 7, kind: output, shape index: {}]  }
   0x1   :  { %13 = vsyncpa [#allocation5], 0 }
   0x2   :  { %14 = vsyncpa [#allocation8], 0  ;;  %s2643_s24 = smov 0   ;;  %s2645_s25 = smov 0  }
   0x3   :  { %s2647_s26 = smov 0   ;;  %s2649_s27 = smov 0  }
   0x4   :  { %s2651_s28 = smov 0  }
   0x5 LB: > { %s2590_s29 = smov [#allocation4]   ;;  %s2133_s8 = sadd.s32 4294967295, %s2588_s28   ;;  %s2588_s28 = sphi %s2651_s28, %s20_s28   ;;  %s2584_s27 = sphi %s2649_s27, %s3138_s27   ;;  %s2580_s26 = sphi %s2647_s26, %s3137_s26   ;;  %s2576_s25 = sphi %s2645_s25, %s3136_s25   ;;  %s2572_s24 = sphi %s2643_s24, %s3135_s24  }
   0x6   : > { %s245_s30 = sshll.u32 %s2590_s29, 4  ;;  %p2135_p0 = scmp.ge.s32.totalorder %s2588_s28, 1  ;;  %s246_s30 = int_to_ptr.vmem [resolvable:$true] %s245_s30 }
   0x7   : > { %p222_p1 = scmp.lt.s32.totalorder %s2588_s28, 9  ;;  %p2671_p2 = scmp.eq.s32.totalorder %s2133_s8, 0 }
   0x8   : > { %s2591_s11 = smov [#allocation7]   ;;  %s2419_s15 = scalar_lea.vmem %s246_s30, 512 }
   0x9   : > { %p2675_p3 = pnand %p2135_p0, %p222_p1  ;;  %s269_s12 = sshll.u32 %s2591_s11, 4  ;;  %s2681_s12 = int_to_ptr.vmem [resolvable:$true] %s269_s12 }
   0xa   : > { %p2420_p7 = scmp.ne.s32.totalorder %s246_s30, %s2419_s15  ;;  %p2427_p10 = scmp.lt.s32.totalorder %s246_s30, %s246_s30 }
   0xb   : > { %p2325_p4 = pneg %p2675_p3  ;;  %p2428_p11 = scmp.lt.s32.totalorder %s2419_s15, %s2419_s15 }
   0xd   : > { %p2685_p5 = pnand %p2671_p2, %p2325_p4  ;;  %p2429_p12 = por %p2428_p11, %p2427_p10 }
   0xf   : > { %p2691_p6 = pneg %p2685_p5 }
  0x11   : > { %p2422_p8 = pnand %p2420_p7, %p2691_p6 }
  0x13   : > { %p2423_p9 = pneg %p2422_p8 }
  0x15   : > { %p2430_p13 = pnand %p2429_p12, %p2423_p9 }
  0x17   : > { %2433 = shalt.err (!%p2430_p13)
}
  0x18   : > { %s2592_s16 = smov 64   ;;  %s2593_s17 = smov 4  }
  0x19   : > { %2331 = dma.hbm_to_vmem [thread:$0]  (!%p2685_p5), %s3126_s3, 512, %s246_s30, [#allocation5], %s2592_s16, %s2592_s16, %s2593_s17  }
  0x1a   : > { %s2445_s20 = scalar_lea.vmem %s2681_s12, 8192  ;;  %p2453_p7 = scmp.lt.s32.totalorder %s2681_s12, %s2681_s12 }
  0x1b   : > { %p2446_p0 = scmp.ne.s32.totalorder %s2681_s12, %s2445_s20  ;;  %p2454_p8 = scmp.lt.s32.totalorder %s2445_s20, %s2445_s20 }
  0x1d   : > { %p2448_p1 = pnand %p2446_p0, %p2691_p6  ;;  %p2455_p9 = por %p2454_p8, %p2453_p7 }
  0x1f   : > { %p2449_p4 = pneg %p2448_p1 }
  0x21   : > { %p2456_p10 = pnand %p2455_p9, %p2449_p4 }
  0x23   : > { %2459 = shalt.err (!%p2456_p10)
}
  0x24   : > { %s2594_s21 = smov 512   ;;  %s2595_s22 = smov 32  }
  0x25   : > { %2337 = dma.hbm_to_vmem [thread:$0]  (!%p2685_p5), %s3128_s5, 8192, %s2681_s12, [#allocation8], %s2594_s21, %s2594_s21, %s2595_s22  }
  0x26   : > { %s29_s30 = sadd.s32 1, %s2580_s26  ;;  %s32_s8 = sadd.s32 1, %s2584_s27 }
  0x27   : > { %p30_p11 = scmp.ge.s32.totalorder %s29_s30, 4  ;;  %s2596_s11 = smov [#allocation2]  }
  0x28   : > { %s235_s15 = sshll.u32 %s2596_s11, 4  ;;  %s2597_s16 = smov [#allocation6]   ;;  %s236_s15 = int_to_ptr.vmem [resolvable:$true] %s235_s15 }
  0x29   : > { %s3140_s30 = smov (%p30_p11, %s29_s30), 0  ;;  %s3142_s8 = smov (!%p30_p11, %s32_s8), %s2584_s27 }
  0x2a   : > { %s259_s17 = sshll.u32 %s2597_s16, 4  ;;  %p34_p12 = scmp.ge.s32.totalorder %s3142_s8, 2  ;;  %s260_s17 = int_to_ptr.vmem [resolvable:$true] %s259_s17 }
  0x2b   : > { %s2471_s18 = scalar_lea.vmem %s236_s15, 16  ;;  %s2478_s19 = scalar_lea.vmem %s236_s15, 32 }
  0x2c   : > { %p2472_p13 = scmp.ne.s32.totalorder %s236_s15, %s2471_s18  ;;  %p2479_p4 = scmp.lt.s32.totalorder %s236_s15, %s236_s15 }
  0x2d   : > { %p2480_p7 = scmp.lt.s32.totalorder %s2478_s19, %s2471_s18 }
  0x2e   : > { %p2474_p0 = pnand %p2472_p13, %p2691_p6 }
  0x2f   : > { %p2481_p8 = por %p2480_p7, %p2479_p4 }
  0x30   : > { %p2475_p1 = pneg %p2474_p0 }
  0x32   : > { %p2482_p9 = pnand %p2481_p8, %p2475_p1 }
  0x34   : > { %2485 = shalt.err (!%p2482_p9)
}
  0x35   : > { %2328 = dma.hbm_to_vmem [thread:$0]  (!%p2685_p5), %s3125_s2, 16, %s236_s15, [#allocation3]  }
  0x36   : > { %s3144_s8 = smov (%p34_p12, %s3142_s8), 0  ;;  %s2497_s21 = scalar_lea.vmem %s260_s17, 16 }
  0x37   : > { %p2498_p10 = scmp.ne.s32.totalorder %s260_s17, %s2497_s21  ;;  %s2504_s22 = scalar_lea.vmem %s260_s17, 32 }
  0x38   : > { %p2505_p0 = scmp.lt.s32.totalorder %s260_s17, %s260_s17  ;;  %p2506_p4 = scmp.lt.s32.totalorder %s2504_s22, %s2497_s21 }
  0x39   : > { %p2500_p11 = pnand %p2498_p10, %p2691_p6 }
  0x3a   : > { %p2507_p1 = por %p2506_p4, %p2505_p0 }
  0x3b   : > { %p2501_p13 = pneg %p2500_p11 }
  0x3d   : > { %p2508_p7 = pnand %p2507_p1, %p2501_p13 }
  0x3f   : > { %2511 = shalt.err (!%p2508_p7)
}
  0x40   : > { %2334 = dma.hbm_to_vmem [thread:$0]  (!%p2685_p5), %s3127_s4, 16, %s260_s17, [#allocation5]  }
  0x41   : > { %s2598_s11 = smov [#allocation9]  }
  0x42   : > { %s283_s15 = sshll.u32 %s2598_s11, 4  ;;  %s284_s15 = int_to_ptr.vmem [resolvable:$true] %s283_s15 }
  0x43   : > { %s2523_s16 = scalar_lea.vmem %s284_s15, 128  ;;  %p2531_p10 = scmp.lt.s32.totalorder %s284_s15, %s284_s15 }
  0x44   : > { %p2524_p12 = scmp.ne.s32.totalorder %s284_s15, %s2523_s16  ;;  %p2532_p11 = scmp.lt.s32.totalorder %s2523_s16, %s2523_s16 }
  0x46   : > { %p2526_p8 = pnand %p2524_p12, %p2691_p6  ;;  %p2533_p0 = por %p2532_p11, %p2531_p10 }
  0x48   : > { %p2527_p9 = pneg %p2526_p8 }
  0x4a   : > { %p2534_p13 = pnand %p2533_p0, %p2527_p9 }
  0x4c   : > { %2537 = shalt.err (!%p2534_p13)
}
  0x4d   : > { %2340 = dma.hbm_to_vmem [thread:$0]  (!%p2685_p5), %s3129_s6, 128, %s284_s15, [#allocation8]  }
  0x4e   : > { %316 = sbr.rel (%p2675_p3) target bundleno = 872 (0x368), region = 48 }
  0x53   : > { %2559 = dma.done.wait (%p2671_p2), [#allocation3], 16  }
  0x54   : > { %2561 = vsyncadd (%p2671_p2), [#allocation3], 4294967280 }
  0x55   : > { %2563 = dma.done.wait (%p2671_p2), [#allocation5], 528  }
  0x56   : > { %2565 = vsyncadd (%p2671_p2), [#allocation5], 4294966768 }
  0x57   : > { %2567 = dma.done.wait (%p2671_p2), [#allocation8], 8320  }
  0x58   : > { %2569 = vsyncadd (%p2671_p2), [#allocation8], 4294958976  ;;  %s2148_s10 = sshll.u32 %s2572_s24, 4  ;;  %p372_p3 = scmp.lt.s32.totalorder %s2576_s25, 1 }
  0x59   : > { %p374_p5 = scmp.lt.s32.totalorder %s2148_s10, 63  ;;  %p2153_p2 = scmp.ne.s32.totalorder %s2572_s24, 0 }
  0x5a   : > { %s3146_s25 = smov (!%p372_p3, %s2576_s25), 1 }
  0x5b   : > { %s3148_s10 = smov (!%p374_p5, %s2148_s10), 63  ;;  %s2149_s13 = sshll.u32 %s3146_s25, 6 }
  0x5c   : > { %s2151_s14 = sshll.u32 %s3146_s25, 1  ;;  %s377_s17 = sadd.s32 %s2149_s13, %s3148_s10 }
  0x5d   : > { %s384_s21 = scalar_lea.vmem %s3124_s1, %s2151_s14  ;;  %s2150_s22 = sshll.u32 %s377_s17, 3 }
  0x5e   : > { %s2152_s23 = sshll.u32 %s3146_s25, 3  ;;  %s2765_s11 = scalar_lea.vmem %s3123_s0, %s2150_s22 }
  0x5f   : > { %s2770_s18 = scalar_lea.vmem %s3130_s7, %s2152_s23  ;;  %393 = sbr.rel (%p2153_p2) target bundleno = 102 (0x66), region = 72 }
  0x64   : > { %v2599_v0 = vmov -inf  }
  0x65   : > { %394 = vst [vmem:[%s2770_s18] sm:$0xff] %v2599_v0 }
  0x66 PF: > { %v419_v1 = vld [vmem:[%s384_s21] sm:$0x3]  ;;  %vm452_vm0 = vcmask 1040384   ;;  %vm453_vm1 = vcmask 1041408   ;;  %v2600_v3 = vmov 65535   ;;  %v396_v5 = vld [vmem:[%s2765_s11 + $0x8] sm:$0xff] }
  0x67   : > { %v395_v2 = vld [vmem:[%s2765_s11] sm:$0xff]  ;;  %v454_v4 = vsel %vm452_vm0, 4294967295, %v2600_v3  ;;  %vm427_vm2 = vcmask 23552   ;;  %v397_v8 = vld [vmem:[%s2765_s11 + $0x10] sm:$0xff]  ;;  %v398_v9 = vld [vmem:[%s2765_s11 + $0x18] sm:$0xff]  ;;  %vm619_vm3 = vcmask 523264  }
  0x68   : > { %v455_v6 = vsel %vm453_vm1, %v454_v4, 0  ;;  %v411_v7 = vpack.c.bf16 %v396_v5, %v395_v2  ;;  %v399_v11 = vld [vmem:[%s2765_s11 + $0x20] sm:$0xff]  ;;  %v400_v12 = vld [vmem:[%s2765_s11 + $0x28] sm:$0xff]  ;;  %v412_v13 = vpack.c.bf16 %v398_v9, %v397_v8  ;;  %v401_v16 = vld [vmem:[%s2765_s11 + $0x30] sm:$0xff] }
  0x69   : > { %v457_v10 = vand.u32 %v455_v6, %v419_v1  ;;  %v413_v14 = vpack.c.bf16 %v400_v12, %v399_v11  ;;  %v2404_v15 = vld [vmem:[#allocation4 + $0x18] sm:$0xff]   ;;  %v404_v19 = vld [vmem:[%s2765_s11 + $0x48] sm:$0xff]  ;;  %v405_v22 = vld [vmem:[%s2765_s11 + $0x50] sm:$0xff] }
  0x6a   : > { %2265 = vmatprep.mubr.msk.bf16.mxu0 %vm427_vm2, %v411_v7  ;;  %2281 = vmatprep.subr.bf16.mxu1 %v2404_v15  ;;  %v402_v17 = vld [vmem:[%s2765_s11 + $0x38] sm:$0xff]  ;;  %v403_v18 = vld [vmem:[%s2765_s11 + $0x40] sm:$0xff]  ;;  %v408_v25 = vld [vmem:[%s2765_s11 + $0x68] sm:$0xff] }
  0x6b   : > { %2263 = vmatprep.subr.bf16.mxu0 %v457_v10  ;;  %2282 = vmatpush3.bf16.msra.mxu1 %v2404_v15  ;;  %v414_v20 = vpack.c.bf16 %v402_v17, %v401_v16  ;;  %v415_v21 = vpack.c.bf16 %v404_v19, %v403_v18  ;;  %v406_v23 = vld [vmem:[%s2765_s11 + $0x58] sm:$0xff]  ;;  %v407_v24 = vld [vmem:[%s2765_s11 + $0x60] sm:$0xff]  ;;  %v409_v28 = vld [vmem:[%s2765_s11 + $0x70] sm:$0xff] }
  0x6c   : > { %2264 = vmatpush3.bf16.msra.mxu0 %v457_v10  ;;  %v416_v26 = vpack.c.bf16 %v406_v23, %v405_v22  ;;  %v417_v27 = vpack.c.bf16 %v408_v25, %v407_v24  ;;  %v410_v29 = vld [vmem:[%s2765_s11 + $0x78] sm:$0xff]  ;;  %v2406_v32 = vld [vmem:[#allocation4 + $0x8] sm:$0xff]   ;;  %v2407_v33 = vld [vmem:[#allocation4] sm:$0xff]  }
  0x6d   : > { %v418_v30 = vpack.c.bf16 %v410_v29, %v409_v28  ;;  %v2405_v31 = vld [vmem:[#allocation4 + $0x10] sm:$0xff]   ;;  %v821_v34 = vld [vmem:[#allocation7 + $0x1c0] sm:$0xff]  ;;  %v2806_v60 = vld [vmem:[#allocation2] ss:$0 sm:$0xff] }
  0x6e   : > { %2283 = vmatprep.subr.bf16.mxu1 %v2405_v31  ;;  %v825_v35 = vld [vmem:[#allocation7 + $0x1e0] sm:$0xff]  ;;  %v2798_v36 = vld [vmem:[#allocation7 + $0x1c8] sm:$0xff] }
  0x6f   : > { %2266 = vmatmul.mubr.msk.bf16.vlgmr.msra.gmra.mxu0 %vm427_vm2, %v412_v13  ;;  %2284 = vmatpush3.bf16.msra.mxu1 %v2405_v31  ;;  %v2232_v37 = vcombine.low %v821_v34, %v825_v35  ;;  %v2233_v38 = vcombine.high %v821_v34, %v825_v35  ;;  %v2800_v39 = vld [vmem:[#allocation7 + $0x1e8] sm:$0xff]  ;;  %v813_v40 = vld [vmem:[#allocation7 + $0x180] sm:$0xff] }
  0x70   : > { %2269 = vmatprep.mubr.msk.bf16.mxu0 %vm427_vm2, %v413_v14  ;;  %2285 = vmatprep.subr.bf16.mxu1 %v2406_v32  ;;  %v817_v41 = vld [vmem:[#allocation7 + $0x1a0] sm:$0xff]  ;;  %v2234_v42 = vcombine.low %v2798_v36, %v2800_v39  ;;  %v2235_v43 = vcombine.high %v2798_v36, %v2800_v39  ;;  %v814_v7 = vld [vmem:[#allocation7 + $0x188] sm:$0xff] }
  0x71   : > { %v2225_v44 = vcombine.high %v813_v40, %v817_v41  ;;  %v805_v45 = vld [vmem:[#allocation7 + $0x140] sm:$0xff]  ;;  %1191 = vmatprep.subr.bf16.mxu0 %v2233_v38  ;;  %v2224_v47 = vcombine.low %v813_v40, %v817_v41  ;;  %v818_v8 = vld [vmem:[#allocation7 + $0x1a8] sm:$0xff] }
  0x72   : > { %v809_v46 = vld [vmem:[#allocation7 + $0x160] sm:$0xff]  ;;  %1192 = vmatpush1.bf16.msra.mxu0 %v2232_v37  ;;  %v2227_v16 = vcombine.high %v814_v7, %v818_v8  ;;  %v806_v18 = vld [vmem:[#allocation7 + $0x148] sm:$0xff]  ;;  %v2226_v25 = vcombine.low %v814_v7, %v818_v8 }
  0x73   : > { %2286 = vmatpush3.bf16.msra.mxu1 %v2406_v32  ;;  %1193 = vmatprep.subr.bf16.mxu0 %v2225_v44  ;;  %v2217_v48 = vcombine.high %v805_v45, %v809_v46  ;;  %v797_v49 = vld [vmem:[#allocation7 + $0x100] sm:$0xff]  ;;  %v2216_v51 = vcombine.low %v805_v45, %v809_v46  ;;  %v810_v19 = vld [vmem:[#allocation7 + $0x168] sm:$0xff] }
  0x74   : > { %2287 = vmatprep.subr.bf16.mxu1 %v2407_v33  ;;  %v801_v50 = vld [vmem:[#allocation7 + $0x120] sm:$0xff]  ;;  %v798_v29 = vld [vmem:[#allocation7 + $0x108] sm:$0xff]  ;;  %v2218_v36 = vcombine.low %v806_v18, %v810_v19 }
  0x75   : > { %v2209_v52 = vcombine.high %v797_v49, %v801_v50  ;;  %v789_v53 = vld [vmem:[#allocation7 + $0xc0] sm:$0xff]  ;;  %v2208_v55 = vcombine.low %v797_v49, %v801_v50  ;;  %v790_v40 = vld [vmem:[#allocation7 + $0xc8] sm:$0xff] }
  0x76   : > { %1194 = vmatpush1.bf16.msra.mxu0 %v2224_v47  ;;  %v793_v54 = vld [vmem:[#allocation7 + $0xe0] sm:$0xff]  ;;  %v794_v41 = vld [vmem:[#allocation7 + $0xe8] sm:$0xff] }
  0x77   : > { %2270 = vmatmul.mubr.msk.bf16.gmra.mxu0 %vm427_vm2, %v414_v20  ;;  %2288 = vmatpush3.bf16.msra.mxu1 %v2407_v33  ;;  %v2201_v56 = vcombine.high %v789_v53, %v793_v54  ;;  %v2200_v57 = vcombine.low %v789_v53, %v793_v54  ;;  %v2203_v49 = vcombine.high %v790_v40, %v794_v41  ;;  %v786_v8 = vld [vmem:[#allocation7 + $0xa8] sm:$0xff] }
  0x78   : > { %2273 = vmatprep.mubr.msk.bf16.mxu0 %vm427_vm2, %v415_v21  ;;  %1304 = vmatprep.subr.bf16.mxu1 %v2235_v43 }
  0x79   : > { %1195 = vmatprep.subr.bf16.mxu0 %v2217_v48 }
  0x7a   : > { %1196 = vmatpush1.bf16.msra.mxu0 %v2216_v51 }
  0x7b   : > { %1197 = vmatprep.subr.bf16.mxu0 %v2209_v52 }
  0x7e   : > { %1198 = vmatpush1.bf16.msra.mxu0 %v2208_v55 }
  0x7f   : > { %2274 = vmatmul.mubr.msk.bf16.gmra.mxu0 %vm427_vm2, %v416_v26  ;;  %1199 = vmatprep.subr.bf16.mxu0 %v2201_v56  ;;  %v2202_v56 = vcombine.low %v790_v40, %v794_v41 }
  0x80   : > { %2277 = vmatprep.mubr.msk.bf16.mxu0 %vm427_vm2, %v417_v27  ;;  %v2219_v27 = vcombine.high %v806_v18, %v810_v19  ;;  %v765_v19 = vld [vmem:[#allocation7] sm:$0xff] }
  0x82   : > { %1200 = vmatpush1.bf16.msra.mxu0 %v2200_v57 }
  0x87   : > { %2278 = vmatmul.mubr.msk.bf16.gmra.mxu0 %vm427_vm2, %v418_v30  ;;  %v802_v30 = vld [vmem:[#allocation7 + $0x128] sm:$0xff] }
  0x88   : > { %v2211_v38 = vcombine.high %v798_v29, %v802_v30  ;;  %v2210_v47 = vcombine.low %v798_v29, %v802_v30  ;;  %v827_v29 = vld [vmem:[#allocation7 + $0x1f0] sm:$0xff]  ;;  %v824_v30 = vld [vmem:[#allocation7 + $0x1d8] sm:$0xff] }
 0x12f   : > { %v2267_v58 = vpop.f32.mrf.mxu0 }
 0x130   : > { %v502_v0 = vadd.f32 %v2267_v58, %v2806_v60 }
 0x131   : > { %v493_v59 = vpop.f32.mrf.mxu0 }
 0x132   : > { %v494_v62 = vadd.f32 %v2806_v60, %v493_v59  ;;  %v558_v9 = vmax.f32 %v502_v0, 0.0 }
 0x133   : > { %v2268_v61 = vpop.f32.mrf.mxu0 }
 0x134   : > { %v505_v63 = vadd.f32 %v2268_v61, %v2806_v60  ;;  %v556_v5 = vmax.f32 %v494_v62, 0.0 }
 0x135   : > { %v496_v1 = vpop.f32.mrf.mxu0 }
 0x136   : > { %v497_v2 = vadd.f32 %v2806_v60, %v496_v1  ;;  %v559_v3 = vmax.f32 %v505_v63, 0.0 }
 0x137   : > { %v2271_v4 = vpop.f32.mrf.mxu0 }
 0x138   : > { %v557_v6 = vmax.f32 %v497_v2, 0.0  ;;  %v518_v10 = vadd.f32 %v2271_v4, %v2806_v60  ;;  %v573_v14 = vpack.c.bf16 %v559_v3, %v558_v9  ;;  %v781_v4 = vld [vmem:[#allocation7 + $0x80] sm:$0xff] }
 0x139   : > { %v509_v11 = vpop.f32.mrf.mxu0 }
 0x13a   : > { %v510_v12 = vadd.f32 %v2806_v60, %v509_v11  ;;  %v572_v13 = vpack.c.bf16 %v557_v6, %v556_v5  ;;  %v562_v20 = vmax.f32 %v518_v10, 0.0  ;;  %v785_v5 = vld [vmem:[#allocation7 + $0xa0] sm:$0xff]  ;;  %v782_v6 = vld [vmem:[#allocation7 + $0x88] sm:$0xff] }
 0x13b   : > { %v2272_v15 = vpop.f32.mrf.mxu0  ;;  %v2193_v7 = vcombine.high %v781_v4, %v785_v5  ;;  %v2192_v9 = vcombine.low %v781_v4, %v785_v5  ;;  %v2194_v10 = vcombine.low %v782_v6, %v786_v8  ;;  %v2195_v11 = vcombine.high %v782_v6, %v786_v8  ;;  %v799_v4 = vld [vmem:[#allocation7 + $0x110] sm:$0xff]  ;;  %v804_v8 = vld [vmem:[#allocation7 + $0x138] sm:$0xff] }
 0x13c   : > { %v521_v17 = vadd.f32 %v2272_v15, %v2806_v60  ;;  %2289 = vmatprep.mubr.msk.bf16.mxu1 %vm619_vm3, %v572_v13  ;;  %v560_v22 = vmax.f32 %v510_v12, 0.0  ;;  %v777_v12 = vld [vmem:[#allocation7 + $0x60] sm:$0xff]  ;;  %v774_v13 = vld [vmem:[#allocation7 + $0x48] sm:$0xff]  ;;  %v803_v6 = vld [vmem:[#allocation7 + $0x130] sm:$0xff] }
 0x13d   : > { %v512_v21 = vpop.f32.mrf.mxu0  ;;  %2290 = vmatmul.mubr.msk.bf16.vlgmr.msra.gmra.mxu1 %vm619_vm3, %v573_v14  ;;  %1201 = vmatprep.subr.bf16.mxu0 %v2193_v7  ;;  %v778_v15 = vld [vmem:[#allocation7 + $0x68] sm:$0xff]  ;;  %v800_v7 = vld [vmem:[#allocation7 + $0x118] sm:$0xff] }
 0x13e   : > { %v563_v23 = vmax.f32 %v521_v17, 0.0  ;;  %v513_v24 = vadd.f32 %v2806_v60, %v512_v21  ;;  %1305 = vmatpush1.bf16.msra.mxu1 %v2234_v42  ;;  %1202 = vmatpush1.bf16.msra.mxu0 %v2192_v9  ;;  %v2186_v17 = vcombine.low %v774_v13, %v778_v15  ;;  %v2187_v18 = vcombine.high %v774_v13, %v778_v15  ;;  %v766_v21 = vld [vmem:[#allocation7 + $0x8] sm:$0xff]  ;;  %v791_v15 = vld [vmem:[#allocation7 + $0xd0] sm:$0xff] }
 0x13f   : > { %v2275_v26 = vpop.f32.mrf.mxu0  ;;  %1306 = vmatprep.subr.bf16.mxu1 %v2227_v16  ;;  %v2213_v13 = vcombine.high %v799_v4, %v803_v6 }
 0x140   : > { %v561_v28 = vmax.f32 %v513_v24, 0.0  ;;  %v575_v31 = vpack.c.bf16 %v563_v23, %v562_v20  ;;  %v534_v32 = vadd.f32 %v2275_v26, %v2806_v60  ;;  %v769_v20 = vld [vmem:[#allocation7 + $0x20] sm:$0xff]  ;;  %v770_v23 = vld [vmem:[#allocation7 + $0x28] sm:$0xff] }
 0x141   : > { %v525_v33 = vpop.f32.mrf.mxu0  ;;  %v2176_v24 = vcombine.low %v765_v19, %v769_v20  ;;  %v2179_v26 = vcombine.high %v766_v21, %v770_v23 }
 0x142   : > { %v574_v34 = vpack.c.bf16 %v561_v28, %v560_v22  ;;  %v526_v35 = vadd.f32 %v2806_v60, %v525_v33  ;;  %1307 = vmatpush1.bf16.msra.mxu1 %v2226_v25  ;;  %v566_v42 = vmax.f32 %v534_v32, 0.0  ;;  %v2177_v22 = vcombine.high %v765_v19, %v769_v20  ;;  %v823_v28 = vld [vmem:[#allocation7 + $0x1d0] sm:$0xff]  ;;  %v828_v33 = vld [vmem:[#allocation7 + $0x1f8] sm:$0xff] }
 0x143   : > { %v2276_v37 = vpop.f32.mrf.mxu0  ;;  %1308 = vmatprep.subr.bf16.mxu1 %v2219_v27  ;;  %v2178_v25 = vcombine.low %v766_v21, %v770_v23  ;;  %v2601_v27 = vmov 0   ;;  %v2237_v32 = vcombine.high %v823_v28, %v827_v29  ;;  %v796_v19 = vld [vmem:[#allocation7 + $0xf8] sm:$0xff]  ;;  %v2212_v21 = vcombine.low %v799_v4, %v803_v6 }
 0x144   : > { %2293 = vmatprep.mubr.msk.bf16.mxu1 %vm619_vm3, %v574_v34  ;;  %v537_v39 = vadd.f32 %v2276_v37, %v2806_v60  ;;  %v564_v44 = vmax.f32 %v526_v35, 0.0  ;;  %1223 = vmatprep.mubr.bf16.mxu0 %v2601_v27  ;;  %v2238_v34 = vcombine.low %v824_v30, %v828_v33  ;;  %v2239_v35 = vcombine.high %v824_v30, %v828_v33  ;;  %v784_v30 = vld [vmem:[#allocation7 + $0x98] sm:$0xff] }
 0x145   : > { %2294 = vmatmul.mubr.msk.bf16.gmra.mxu1 %vm619_vm3, %v575_v31  ;;  %v528_v43 = vpop.f32.mrf.mxu0  ;;  %v2236_v31 = vcombine.low %v823_v28, %v827_v29  ;;  %v787_v29 = vld [vmem:[#allocation7 + $0xb0] sm:$0xff] }
 0x146   : > { %v567_v45 = vmax.f32 %v537_v39, 0.0  ;;  %v529_v46 = vadd.f32 %v2806_v60, %v528_v43  ;;  %1309 = vmatpush1.bf16.msra.mxu1 %v2218_v36 }
 0x147   : > { %v2279_v48 = vpop.f32.mrf.mxu0  ;;  %1310 = vmatprep.subr.bf16.mxu1 %v2211_v38  ;;  %v2834_v38 = vld [vmem:[#allocation6] ss:$0 sm:$0xff] }
 0x148   : > { %v565_v50 = vmax.f32 %v529_v46, 0.0  ;;  %v577_v51 = vpack.c.bf16 %v567_v45, %v566_v42  ;;  %v550_v52 = vadd.f32 %v2279_v48, %v2806_v60  ;;  %v816_v48 = vld [vmem:[#allocation7 + $0x198] sm:$0xff] }
 0x149   : > { %v541_v53 = vpop.f32.mrf.mxu0 }
 0x14a   : > { %v576_v54 = vpack.c.bf16 %v565_v50, %v564_v44  ;;  %v542_v55 = vadd.f32 %v2806_v60, %v541_v53  ;;  %1311 = vmatpush1.bf16.msra.mxu1 %v2210_v47  ;;  %v570_v59 = vmax.f32 %v550_v52, 0.0  ;;  %v815_v44 = vld [vmem:[#allocation7 + $0x190] sm:$0xff] }
 0x14b   : > { %v2280_v57 = vpop.f32.mrf.mxu0  ;;  %1312 = vmatprep.subr.bf16.mxu1 %v2203_v49  ;;  %v819_v47 = vld [vmem:[#allocation7 + $0x1b0] sm:$0xff]  ;;  %v820_v49 = vld [vmem:[#allocation7 + $0x1b8] sm:$0xff] }
 0x14c   : > { %2297 = vmatprep.mubr.msk.bf16.mxu1 %vm619_vm3, %v576_v54  ;;  %v553_v58 = vadd.f32 %v2280_v57, %v2806_v60  ;;  %v568_v62 = vmax.f32 %v542_v55, 0.0  ;;  %v807_v53 = vld [vmem:[#allocation7 + $0x150] sm:$0xff]  ;;  %v2229_v55 = vcombine.high %v815_v44, %v819_v47 }
 0x14d   : > { %2298 = vmatmul.mubr.msk.bf16.gmra.mxu1 %vm619_vm3, %v577_v51  ;;  %v544_v61 = vpop.f32.mrf.mxu0  ;;  %v811_v57 = vld [vmem:[#allocation7 + $0x170] sm:$0xff] }
 0x14e   : > { %v571_v63 = vmax.f32 %v553_v58, 0.0  ;;  %v545_v0 = vadd.f32 %v2806_v60, %v544_v61  ;;  %1313 = vmatpush1.bf16.msra.mxu1 %v2202_v56  ;;  %v773_v60 = vld [vmem:[#allocation7 + $0x40] sm:$0xff]  ;;  %v2231_v56 = vcombine.high %v816_v48, %v820_v49  ;;  %v808_v58 = vld [vmem:[#allocation7 + $0x158] sm:$0xff]  ;;  %v2220_v9 = vcombine.low %v807_v53, %v811_v57 }
 0x14f   : > { %1314 = vmatprep.subr.bf16.mxu1 %v2195_v11  ;;  %v2185_v14 = vcombine.high %v773_v60, %v777_v12  ;;  %v2184_v16 = vcombine.low %v773_v60, %v777_v12 }
 0x150   : > { %v569_v1 = vmax.f32 %v545_v0, 0.0  ;;  %v579_v2 = vpack.c.bf16 %v571_v63, %v570_v59  ;;  %v812_v59 = vld [vmem:[#allocation7 + $0x178] sm:$0xff]  ;;  %v2230_v63 = vcombine.low %v816_v48, %v820_v49 }
 0x151   : > { %1203 = vmatprep.subr.bf16.mxu0 %v2185_v14  ;;  %v2222_v60 = vcombine.low %v808_v58, %v812_v59  ;;  %v2215_v14 = vcombine.high %v800_v7, %v804_v8 }
 0x152   : > { %v578_v3 = vpack.c.bf16 %v569_v1, %v568_v62  ;;  %1315 = vmatpush1.bf16.msra.mxu1 %v2194_v10  ;;  %1204 = vmatpush1.bf16.msra.mxu0 %v2184_v16  ;;  %v2228_v62 = vcombine.low %v815_v44, %v819_v47  ;;  %v2221_v1 = vcombine.high %v807_v53, %v811_v57  ;;  %v776_v44 = vld [vmem:[#allocation7 + $0x58] sm:$0xff] }
 0x153   : > { %1316 = vmatprep.subr.bf16.mxu1 %v2187_v18  ;;  %1205 = vmatprep.subr.bf16.mxu0 %v2177_v22  ;;  %v792_v18 = vld [vmem:[#allocation7 + $0xd8] sm:$0xff]  ;;  %v2214_v22 = vcombine.low %v800_v7, %v804_v8 }
 0x154   : > { %2301 = vmatprep.mubr.msk.bf16.mxu1 %vm619_vm3, %v578_v3 }
 0x155   : > { %2302 = vmatmul.mubr.msk.bf16.gmra.mxu1 %vm619_vm3, %v579_v2  ;;  %v2223_v2 = vcombine.high %v808_v58, %v812_v59 }
 0x156   : > { %1317 = vmatpush1.bf16.msra.mxu1 %v2186_v17  ;;  %1206 = vmatpush1.bf16.msra.mxu0 %v2176_v24  ;;  %v795_v17 = vld [vmem:[#allocation7 + $0xf0] sm:$0xff] }
 0x157   : > { %1318 = vmatprep.subr.bf16.mxu1 %v2179_v26  ;;  %1336 = vmatprep.mubr.bf16.mxu1 %v2601_v27  ;;  %v2205_v24 = vcombine.high %v791_v15, %v795_v17  ;;  %v783_v26 = vld [vmem:[#allocation7 + $0x90] sm:$0xff] }
 0x158   : > { %1417 = vmatprep.subr.bf16.mxu0 %v2237_v32  ;;  %v2204_v32 = vcombine.low %v791_v15, %v795_v17  ;;  %v2196_v47 = vcombine.low %v783_v26, %v787_v29 }
 0x15a   : > { %1319 = vmatpush1.bf16.msra.mxu1 %v2178_v25  ;;  %v2207_v25 = vcombine.high %v792_v18, %v796_v19 }
 0x15b   : > { %1530 = vmatprep.subr.bf16.mxu1 %v2239_v35  ;;  %v2206_v35 = vcombine.low %v792_v18, %v796_v19 }
 0x1fd   : > { %v2291_v36 = vpop.f32.mrf.mxu1 }
 0x1fe   : > { %v687_v61 = vadd.f32 %v2291_v36, %v2834_v38 }
 0x1ff   : > { %v678_v37 = vpop.f32.mrf.mxu1 }
 0x200   : > { %v679_v40 = vadd.f32 %v2834_v38, %v678_v37  ;;  %v743_v5 = vmax.f32 %v687_v61, 0.0  ;;  %v2197_v37 = vcombine.high %v783_v26, %v787_v29  ;;  %v2916_v26 = vld [vmem:[#allocation9] sm:$0xff] }
 0x201   : > { %v2292_v39 = vpop.f32.mrf.mxu1 }
 0x202   : > { %v741_v45 = vmax.f32 %v679_v40, 0.0  ;;  %v690_v51 = vadd.f32 %v2292_v39, %v2834_v38  ;;  %v775_v40 = vld [vmem:[#allocation7 + $0x50] sm:$0xff] }
 0x203   : > { %v681_v41 = vpop.f32.mrf.mxu1 }
 0x204   : > { %v682_v42 = vadd.f32 %v2834_v38, %v681_v41  ;;  %v744_v0 = vmax.f32 %v690_v51, 0.0  ;;  %v767_v51 = vld [vmem:[#allocation7 + $0x10] sm:$0xff] }
 0x205   : > { %v2838_v43 = vpop.f32.mrf.mxu1 }
 0x206   : > { %v742_v46 = vmax.f32 %v682_v42, 0.0  ;;  %v2848_v10 = vpack.c.bf16 %v744_v0, %v743_v5  ;;  %v703_v41 = vadd.f32 %v2838_v43, %v2834_v38  ;;  %v779_v42 = vld [vmem:[#allocation7 + $0x70] sm:$0xff] }
 0x207   : > { %v694_v50 = vpop.f32.mrf.mxu1  ;;  %v2189_v43 = vcombine.high %v775_v40, %v779_v42  ;;  %v2188_v57 = vcombine.low %v775_v40, %v779_v42 }
 0x208   : > { %v2841_v52 = vpack.c.bf16 %v742_v46, %v741_v45  ;;  %v695_v16 = vadd.f32 %v2834_v38, %v694_v50  ;;  %v780_v45 = vld [vmem:[#allocation7 + $0x78] sm:$0xff]  ;;  %v747_v53 = vmax.f32 %v703_v41, 0.0 }
 0x209   : > { %v2296_v54 = vpop.f32.mrf.mxu1  ;;  %v2191_v50 = vcombine.high %v776_v44, %v780_v45  ;;  %v2190_v58 = vcombine.low %v776_v44, %v780_v45 }
 0x20a   : > { %1224 = vmatmul.mubr.bf16.vlgmr.msra.gmra.mxu0 %v2841_v52  ;;  %1337 = vmatmul.mubr.bf16.vlgmr.msra.gmra.mxu1 %v2841_v52  ;;  %v745_v28 = vmax.f32 %v695_v16, 0.0  ;;  %v706_v33 = vadd.f32 %v2296_v54, %v2834_v38  ;;  %v771_v54 = vld [vmem:[#allocation7 + $0x30] sm:$0xff] }
 0x20b   : > { %1418 = vmatpush1.bf16.msra.mxu0 %v2236_v31  ;;  %1531 = vmatpush1.bf16.msra.mxu1 %v2238_v34  ;;  %v697_v3 = vpop.f32.mrf.mxu1  ;;  %v788_v31 = vld [vmem:[#allocation7 + $0xb8] sm:$0xff]  ;;  %v2181_v0 = vcombine.high %v767_v51, %v771_v54  ;;  %v2180_v4 = vcombine.low %v767_v51, %v771_v54 }
 0x20c   : > { %1233 = vmatprep.mubr.bf16.mxu0 %v2601_v27  ;;  %1346 = vmatprep.mubr.bf16.mxu1 %v2601_v27  ;;  %v698_v11 = vadd.f32 %v2834_v38, %v697_v3  ;;  %v2199_v39 = vcombine.high %v784_v30, %v788_v31  ;;  %v748_v46 = vmax.f32 %v706_v33, 0.0  ;;  %v2198_v48 = vcombine.low %v784_v30, %v788_v31 }
 0x20d   : > { %1419 = vmatprep.subr.bf16.mxu0 %v2229_v55  ;;  %1532 = vmatprep.subr.bf16.mxu1 %v2231_v56  ;;  %v2851_v12 = vpop.f32.mrf.mxu1  ;;  %v768_v55 = vld [vmem:[#allocation7 + $0x18] sm:$0xff] }
 0x20e   : > { %v746_v20 = vmax.f32 %v698_v11, 0.0  ;;  %v772_v56 = vld [vmem:[#allocation7 + $0x38] sm:$0xff]  ;;  %v2867_v59 = vpack.c.bf16 %v748_v46, %v747_v53  ;;  %v719_v7 = vadd.f32 %v2851_v12, %v2834_v38 }
 0x20f   : > { %1420 = vmatpush1.bf16.msra.mxu0 %v2228_v62  ;;  %1533 = vmatpush1.bf16.msra.mxu1 %v2230_v63  ;;  %v710_v23 = vpop.f32.mrf.mxu1  ;;  %v2182_v5 = vcombine.low %v768_v55, %v772_v56 }
 0x210   : > { %1421 = vmatprep.subr.bf16.mxu0 %v2221_v1  ;;  %1534 = vmatprep.subr.bf16.mxu1 %v2223_v2  ;;  %v2859_v34 = vpack.c.bf16 %v746_v20, %v745_v28  ;;  %v711_v61 = vadd.f32 %v2834_v38, %v710_v23  ;;  %v2183_v1 = vcombine.high %v768_v55, %v772_v56 }
 0x211   : > { %v2300_v36 = vpop.f32.mrf.mxu1 }
 0x212   : > { %1234 = vmatmul.mubr.bf16.gmra.mxu0 %v2848_v10  ;;  %1347 = vmatmul.mubr.bf16.gmra.mxu1 %v2848_v10  ;;  %v749_v2 = vmax.f32 %v711_v61, 0.0  ;;  %v722_v8 = vadd.f32 %v2300_v36, %v2834_v38 }
 0x213   : > { %1243 = vmatprep.mubr.bf16.mxu0 %v2601_v27  ;;  %1356 = vmatprep.mubr.bf16.mxu1 %v2601_v27  ;;  %v713_v49 = vpop.f32.mrf.mxu1 }
 0x214   : > { %1422 = vmatpush1.bf16.msra.mxu0 %v2220_v9  ;;  %1535 = vmatpush1.bf16.msra.mxu1 %v2222_v60  ;;  %v714_v62 = vadd.f32 %v2834_v38, %v713_v49  ;;  %v751_v60 = vmax.f32 %v719_v7, 0.0 }
 0x215   : > { %1423 = vmatprep.subr.bf16.mxu0 %v2213_v13  ;;  %1536 = vmatprep.subr.bf16.mxu1 %v2215_v14  ;;  %v2303_v63 = vpop.f32.mrf.mxu1  ;;  %v752_v13 = vmax.f32 %v722_v8, 0.0 }
 0x216   : > { %v750_v3 = vmax.f32 %v714_v62, 0.0  ;;  %v735_v19 = vadd.f32 %v2303_v63, %v2834_v38 }
 0x217   : > { %v726_v6 = vpop.f32.mrf.mxu1  ;;  %v762_v15 = vpack.c.bf16 %v752_v13, %v751_v60 }
 0x218   : > { %1424 = vmatpush1.bf16.msra.mxu0 %v2212_v21  ;;  %1537 = vmatpush1.bf16.msra.mxu1 %v2214_v22  ;;  %v761_v9 = vpack.c.bf16 %v750_v3, %v749_v2  ;;  %v727_v16 = vadd.f32 %v2834_v38, %v726_v6  ;;  %v755_v22 = vmax.f32 %v735_v19, 0.0 }
 0x219   : > { %1425 = vmatprep.subr.bf16.mxu0 %v2205_v24  ;;  %1538 = vmatprep.subr.bf16.mxu1 %v2207_v25  ;;  %v2304_v11 = vpop.f32.mrf.mxu1 }
 0x21a   : > { %1244 = vmatmul.mubr.bf16.gmra.mxu0 %v2859_v34  ;;  %1357 = vmatmul.mubr.bf16.gmra.mxu1 %v2859_v34  ;;  %v753_v17 = vmax.f32 %v727_v16, 0.0  ;;  %v738_v20 = vadd.f32 %v2304_v11, %v2834_v38 }
 0x21b   : > { %1253 = vmatprep.mubr.bf16.mxu0 %v2601_v27  ;;  %1366 = vmatprep.mubr.bf16.mxu1 %v2601_v27  ;;  %v729_v14 = vpop.f32.mrf.mxu1 }
 0x21c   : > { %1426 = vmatpush1.bf16.msra.mxu0 %v2204_v32  ;;  %1539 = vmatpush1.bf16.msra.mxu1 %v2206_v35  ;;  %v730_v12 = vadd.f32 %v2834_v38, %v729_v14  ;;  %v756_v23 = vmax.f32 %v738_v20, 0.0  ;;  %v831_v38 = vlaneseq }
 0x21d   : > { %1427 = vmatprep.subr.bf16.mxu0 %v2197_v37  ;;  %1540 = vmatprep.subr.bf16.mxu1 %v2199_v39 }
 0x21e   : > { %v754_v18 = vmax.f32 %v730_v12, 0.0  ;;  %v764_v24 = vpack.c.bf16 %v756_v23, %v755_v22 }
 0x220   : > { %1428 = vmatpush1.bf16.msra.mxu0 %v2196_v47  ;;  %1541 = vmatpush1.bf16.msra.mxu1 %v2198_v48  ;;  %v763_v21 = vpack.c.bf16 %v754_v18, %v753_v17 }
 0x221   : > { %1429 = vmatprep.subr.bf16.mxu0 %v2189_v43  ;;  %1542 = vmatprep.subr.bf16.mxu1 %v2191_v50 }
 0x222   : > { %1254 = vmatmul.mubr.bf16.gmra.mxu0 %v2867_v59  ;;  %1367 = vmatmul.mubr.bf16.gmra.mxu1 %v2867_v59 }
 0x223   : > { %1263 = vmatprep.mubr.bf16.mxu0 %v2601_v27  ;;  %1376 = vmatprep.mubr.bf16.mxu1 %v2601_v27 }
 0x224   : > { %1430 = vmatpush1.bf16.msra.mxu0 %v2188_v57  ;;  %1543 = vmatpush1.bf16.msra.mxu1 %v2190_v58 }
 0x225   : > { %1431 = vmatprep.subr.bf16.mxu0 %v2181_v0  ;;  %1544 = vmatprep.subr.bf16.mxu1 %v2183_v1 }
 0x228   : > { %1432 = vmatpush1.bf16.msra.mxu0 %v2180_v4  ;;  %1545 = vmatpush1.bf16.msra.mxu1 %v2182_v5 }
 0x22a   : > { %1264 = vmatmul.mubr.bf16.gmra.mxu0 %v761_v9  ;;  %1377 = vmatmul.mubr.bf16.gmra.mxu1 %v761_v9 }
 0x22b   : > { %1273 = vmatprep.mubr.bf16.mxu0 %v2601_v27  ;;  %1386 = vmatprep.mubr.bf16.mxu1 %v2601_v27 }
 0x232   : > { %1274 = vmatmul.mubr.bf16.gmra.mxu0 %v762_v15  ;;  %1387 = vmatmul.mubr.bf16.gmra.mxu1 %v762_v15 }
 0x233   : > { %1283 = vmatprep.mubr.bf16.mxu0 %v2601_v27  ;;  %1396 = vmatprep.mubr.bf16.mxu1 %v2601_v27 }
 0x23a   : > { %1284 = vmatmul.mubr.bf16.gmra.mxu0 %v763_v21  ;;  %1397 = vmatmul.mubr.bf16.gmra.mxu1 %v763_v21 }
 0x23b   : > { %1293 = vmatprep.mubr.bf16.mxu0 %v2601_v27  ;;  %1406 = vmatprep.mubr.bf16.mxu1 %v2601_v27 }
 0x242   : > { %1294 = vmatmul.mubr.bf16.gmra.mxu0 %v764_v24  ;;  %1407 = vmatmul.mubr.bf16.gmra.mxu1 %v764_v24 }
 0x243   : > { %1449 = vmatprep.mubr.bf16.mxu0 %v2601_v27  ;;  %1562 = vmatprep.mubr.bf16.mxu1 %v2601_v27 }
 0x24a   : > { %1450 = vmatmul.mubr.bf16.vlgmr.msra.gmra.mxu0 %v2841_v52  ;;  %1563 = vmatmul.mubr.bf16.vlgmr.msra.gmra.mxu1 %v2841_v52  ;;  %v2912_v52 = vshrl.u32 %v831_v38, 7 }
 0x24b   : > { %1459 = vmatprep.mubr.bf16.mxu0 %v2601_v27  ;;  %1572 = vmatprep.mubr.bf16.mxu1 %v2601_v27 }
 0x24c   : > { %v841_v25 = vsub.s32 2, %v2912_v52  ;;  %v837_v28 = vsub.s32 1, %v2912_v52  ;;  %v845_v29 = vsub.s32 3, %v2912_v52 }
 0x24e   : > { %v2927_v33 = vrot.slane %v2916_v26, %v837_v28 }
 0x252   : > { %1460 = vmatmul.mubr.bf16.gmra.mxu0 %v2848_v10  ;;  %1573 = vmatmul.mubr.bf16.gmra.mxu1 %v2848_v10  ;;  %v833_v10 = vsub.s32 0, %v2912_v52 }
 0x253   : > { %1469 = vmatprep.mubr.bf16.mxu0 %v2601_v27  ;;  %1582 = vmatprep.mubr.bf16.mxu1 %v2601_v27 }
 0x254   : > { %v2921_v30 = vrot.slane %v2916_v26, %v833_v10 }
 0x25a   : > { %1470 = vmatmul.mubr.bf16.gmra.mxu0 %v2859_v34  ;;  %1583 = vmatmul.mubr.bf16.gmra.mxu1 %v2859_v34  ;;  %v2930_v34 = vrot.slane %v2916_v26, %v845_v29 }
 0x25b   : > { %1479 = vmatprep.mubr.bf16.mxu0 %v2601_v27  ;;  %1592 = vmatprep.mubr.bf16.mxu1 %v2601_v27 }
 0x262   : > { %1480 = vmatmul.mubr.bf16.gmra.mxu0 %v2867_v59  ;;  %1593 = vmatmul.mubr.bf16.gmra.mxu1 %v2867_v59 }
 0x263   : > { %1489 = vmatprep.mubr.bf16.mxu0 %v2601_v27  ;;  %1602 = vmatprep.mubr.bf16.mxu1 %v2601_v27 }
 0x26a   : > { %1490 = vmatmul.mubr.bf16.gmra.mxu0 %v761_v9  ;;  %1603 = vmatmul.mubr.bf16.gmra.mxu1 %v761_v9 }
 0x26b   : > { %1499 = vmatprep.mubr.bf16.mxu0 %v2601_v27  ;;  %1612 = vmatprep.mubr.bf16.mxu1 %v2601_v27 }
 0x272   : > { %1500 = vmatmul.mubr.bf16.gmra.mxu0 %v762_v15  ;;  %1613 = vmatmul.mubr.bf16.gmra.mxu1 %v762_v15 }
 0x273   : > { %1509 = vmatprep.mubr.bf16.mxu0 %v2601_v27  ;;  %1622 = vmatprep.mubr.bf16.mxu1 %v2601_v27 }
 0x27a   : > { %1510 = vmatmul.mubr.bf16.gmra.mxu0 %v763_v21  ;;  %1623 = vmatmul.mubr.bf16.gmra.mxu1 %v763_v21 }
 0x27b   : > { %1519 = vmatprep.mubr.bf16.mxu0 %v2601_v27  ;;  %1632 = vmatprep.mubr.bf16.mxu1 %v2601_v27  ;;  %v2924_v27 = vrot.slane %v2916_v26, %v841_v25 }
 0x282   : > { %1520 = vmatmul.mubr.bf16.gmra.mxu0 %v764_v24  ;;  %1633 = vmatmul.mubr.bf16.gmra.mxu1 %v764_v24 }
 0x2ca   : > { %v1225_v31 = vpop.f32.mrf.mxu0  ;;  %v1338_v32 = vpop.f32.mrf.mxu1 }
 0x2cb   : > { %v1226_v35 = vadd.f32 %v1225_v31, %v2921_v30  ;;  %v1339_v36 = vadd.f32 %v1338_v32, %v2924_v27 }
 0x2cc   : > { %v1227_v37 = vpop.f32.mrf.mxu0  ;;  %v1340_v39 = vpop.f32.mrf.mxu1 }
 0x2cd   : > { %v1228_v40 = vadd.f32 %v1227_v37, %v2927_v33  ;;  %v1341_v41 = vadd.f32 %v1340_v39, %v2930_v34  ;;  %v1643_v47 = vmax.f32 %v1226_v35, 0.0  ;;  %v1645_v48 = vmax.f32 %v1339_v36, 0.0 }
 0x2ce   : > { %v1229_v42 = vpop.f32.mrf.mxu0  ;;  %v1342_v44 = vpop.f32.mrf.mxu1 }
 0x2cf   : > { %v1230_v45 = vadd.f32 %v1229_v42, %v2921_v30  ;;  %v1343_v46 = vadd.f32 %v1342_v44, %v2924_v27  ;;  %v1644_v55 = vmax.f32 %v1228_v40, 0.0  ;;  %v1646_v56 = vmax.f32 %v1341_v41, 0.0 }
 0x2d0   : > { %v1231_v49 = vpop.f32.mrf.mxu0  ;;  %v1344_v43 = vpop.f32.mrf.mxu1 }
 0x2d1   : > { %v1651_v50 = vmax.f32 %v1230_v45, 0.0  ;;  %v1653_v51 = vmax.f32 %v1343_v46, 0.0  ;;  %v1232_v53 = vadd.f32 %v1231_v49, %v2927_v33  ;;  %v1345_v54 = vadd.f32 %v1344_v43, %v2930_v34 }
 0x2d2   : > { %v1235_v57 = vpop.f32.mrf.mxu0  ;;  %v1348_v58 = vpop.f32.mrf.mxu1 }
 0x2d3   : > { %v1772_v59 = vmax.f32 %v1643_v47, %v1651_v50  ;;  %v1814_v61 = vmax.f32 %v1645_v48, %v1653_v51  ;;  %v1652_v62 = vmax.f32 %v1232_v53, 0.0  ;;  %v1654_v63 = vmax.f32 %v1345_v54, 0.0 }
 0x2d4   : > { %v1236_v0 = vadd.f32 %v1235_v57, %v2921_v30  ;;  %v1349_v1 = vadd.f32 %v1348_v58, %v2924_v27  ;;  %v1237_v2 = vpop.f32.mrf.mxu0  ;;  %v1350_v3 = vpop.f32.mrf.mxu1 }
 0x2d5   : > { %v1793_v4 = vmax.f32 %v1644_v55, %v1652_v62  ;;  %v1835_v5 = vmax.f32 %v1646_v56, %v1654_v63  ;;  %v1238_v6 = vadd.f32 %v1237_v2, %v2927_v33  ;;  %v1351_v7 = vadd.f32 %v1350_v3, %v2930_v34 }
 0x2d6   : > { %v1659_v8 = vmax.f32 %v1236_v0, 0.0  ;;  %v1661_v9 = vmax.f32 %v1349_v1, 0.0  ;;  %v1239_v11 = vpop.f32.mrf.mxu0  ;;  %v1352_v60 = vpop.f32.mrf.mxu1 }
 0x2d7   : > { %v1660_v13 = vmax.f32 %v1238_v6, 0.0  ;;  %v1662_v14 = vmax.f32 %v1351_v7, 0.0  ;;  %v1240_v15 = vadd.f32 %v1239_v11, %v2921_v30  ;;  %v1353_v16 = vadd.f32 %v1352_v60, %v2924_v27 }
 0x2d8   : > { %v1773_v12 = vmax.f32 %v1772_v59, %v1659_v8  ;;  %v1815_v17 = vmax.f32 %v1814_v61, %v1661_v9  ;;  %v1241_v18 = vpop.f32.mrf.mxu0  ;;  %v1354_v19 = vpop.f32.mrf.mxu1 }
 0x2d9   : > { %v1794_v20 = vmax.f32 %v1793_v4, %v1660_v13  ;;  %v1836_v21 = vmax.f32 %v1835_v5, %v1662_v14  ;;  %v1667_v22 = vmax.f32 %v1240_v15, 0.0  ;;  %v1669_v23 = vmax.f32 %v1353_v16, 0.0 }
 0x2da   : > { %v1242_v24 = vadd.f32 %v1241_v18, %v2927_v33  ;;  %v1355_v38 = vadd.f32 %v1354_v19, %v2930_v34  ;;  %v1245_v10 = vpop.f32.mrf.mxu0  ;;  %v1358_v25 = vpop.f32.mrf.mxu1 }
 0x2db   : > { %v1774_v28 = vmax.f32 %v1773_v12, %v1667_v22  ;;  %v1816_v29 = vmax.f32 %v1815_v17, %v1669_v23  ;;  %v1246_v31 = vadd.f32 %v1245_v10, %v2921_v30  ;;  %v1359_v32 = vadd.f32 %v1358_v25, %v2924_v27 }
 0x2dc   : > { %v1668_v35 = vmax.f32 %v1242_v24, 0.0  ;;  %v1670_v36 = vmax.f32 %v1355_v38, 0.0  ;;  %v1247_v37 = vpop.f32.mrf.mxu0  ;;  %v1360_v39 = vpop.f32.mrf.mxu1 }
 0x2dd   : > { %v1675_v40 = vmax.f32 %v1246_v31, 0.0  ;;  %v1677_v41 = vmax.f32 %v1359_v32, 0.0  ;;  %v1248_v42 = vadd.f32 %v1247_v37, %v2927_v33  ;;  %v1361_v44 = vadd.f32 %v1360_v39, %v2930_v34 }
 0x2de   : > { %v1795_v45 = vmax.f32 %v1794_v20, %v1668_v35  ;;  %v1837_v46 = vmax.f32 %v1836_v21, %v1670_v36  ;;  %v1249_v47 = vpop.f32.mrf.mxu0  ;;  %v1362_v48 = vpop.f32.mrf.mxu1 }
 0x2df   : > { %v1775_v49 = vmax.f32 %v1774_v28, %v1675_v40  ;;  %v1817_v43 = vmax.f32 %v1816_v29, %v1677_v41  ;;  %v1676_v50 = vmax.f32 %v1248_v42, 0.0  ;;  %v1678_v51 = vmax.f32 %v1361_v44, 0.0 }
 0x2e0   : > { %v1250_v53 = vadd.f32 %v1249_v47, %v2921_v30  ;;  %v1363_v54 = vadd.f32 %v1362_v48, %v2924_v27  ;;  %v1251_v55 = vpop.f32.mrf.mxu0  ;;  %v1364_v56 = vpop.f32.mrf.mxu1 }
 0x2e1   : > { %v1796_v57 = vmax.f32 %v1795_v45, %v1676_v50  ;;  %v1838_v58 = vmax.f32 %v1837_v46, %v1678_v51  ;;  %v1252_v59 = vadd.f32 %v1251_v55, %v2927_v33  ;;  %v1365_v61 = vadd.f32 %v1364_v56, %v2930_v34 }
 0x2e2   : > { %v1683_v62 = vmax.f32 %v1250_v53, 0.0  ;;  %v1685_v63 = vmax.f32 %v1363_v54, 0.0  ;;  %v1255_v0 = vpop.f32.mrf.mxu0  ;;  %v1368_v1 = vpop.f32.mrf.mxu1 }
 0x2e3   : > { %v1684_v2 = vmax.f32 %v1252_v59, 0.0  ;;  %v1686_v3 = vmax.f32 %v1365_v61, 0.0  ;;  %v1256_v4 = vadd.f32 %v1255_v0, %v2921_v30  ;;  %v1369_v5 = vadd.f32 %v1368_v1, %v2924_v27 }
 0x2e4   : > { %v1776_v6 = vmax.f32 %v1775_v49, %v1683_v62  ;;  %v1818_v7 = vmax.f32 %v1817_v43, %v1685_v63  ;;  %v1257_v8 = vpop.f32.mrf.mxu0  ;;  %v1370_v9 = vpop.f32.mrf.mxu1 }
 0x2e5   : > { %v1797_v11 = vmax.f32 %v1796_v57, %v1684_v2  ;;  %v1839_v60 = vmax.f32 %v1838_v58, %v1686_v3  ;;  %v1691_v13 = vmax.f32 %v1256_v4, 0.0  ;;  %v1693_v14 = vmax.f32 %v1369_v5, 0.0 }
 0x2e6   : > { %v1258_v15 = vadd.f32 %v1257_v8, %v2927_v33  ;;  %v1371_v16 = vadd.f32 %v1370_v9, %v2930_v34  ;;  %v1259_v12 = vpop.f32.mrf.mxu0  ;;  %v1372_v17 = vpop.f32.mrf.mxu1 }
 0x2e7   : > { %v1777_v18 = vmax.f32 %v1776_v6, %v1691_v13  ;;  %v1819_v19 = vmax.f32 %v1818_v7, %v1693_v14  ;;  %v1260_v20 = vadd.f32 %v1259_v12, %v2921_v30  ;;  %v1373_v21 = vadd.f32 %v1372_v17, %v2924_v27 }
 0x2e8   : > { %v1692_v22 = vmax.f32 %v1258_v15, 0.0  ;;  %v1694_v23 = vmax.f32 %v1371_v16, 0.0  ;;  %v1261_v24 = vpop.f32.mrf.mxu0  ;;  %v1374_v38 = vpop.f32.mrf.mxu1 }
 0x2e9   : > { %v1699_v10 = vmax.f32 %v1260_v20, 0.0  ;;  %v1701_v25 = vmax.f32 %v1373_v21, 0.0  ;;  %v1262_v28 = vadd.f32 %v1261_v24, %v2927_v33  ;;  %v1375_v29 = vadd.f32 %v1374_v38, %v2930_v34 }
 0x2ea   : > { %v1798_v31 = vmax.f32 %v1797_v11, %v1692_v22  ;;  %v1840_v32 = vmax.f32 %v1839_v60, %v1694_v23  ;;  %v1265_v35 = vpop.f32.mrf.mxu0  ;;  %v1378_v36 = vpop.f32.mrf.mxu1 }
 0x2eb   : > { %v1778_v37 = vmax.f32 %v1777_v18, %v1699_v10  ;;  %v1820_v39 = vmax.f32 %v1819_v19, %v1701_v25  ;;  %v1700_v40 = vmax.f32 %v1262_v28, 0.0  ;;  %v1702_v41 = vmax.f32 %v1375_v29, 0.0 }
 0x2ec   : > { %v1266_v42 = vadd.f32 %v1265_v35, %v2921_v30  ;;  %v1379_v44 = vadd.f32 %v1378_v36, %v2924_v27  ;;  %v1267_v45 = vpop.f32.mrf.mxu0  ;;  %v1380_v46 = vpop.f32.mrf.mxu1 }
 0x2ed   : > { %v1799_v47 = vmax.f32 %v1798_v31, %v1700_v40  ;;  %v1841_v48 = vmax.f32 %v1840_v32, %v1702_v41  ;;  %v1268_v49 = vadd.f32 %v1267_v45, %v2927_v33  ;;  %v1381_v43 = vadd.f32 %v1380_v46, %v2930_v34 }
 0x2ee   : > { %v1707_v50 = vmax.f32 %v1266_v42, 0.0  ;;  %v1709_v51 = vmax.f32 %v1379_v44, 0.0  ;;  %v1269_v53 = vpop.f32.mrf.mxu0  ;;  %v1382_v54 = vpop.f32.mrf.mxu1 }
 0x2ef   : > { %v1708_v55 = vmax.f32 %v1268_v49, 0.0  ;;  %v1710_v56 = vmax.f32 %v1381_v43, 0.0  ;;  %v1270_v57 = vadd.f32 %v1269_v53, %v2921_v30  ;;  %v1383_v58 = vadd.f32 %v1382_v54, %v2924_v27 }
 0x2f0   : > { %v1779_v59 = vmax.f32 %v1778_v37, %v1707_v50  ;;  %v1821_v61 = vmax.f32 %v1820_v39, %v1709_v51  ;;  %v1271_v62 = vpop.f32.mrf.mxu0  ;;  %v1384_v63 = vpop.f32.mrf.mxu1 }
 0x2f1   : > { %v1800_v0 = vmax.f32 %v1799_v47, %v1708_v55  ;;  %v1842_v1 = vmax.f32 %v1841_v48, %v1710_v56  ;;  %v1715_v2 = vmax.f32 %v1270_v57, 0.0  ;;  %v1717_v3 = vmax.f32 %v1383_v58, 0.0 }
 0x2f2   : > { %v1272_v4 = vadd.f32 %v1271_v62, %v2927_v33  ;;  %v1385_v5 = vadd.f32 %v1384_v63, %v2930_v34  ;;  %v1275_v6 = vpop.f32.mrf.mxu0  ;;  %v1388_v7 = vpop.f32.mrf.mxu1 }
 0x2f3   : > { %v1780_v8 = vmax.f32 %v1779_v59, %v1715_v2  ;;  %v1822_v9 = vmax.f32 %v1821_v61, %v1717_v3  ;;  %v1276_v11 = vadd.f32 %v1275_v6, %v2921_v30  ;;  %v1389_v60 = vadd.f32 %v1388_v7, %v2924_v27 }
 0x2f4   : > { %v1716_v13 = vmax.f32 %v1272_v4, 0.0  ;;  %v1718_v14 = vmax.f32 %v1385_v5, 0.0  ;;  %v1277_v15 = vpop.f32.mrf.mxu0  ;;  %v1390_v16 = vpop.f32.mrf.mxu1 }
 0x2f5   : > { %v1723_v12 = vmax.f32 %v1276_v11, 0.0  ;;  %v1725_v17 = vmax.f32 %v1389_v60, 0.0  ;;  %v1278_v18 = vadd.f32 %v1277_v15, %v2927_v33  ;;  %v1391_v19 = vadd.f32 %v1390_v16, %v2930_v34 }
 0x2f6   : > { %v1801_v20 = vmax.f32 %v1800_v0, %v1716_v13  ;;  %v1843_v21 = vmax.f32 %v1842_v1, %v1718_v14  ;;  %v1279_v22 = vpop.f32.mrf.mxu0  ;;  %v1392_v23 = vpop.f32.mrf.mxu1 }
 0x2f7   : > { %v1781_v24 = vmax.f32 %v1780_v8, %v1723_v12  ;;  %v1823_v38 = vmax.f32 %v1822_v9, %v1725_v17  ;;  %v1724_v10 = vmax.f32 %v1278_v18, 0.0  ;;  %v1726_v25 = vmax.f32 %v1391_v19, 0.0 }
 0x2f8   : > { %v1280_v28 = vadd.f32 %v1279_v22, %v2921_v30  ;;  %v1393_v29 = vadd.f32 %v1392_v23, %v2924_v27  ;;  %v1281_v31 = vpop.f32.mrf.mxu0  ;;  %v1394_v32 = vpop.f32.mrf.mxu1 }
 0x2f9   : > { %v1802_v35 = vmax.f32 %v1801_v20, %v1724_v10  ;;  %v1844_v36 = vmax.f32 %v1843_v21, %v1726_v25  ;;  %v1282_v37 = vadd.f32 %v1281_v31, %v2927_v33  ;;  %v1395_v39 = vadd.f32 %v1394_v32, %v2930_v34 }
 0x2fa   : > { %v1731_v40 = vmax.f32 %v1280_v28, 0.0  ;;  %v1733_v41 = vmax.f32 %v1393_v29, 0.0  ;;  %v1285_v42 = vpop.f32.mrf.mxu0  ;;  %v1398_v44 = vpop.f32.mrf.mxu1 }
 0x2fb   : > { %v1732_v45 = vmax.f32 %v1282_v37, 0.0  ;;  %v1734_v46 = vmax.f32 %v1395_v39, 0.0  ;;  %v1286_v47 = vadd.f32 %v1285_v42, %v2921_v30  ;;  %v1399_v48 = vadd.f32 %v1398_v44, %v2924_v27 }
 0x2fc   : > { %v1782_v49 = vmax.f32 %v1781_v24, %v1731_v40  ;;  %v1824_v43 = vmax.f32 %v1823_v38, %v1733_v41  ;;  %v1287_v50 = vpop.f32.mrf.mxu0  ;;  %v1400_v51 = vpop.f32.mrf.mxu1 }
 0x2fd   : > { %v1803_v53 = vmax.f32 %v1802_v35, %v1732_v45  ;;  %v1845_v54 = vmax.f32 %v1844_v36, %v1734_v46  ;;  %v1739_v55 = vmax.f32 %v1286_v47, 0.0  ;;  %v1741_v56 = vmax.f32 %v1399_v48, 0.0 }
 0x2fe   : > { %v1288_v57 = vadd.f32 %v1287_v50, %v2927_v33  ;;  %v1401_v58 = vadd.f32 %v1400_v51, %v2930_v34  ;;  %v1289_v59 = vpop.f32.mrf.mxu0  ;;  %v1402_v61 = vpop.f32.mrf.mxu1 }
 0x2ff   : > { %v1783_v62 = vmax.f32 %v1782_v49, %v1739_v55  ;;  %v1825_v63 = vmax.f32 %v1824_v43, %v1741_v56  ;;  %v1290_v0 = vadd.f32 %v1289_v59, %v2921_v30  ;;  %v1403_v1 = vadd.f32 %v1402_v61, %v2924_v27 }
 0x300   : > { %v1740_v2 = vmax.f32 %v1288_v57, 0.0  ;;  %v1742_v3 = vmax.f32 %v1401_v58, 0.0  ;;  %v1291_v4 = vpop.f32.mrf.mxu0  ;;  %v1404_v5 = vpop.f32.mrf.mxu1 }
 0x301   : > { %v1747_v6 = vmax.f32 %v1290_v0, 0.0  ;;  %v1749_v7 = vmax.f32 %v1403_v1, 0.0  ;;  %v1292_v8 = vadd.f32 %v1291_v4, %v2927_v33  ;;  %v1405_v9 = vadd.f32 %v1404_v5, %v2930_v34 }
 0x302   : > { %v1804_v11 = vmax.f32 %v1803_v53, %v1740_v2  ;;  %v1846_v60 = vmax.f32 %v1845_v54, %v1742_v3  ;;  %v1295_v13 = vpop.f32.mrf.mxu0  ;;  %v1408_v14 = vpop.f32.mrf.mxu1  ;;  %v2602_v4 = vmov 1966171168  }
 0x303   : > { %v1784_v15 = vmax.f32 %v1783_v62, %v1747_v6  ;;  %v1826_v16 = vmax.f32 %v1825_v63, %v1749_v7  ;;  %v1748_v12 = vmax.f32 %v1292_v8, 0.0  ;;  %v1750_v17 = vmax.f32 %v1405_v9, 0.0 }
 0x304   : > { %v1296_v18 = vadd.f32 %v1295_v13, %v2921_v30  ;;  %v1409_v19 = vadd.f32 %v1408_v14, %v2924_v27  ;;  %v1297_v20 = vpop.f32.mrf.mxu0  ;;  %v1410_v21 = vpop.f32.mrf.mxu1  ;;  %v1953_v5 = vunpack.c.l.s4 %v2602_v4 }
 0x305   : > { %v1805_v22 = vmax.f32 %v1804_v11, %v1748_v12  ;;  %v1847_v23 = vmax.f32 %v1846_v60, %v1750_v17  ;;  %v1298_v24 = vadd.f32 %v1297_v20, %v2927_v33  ;;  %v1411_v38 = vadd.f32 %v1410_v21, %v2930_v34 }
 0x306   : > { %v1755_v10 = vmax.f32 %v1296_v18, 0.0  ;;  %v1757_v25 = vmax.f32 %v1409_v19, 0.0  ;;  %v1299_v28 = vpop.f32.mrf.mxu0  ;;  %v1412_v29 = vpop.f32.mrf.mxu1  ;;  %v1954_v12 = vunpack.c.0.s8 %v1953_v5  ;;  %v849_v17 = vsub.s32 4, %v2912_v52 }
 0x307   : > { %v1756_v31 = vmax.f32 %v1298_v24, 0.0  ;;  %v1758_v32 = vmax.f32 %v1411_v38, 0.0  ;;  %v1300_v35 = vadd.f32 %v1299_v28, %v2921_v30  ;;  %v1413_v36 = vadd.f32 %v1412_v29, %v2924_v27 }
 0x308   : > { %v1785_v37 = vmax.f32 %v1784_v15, %v1755_v10  ;;  %v1827_v39 = vmax.f32 %v1826_v16, %v1757_v25  ;;  %v1301_v40 = vpop.f32.mrf.mxu0  ;;  %v1414_v41 = vpop.f32.mrf.mxu1  ;;  %v857_v18 = vsub.s32 6, %v2912_v52  ;;  %v853_v38 = vsub.s32 5, %v2912_v52 }
 0x309   : > { %v1806_v42 = vmax.f32 %v1805_v22, %v1756_v31  ;;  %v1848_v44 = vmax.f32 %v1847_v23, %v1758_v32  ;;  %v1763_v45 = vmax.f32 %v1300_v35, 0.0  ;;  %v1765_v46 = vmax.f32 %v1413_v36, 0.0 }
 0x30a   : > { %v1302_v47 = vadd.f32 %v1301_v40, %v2927_v33  ;;  %v1415_v48 = vadd.f32 %v1414_v41, %v2930_v34  ;;  %v2996_v49 = vpop.f32.mrf.mxu0  ;;  %v2998_v43 = vpop.f32.mrf.mxu1  ;;  %v861_v10 = vsub.s32 7, %v2912_v52  ;;  %v3009_v32 = vsub.s32 %v1954_v12, %v2912_v52 }
 0x30b   : > { %v1786_v50 = vmax.f32 %v1785_v37, %v1763_v45  ;;  %v1828_v30 = vmax.f32 %v1827_v39, %v1765_v46  ;;  %v3012_v35 = vrot.slane %v2916_v26, %v849_v17  ;;  %v3015_v36 = vrot.slane %v2916_v26, %v857_v18 }
 0x30c   : > { %v1764_v51 = vmax.f32 %v1302_v47, 0.0  ;;  %v1766_v27 = vmax.f32 %v1415_v48, 0.0  ;;  %v3000_v53 = vpop.f32.mrf.mxu0  ;;  %v3002_v54 = vpop.f32.mrf.mxu1  ;;  %v3018_v45 = vrot.slane %v2916_v26, %v853_v38  ;;  %v3021_v46 = vrot.slane %v2916_v26, %v861_v10 }
 0x30d   : > { %v1787_v55 = vrot.slane %v1786_v50, 4  ;;  %v1829_v56 = vrot.slane %v1828_v30, 4  ;;  %v1565_v26 = vadd.f32 %v2998_v43, %v3015_v36 }
 0x30e   : > { %v1807_v57 = vmax.f32 %v1806_v42, %v1764_v51  ;;  %v1849_v58 = vmax.f32 %v1848_v44, %v1766_v27  ;;  %v1455_v59 = vpop.f32.mrf.mxu0  ;;  %v1568_v33 = vpop.f32.mrf.mxu1  ;;  %v1452_v27 = vadd.f32 %v2996_v49, %v3012_v35  ;;  %v1567_v49 = vadd.f32 %v3002_v54, %v3021_v46 }
 0x30f   : > { %v1788_v61 = vmax.f32 %v1786_v50, %v1787_v55  ;;  %v1830_v34 = vmax.f32 %v1828_v30, %v1829_v56  ;;  %v1456_v48 = vadd.f32 %v1455_v59, %v3012_v35  ;;  %v1569_v50 = vadd.f32 %v1568_v33, %v3015_v36 }
 0x310   : > { %v1808_v62 = vrot.slane %v1807_v57, 4  ;;  %v1850_v63 = vrot.slane %v1849_v58, 4  ;;  %v1457_v0 = vpop.f32.mrf.mxu0  ;;  %v1570_v1 = vpop.f32.mrf.mxu1  ;;  %v1649_v54 = vmax.f32 %v1565_v26, 0.0 }
 0x311   : > { %v1789_v2 = vrot.slane %v1788_v61, 2  ;;  %v1831_v3 = vrot.slane %v1830_v34, 2  ;;  %v1458_v55 = vadd.f32 %v1457_v0, %v3018_v45  ;;  %v1657_v0 = vmax.f32 %v1569_v50, 0.0 }
 0x312   : > { %v1809_v6 = vmax.f32 %v1807_v57, %v1808_v62  ;;  %v1851_v7 = vmax.f32 %v1849_v58, %v1850_v63  ;;  %v1461_v8 = vpop.f32.mrf.mxu0  ;;  %v1574_v9 = vpop.f32.mrf.mxu1  ;;  %v1571_v58 = vadd.f32 %v1570_v1, %v3021_v46  ;;  %v1655_v63 = vmax.f32 %v1456_v48, 0.0 }
 0x313   : > { %v1790_v11 = vmax.f32 %v1788_v61, %v1789_v2  ;;  %v1832_v60 = vmax.f32 %v1830_v34, %v1831_v3  ;;  %v1454_v61 = vadd.f32 %v3000_v53, %v3018_v45  ;;  %v1462_v34 = vadd.f32 %v1461_v8, %v3012_v35 }
 0x314   : > { %v1810_v13 = vrot.slane %v1809_v6, 2  ;;  %v1852_v14 = vrot.slane %v1851_v7, 2  ;;  %v1463_v15 = vpop.f32.mrf.mxu0  ;;  %v1576_v16 = vpop.f32.mrf.mxu1  ;;  %v1575_v2 = vadd.f32 %v1574_v9, %v3015_v36  ;;  %v1656_v1 = vmax.f32 %v1458_v55, 0.0 }
 0x315   : > { %v1791_v19 = vrot.slane %v1790_v11, 1  ;;  %v1833_v20 = vrot.slane %v1832_v60, 1  ;;  %v1464_v4 = vadd.f32 %v1463_v15, %v3018_v45  ;;  %v1577_v5 = vadd.f32 %v1576_v16, %v3021_v46 }
 0x316   : > { %v1811_v21 = vmax.f32 %v1809_v6, %v1810_v13  ;;  %v1853_v22 = vmax.f32 %v1851_v7, %v1852_v14  ;;  %v1465_v23 = vpop.f32.mrf.mxu0  ;;  %v1578_v24 = vpop.f32.mrf.mxu1  ;;  %v1647_v6 = vmax.f32 %v1452_v27, 0.0  ;;  %v1658_v7 = vmax.f32 %v1571_v58, 0.0 }
 0x317   : > { %v1792_v37 = vmax.f32 %v1790_v11, %v1791_v19  ;;  %v1834_v39 = vmax.f32 %v1832_v60, %v1833_v20  ;;  %v1466_v53 = vadd.f32 %v1465_v23, %v3012_v35  ;;  %v1579_v8 = vadd.f32 %v1578_v24, %v3015_v36 }
 0x318   : > { %v1812_v25 = vrot.slane %v1811_v21, 1  ;;  %v1854_v28 = vrot.slane %v1853_v22, 1  ;;  %v1467_v29 = vpop.f32.mrf.mxu0  ;;  %v1580_v31 = vpop.f32.mrf.mxu1  ;;  %v1648_v13 = vmax.f32 %v1454_v61, 0.0  ;;  %v1650_v14 = vmax.f32 %v1567_v49, 0.0 }
 0x319   : > { %v1663_v12 = vmax.f32 %v1462_v34, 0.0  ;;  %v1468_v9 = vadd.f32 %v1467_v29, %v3018_v45  ;;  %v1856_v17 = vmax.f32 %v1647_v6, %v1655_v63  ;;  %v1898_v18 = vmax.f32 %v1649_v54, %v1657_v0 }
 0x31a   : > { %v1813_v40 = vmax.f32 %v1811_v21, %v1812_v25  ;;  %v1855_v41 = vmax.f32 %v1853_v22, %v1854_v28  ;;  %v1471_v42 = vpop.f32.mrf.mxu0  ;;  %v1584_v44 = vpop.f32.mrf.mxu1  ;;  %v1665_v19 = vmax.f32 %v1575_v2, 0.0  ;;  %v1581_v15 = vadd.f32 %v1580_v31, %v3021_v46 }
 0x31b   : > { %v1877_v21 = vmax.f32 %v1648_v13, %v1656_v1  ;;  %v1664_v22 = vmax.f32 %v1464_v4, 0.0  ;;  %v1666_v23 = vmax.f32 %v1577_v5, 0.0  ;;  %v1671_v38 = vmax.f32 %v1466_v53, 0.0 }
 0x31c   : > { %v1948_v52 = vcombine.low %v1792_v37, %v1813_v40  ;;  %v1949_v47 = vcombine.low %v1834_v39, %v1855_v41  ;;  %v1473_v30 = vpop.f32.mrf.mxu0  ;;  %v1586_v51 = vpop.f32.mrf.mxu1  ;;  %v1919_v10 = vmax.f32 %v1650_v14, %v1658_v7  ;;  %v1673_v24 = vmax.f32 %v1579_v8, 0.0 }
 0x31d   : > { %v1472_v25 = vadd.f32 %v1471_v42, %v3012_v35  ;;  %v1585_v28 = vadd.f32 %v1584_v44, %v3015_v36  ;;  %v1857_v29 = vmax.f32 %v1856_v17, %v1663_v12  ;;  %v1672_v40 = vmax.f32 %v1468_v9, 0.0 }
 0x31e   : > { %v3029_v56 = vrot.slane %v1948_v52, %v3009_v32  ;;  %v3032_v57 = vrot.slane %v1949_v47, %v3009_v32  ;;  %v1475_v59 = vpop.f32.mrf.mxu0  ;;  %v1588_v33 = vpop.f32.mrf.mxu1  ;;  %v1474_v41 = vadd.f32 %v1473_v30, %v3018_v45  ;;  %v1587_v31 = vadd.f32 %v1586_v51, %v3021_v46 }
 0x31f   : > { %v1899_v52 = vmax.f32 %v1898_v18, %v1665_v19  ;;  %v1674_v47 = vmax.f32 %v1581_v15, 0.0  ;;  %v1476_v48 = vadd.f32 %v1475_v59, %v3012_v35  ;;  %v1589_v50 = vadd.f32 %v1588_v33, %v3015_v36 }
 0x320   : > { %v1980_v62 = vcombine.low %v3029_v56, %v3032_v57  ;;  %v1477_v43 = vpop.f32.mrf.mxu0  ;;  %v1590_v3 = vpop.f32.mrf.mxu1  ;;  %v1878_v26 = vmax.f32 %v1877_v21, %v1664_v22  ;;  %v1920_v42 = vmax.f32 %v1919_v10, %v1666_v23  ;;  %v1858_v58 = vmax.f32 %v1857_v29, %v1671_v38 }
 0x321   : > { %v1478_v44 = vadd.f32 %v1477_v43, %v3018_v45  ;;  %v1900_v61 = vmax.f32 %v1899_v52, %v1673_v24  ;;  %v1679_v49 = vmax.f32 %v1472_v25, 0.0  ;;  %v1681_v34 = vmax.f32 %v1585_v28, 0.0 }
 0x322   : > { %v1481_v11 = vpop.f32.mrf.mxu0  ;;  %v1594_v60 = vpop.f32.mrf.mxu1  ;;  %v1591_v30 = vadd.f32 %v1590_v3, %v3021_v46  ;;  %v1879_v0 = vmax.f32 %v1878_v26, %v1672_v40  ;;  %v1680_v2 = vmax.f32 %v1474_v41, 0.0  ;;  %v1682_v1 = vmax.f32 %v1587_v31, 0.0 }
 0x323   : > { %v1482_v59 = vadd.f32 %v1481_v11, %v3012_v35  ;;  %v1921_v33 = vmax.f32 %v1920_v42, %v1674_v47  ;;  %v1687_v4 = vmax.f32 %v1476_v48, 0.0  ;;  %v1689_v5 = vmax.f32 %v1589_v50, 0.0 }
 0x324   : > { %v1483_v16 = vpop.f32.mrf.mxu0  ;;  %v1596_v20 = vpop.f32.mrf.mxu1  ;;  %v1595_v53 = vadd.f32 %v1594_v60, %v3015_v36  ;;  %v1688_v43 = vmax.f32 %v1478_v44, 0.0  ;;  %v1859_v13 = vmax.f32 %v1858_v58, %v1679_v49  ;;  %v1901_v14 = vmax.f32 %v1900_v61, %v1681_v34 }
 0x325   : > { %v1484_v7 = vadd.f32 %v1483_v16, %v3018_v45  ;;  %v1597_v8 = vadd.f32 %v1596_v20, %v3021_v46  ;;  %v1690_v12 = vmax.f32 %v1591_v30, 0.0  ;;  %v1880_v18 = vmax.f32 %v1879_v0, %v1680_v2 }
 0x326   : > { %v1485_v37 = vpop.f32.mrf.mxu0  ;;  %v1598_v39 = vpop.f32.mrf.mxu1  ;;  %v1922_v19 = vmax.f32 %v1921_v33, %v1682_v1  ;;  %v1695_v15 = vmax.f32 %v1482_v59, 0.0  ;;  %v1860_v21 = vmax.f32 %v1859_v13, %v1687_v4  ;;  %v1902_v22 = vmax.f32 %v1901_v14, %v1689_v5 }
 0x327   : > { %v1486_v3 = vadd.f32 %v1485_v37, %v3012_v35  ;;  %v1599_v9 = vadd.f32 %v1598_v39, %v3015_v36  ;;  %v1697_v23 = vmax.f32 %v1595_v53, 0.0  ;;  %v1881_v10 = vmax.f32 %v1880_v18, %v1688_v43 }
 0x328   : > { %v1487_v27 = vpop.f32.mrf.mxu0  ;;  %v1600_v55 = vpop.f32.mrf.mxu1  ;;  %v1696_v24 = vmax.f32 %v1484_v7, 0.0  ;;  %v1698_v25 = vmax.f32 %v1597_v8, 0.0  ;;  %v1923_v37 = vmax.f32 %v1922_v19, %v1690_v12  ;;  %v1861_v52 = vmax.f32 %v1860_v21, %v1695_v15 }
 0x329   : > { %v1488_v60 = vadd.f32 %v1487_v27, %v3018_v45  ;;  %v1601_v16 = vadd.f32 %v1600_v55, %v3021_v46  ;;  %v1703_v28 = vmax.f32 %v1486_v3, 0.0  ;;  %v1705_v39 = vmax.f32 %v1599_v9, 0.0 }
 0x32a   : > { %v1491_v63 = vpop.f32.mrf.mxu0  ;;  %v1604_v51 = vpop.f32.mrf.mxu1  ;;  %v1903_v27 = vmax.f32 %v1902_v22, %v1697_v23  ;;  %v1882_v61 = vmax.f32 %v1881_v10, %v1696_v24  ;;  %v1924_v49 = vmax.f32 %v1923_v37, %v1698_v25 }
 0x32b   : > { %v1492_v29 = vadd.f32 %v1491_v63, %v3012_v35  ;;  %v1605_v40 = vadd.f32 %v1604_v51, %v3015_v36  ;;  %v1704_v47 = vmax.f32 %v1488_v60, 0.0  ;;  %v1706_v55 = vmax.f32 %v1601_v16, 0.0 }
 0x32c   : > { %v1493_v6 = vpop.f32.mrf.mxu0  ;;  %v1606_v54 = vpop.f32.mrf.mxu1  ;;  %v1862_v34 = vmax.f32 %v1861_v52, %v1703_v28  ;;  %v1904_v63 = vmax.f32 %v1903_v27, %v1705_v39 }
 0x32d   : > { %v1494_v48 = vadd.f32 %v1493_v6, %v3018_v45  ;;  %v1607_v50 = vadd.f32 %v1606_v54, %v3021_v46  ;;  %v1711_v51 = vmax.f32 %v1492_v29, 0.0  ;;  %v1713_v0 = vmax.f32 %v1605_v40, 0.0 }
 0x32e   : > { %v1495_v11 = vpop.f32.mrf.mxu0  ;;  %v1608_v17 = vpop.f32.mrf.mxu1  ;;  %v1883_v33 = vmax.f32 %v1882_v61, %v1704_v47  ;;  %v1925_v6 = vmax.f32 %v1924_v49, %v1706_v55 }
 0x32f   : > { %v1496_v26 = vadd.f32 %v1495_v11, %v3012_v35  ;;  %v1609_v42 = vadd.f32 %v1608_v17, %v3015_v36  ;;  %v1712_v4 = vmax.f32 %v1494_v48, 0.0  ;;  %v1714_v5 = vmax.f32 %v1607_v50, 0.0 }
 0x330   : > { %v1497_v20 = vpop.f32.mrf.mxu0  ;;  %v1610_v38 = vpop.f32.mrf.mxu1  ;;  %v1863_v11 = vmax.f32 %v1862_v34, %v1711_v51  ;;  %v1905_v17 = vmax.f32 %v1904_v63, %v1713_v0 }
 0x331   : > { %v1498_v30 = vadd.f32 %v1497_v20, %v3018_v45  ;;  %v1611_v2 = vadd.f32 %v1610_v38, %v3021_v46  ;;  %v1719_v54 = vmax.f32 %v1496_v26, 0.0  ;;  %v1721_v43 = vmax.f32 %v1609_v42, 0.0 }
 0x332   : > { %v1501_v41 = vpop.f32.mrf.mxu0  ;;  %v1614_v31 = vpop.f32.mrf.mxu1  ;;  %v1884_v21 = vmax.f32 %v1883_v33, %v1712_v4  ;;  %v1926_v22 = vmax.f32 %v1925_v6, %v1714_v5 }
 0x333   : > { %v1502_v53 = vadd.f32 %v1501_v41, %v3012_v35  ;;  %v1615_v7 = vadd.f32 %v1614_v31, %v3015_v36  ;;  %v1720_v13 = vmax.f32 %v1498_v30, 0.0  ;;  %v1722_v18 = vmax.f32 %v1611_v2, 0.0 }
 0x334   : > { %v1503_v58 = vpop.f32.mrf.mxu0  ;;  %v1616_v44 = vpop.f32.mrf.mxu1  ;;  %v1864_v20 = vmax.f32 %v1863_v11, %v1719_v54  ;;  %v1906_v38 = vmax.f32 %v1905_v17, %v1721_v43 }
 0x335   : > { %v1504_v14 = vadd.f32 %v1503_v58, %v3018_v45  ;;  %v1617_v12 = vadd.f32 %v1616_v44, %v3021_v46  ;;  %v1727_v23 = vmax.f32 %v1502_v53, 0.0  ;;  %v1729_v10 = vmax.f32 %v1615_v7, 0.0 }
 0x336   : > { %v1505_v1 = vpop.f32.mrf.mxu0  ;;  %v1618_v59 = vpop.f32.mrf.mxu1  ;;  %v1885_v37 = vmax.f32 %v1884_v21, %v1720_v13  ;;  %v1927_v41 = vmax.f32 %v1926_v22, %v1722_v18 }
 0x337   : > { %v1506_v9 = vadd.f32 %v1505_v1, %v3012_v35  ;;  %v1619_v19 = vadd.f32 %v1618_v59, %v3015_v36  ;;  %v1728_v39 = vmax.f32 %v1504_v14, 0.0  ;;  %v1730_v29 = vmax.f32 %v1617_v12, 0.0 }
 0x338   : > { %v1507_v8 = vpop.f32.mrf.mxu0  ;;  %v1620_v3 = vpop.f32.mrf.mxu1  ;;  %v1865_v27 = vmax.f32 %v1864_v20, %v1727_v23  ;;  %v1907_v58 = vmax.f32 %v1906_v38, %v1729_v10 }
 0x339   : > { %v1508_v16 = vadd.f32 %v1507_v8, %v3018_v45  ;;  %v1735_v40 = vmax.f32 %v1506_v9, 0.0  ;;  %v1737_v31 = vmax.f32 %v1619_v19, 0.0  ;;  %v1621_v52 = vadd.f32 %v1620_v3, %v3021_v46 }
 0x33a   : > { %v1511_v15 = vpop.f32.mrf.mxu0  ;;  %v1624_v60 = vpop.f32.mrf.mxu1  ;;  %v1886_v63 = vmax.f32 %v1885_v37, %v1728_v39  ;;  %v1928_v51 = vmax.f32 %v1927_v41, %v1730_v29 }
 0x33b   : > { %v1512_v24 = vadd.f32 %v1511_v15, %v3012_v35  ;;  %v1625_v47 = vadd.f32 %v1624_v60, %v3015_v36  ;;  %v1736_v55 = vmax.f32 %v1508_v16, 0.0  ;;  %v1866_v0 = vmax.f32 %v1865_v27, %v1735_v40 }
 0x33c   : > { %v1513_v25 = vpop.f32.mrf.mxu0  ;;  %v1626_v28 = vpop.f32.mrf.mxu1  ;;  %v1908_v1 = vmax.f32 %v1907_v58, %v1737_v31  ;;  %v1738_v59 = vmax.f32 %v1621_v52, 0.0 }
 0x33d   : > { %v1514_v26 = vadd.f32 %v1513_v25, %v3018_v45  ;;  %v1743_v44 = vmax.f32 %v1512_v24, 0.0  ;;  %v1627_v61 = vadd.f32 %v1626_v28, %v3021_v46  ;;  %v1745_v33 = vmax.f32 %v1625_v47, 0.0 }
 0x33e   : > { %v1515_v48 = vpop.f32.mrf.mxu0  ;;  %v1628_v50 = vpop.f32.mrf.mxu1  ;;  %v1887_v6 = vmax.f32 %v1886_v63, %v1736_v55  ;;  %v1929_v15 = vmax.f32 %v1928_v51, %v1738_v59 }
 0x33f   : > { %v1516_v42 = vadd.f32 %v1515_v48, %v3012_v35  ;;  %v1629_v49 = vadd.f32 %v1628_v50, %v3015_v36  ;;  %v1744_v54 = vmax.f32 %v1514_v26, 0.0  ;;  %v1867_v8 = vmax.f32 %v1866_v0, %v1743_v44 }
 0x340   : > { %v1517_v34 = vpop.f32.mrf.mxu0  ;;  %v1630_v30 = vpop.f32.mrf.mxu1  ;;  %v1746_v3 = vmax.f32 %v1627_v61, 0.0  ;;  %v1909_v60 = vmax.f32 %v1908_v1, %v1745_v33 }
 0x341   : > { %v1518_v2 = vadd.f32 %v1517_v34, %v3018_v45  ;;  %v1631_v4 = vadd.f32 %v1630_v30, %v3021_v46  ;;  %v1751_v43 = vmax.f32 %v1516_v42, 0.0  ;;  %v1753_v13 = vmax.f32 %v1629_v49, 0.0 }
 0x342   : > { %v1521_v5 = vpop.f32.mrf.mxu0  ;;  %v1634_v53 = vpop.f32.mrf.mxu1  ;;  %v1888_v20 = vmax.f32 %v1887_v6, %v1744_v54  ;;  %v1930_v25 = vmax.f32 %v1929_v15, %v1746_v3 }
 0x343   : > { %v1522_v7 = vadd.f32 %v1521_v5, %v3012_v35  ;;  %v1635_v14 = vadd.f32 %v1634_v53, %v3015_v36  ;;  %v1752_v11 = vmax.f32 %v1518_v2, 0.0  ;;  %v1754_v21 = vmax.f32 %v1631_v4, 0.0 }
 0x344   : > { %v1523_v12 = vpop.f32.mrf.mxu0  ;;  %v1636_v9 = vpop.f32.mrf.mxu1  ;;  %v1868_v38 = vmax.f32 %v1867_v8, %v1751_v43  ;;  %v1910_v28 = vmax.f32 %v1909_v60, %v1753_v13  ;;  %v1988_v60 = vrot.slane %v1980_v62, %v3009_v32 }
 0x345   : > { %v1759_v17 = vmax.f32 %v1522_v7, 0.0  ;;  %v1524_v18 = vadd.f32 %v1523_v12, %v3018_v45  ;;  %v1637_v19 = vadd.f32 %v1636_v9, %v3021_v46  ;;  %v1761_v22 = vmax.f32 %v1635_v14, 0.0 }
 0x346   : > { %v1525_v23 = vpop.f32.mrf.mxu0  ;;  %v1638_v16 = vpop.f32.mrf.mxu1  ;;  %v1889_v41 = vmax.f32 %v1888_v20, %v1752_v11  ;;  %v1931_v48 = vmax.f32 %v1930_v25, %v1754_v21 }
 0x347   : > { %v1760_v10 = vmax.f32 %v1524_v18, 0.0  ;;  %v1526_v24 = vadd.f32 %v1525_v23, %v3012_v35  ;;  %v1762_v37 = vmax.f32 %v1637_v19, 0.0  ;;  %v1639_v39 = vadd.f32 %v1638_v16, %v3015_v36 }
 0x348   : > { %v1527_v29 = vpop.f32.mrf.mxu0  ;;  %v1640_v40 = vpop.f32.mrf.mxu1  ;;  %v1869_v31 = vmax.f32 %v1868_v38, %v1759_v17  ;;  %v1911_v50 = vmax.f32 %v1910_v28, %v1761_v22  ;;  %v1771_v22 = vld [vmem:[%s2770_s18] sm:$0xff] }
 0x349   : > { %v1767_v52 = vmax.f32 %v1526_v24, 0.0  ;;  %v1528_v47 = vadd.f32 %v1527_v29, %v3018_v45  ;;  %v1769_v27 = vmax.f32 %v1639_v39, 0.0  ;;  %v1641_v55 = vadd.f32 %v1640_v40, %v3021_v46 }
 0x34a   : > { %v1890_v26 = vmax.f32 %v1889_v41, %v1760_v10  ;;  %v1932_v58 = vmax.f32 %v1931_v48, %v1762_v37 }
 0x34b   : > { %v1870_v42 = vmax.f32 %v1869_v31, %v1767_v52  ;;  %v1768_v35 = vmax.f32 %v1528_v47, 0.0  ;;  %v1912_v44 = vmax.f32 %v1911_v50, %v1769_v27  ;;  %v1770_v61 = vmax.f32 %v1641_v55, 0.0 }
 0x34d   : > { %v1871_v49 = vrot.slane %v1870_v42, 4  ;;  %v1891_v36 = vmax.f32 %v1890_v26, %v1768_v35  ;;  %v1913_v34 = vrot.slane %v1912_v44, 4  ;;  %v1933_v30 = vmax.f32 %v1932_v58, %v1770_v61 }
 0x34f   : > { %v1872_v63 = vmax.f32 %v1870_v42, %v1871_v49  ;;  %v1892_v51 = vrot.slane %v1891_v36, 4  ;;  %v1914_v0 = vmax.f32 %v1912_v44, %v1913_v34  ;;  %v1934_v2 = vrot.slane %v1933_v30, 4 }
 0x351   : > { %v1873_v45 = vrot.slane %v1872_v63, 2  ;;  %v1893_v1 = vmax.f32 %v1891_v36, %v1892_v51  ;;  %v1915_v59 = vrot.slane %v1914_v0, 2  ;;  %v1935_v33 = vmax.f32 %v1933_v30, %v1934_v2 }
 0x353   : > { %v1874_v4 = vmax.f32 %v1872_v63, %v1873_v45  ;;  %v1894_v46 = vrot.slane %v1893_v1, 2  ;;  %v1916_v5 = vmax.f32 %v1914_v0, %v1915_v59  ;;  %v1936_v53 = vrot.slane %v1935_v33, 2 }
 0x355   : > { %v1875_v6 = vrot.slane %v1874_v4, 1  ;;  %v1895_v54 = vmax.f32 %v1893_v1, %v1894_v46  ;;  %v1917_v43 = vrot.slane %v1916_v5, 1  ;;  %v1937_v7 = vmax.f32 %v1935_v33, %v1936_v53 }
 0x357   : > { %v1896_v8 = vrot.slane %v1895_v54, 1  ;;  %v1938_v3 = vrot.slane %v1937_v7, 1  ;;  %v1876_v13 = vmax.f32 %v1874_v4, %v1875_v6  ;;  %v1918_v12 = vmax.f32 %v1916_v5, %v1917_v43 }
 0x359   : > { %v1897_v14 = vmax.f32 %v1895_v54, %v1896_v8  ;;  %v1939_v9 = vmax.f32 %v1937_v7, %v1938_v3 }
 0x35b   : > { %v1950_v11 = vcombine.low %v1876_v13, %v1897_v14  ;;  %v1951_v17 = vcombine.low %v1918_v12, %v1939_v9 }
 0x35d   : > { %v1972_v18 = vrot.slane %v1950_v11, %v3009_v32  ;;  %v1979_v19 = vrot.slane %v1951_v17, %v3009_v32 }
 0x35f   : > { %v1981_v15 = vcombine.low %v1972_v18, %v1979_v19 }
 0x361   : > { %v1995_v21 = vrot.slane %v1981_v15, %v3009_v32 }
 0x363   : > { %v1996_v23 = vcombine.low %v1988_v60, %v1995_v21 }
 0x365   : > { %v1998_v16 = vmax.f32 %v1771_v22, %v1996_v23 }
 0x367   : > { %1999 = vst [vmem:[%s2770_s18] sm:$0xff] %v1998_v16 }
 0x368 PF: > { %s20_s28 = sadd.s32 1, %s2588_s28   ;;  %s3135_s24 = smov %s2580_s26 }
 0x369   : > { %p17_p6 = scmp.ge.s32.totalorder %s20_s28, 10   ;;  %s3136_s25 = smov %s2584_s27 }
 0x36a   : > { %s3137_s26 = smov %s3140_s30  ;;  %s3138_s27 = smov %s3144_s8 }
 0x36b   :  { %19 = sbr.rel (!%p17_p6) target bundleno = 5 (0x5), region = 106 }
 0x370   :  { %2019 = vsyncpa [#allocation3], 1 }
 0x371   :  { %2021 = vsyncpa [#allocation3 + $0x1], 1 }
 0x372   :  { %2022 = vsyncpa [#allocation5], 1 }
 0x373   :  { %2023 = vsyncpa [#allocation8], 1 }

// kernel: _lambda_.5
= control target key start
LH: loop header
LB: loop body
LE: loop exit
PB: predicated region body
PF: predicated region fallthrough
CT: control target
= control target key end

     0   :  { %s2181_s24 = smov 0   ;;  %s2183_s25 = smov 0   ;;  %s2815_s0 = inlined_call_operand.vmem [shape: f32[2,512,3], index: 0, kind: input, shape index: {}]   ;;  %s2816_s1 = inlined_call_operand.vmem [shape: bf16[2,3,64], index: 1, kind: input, shape index: {}]   ;;  %s2817_s2 = inlined_call_operand.vmem [shape: f32[1,64], index: 2, kind: input, shape index: {}]   ;;  %s2818_s3 = inlined_call_operand.vmem [shape: bf16[64,128], index: 3, kind: input, shape index: {}]   ;;  %s2819_s4 = inlined_call_operand.vmem [shape: f32[1,128], index: 4, kind: input, shape index: {}]   ;;  %s2820_s5 = inlined_call_operand.vmem [shape: bf16[128,1024], index: 5, kind: input, shape index: {}]   ;;  %s2821_s6 = inlined_call_operand.vmem [shape: f32[1,1024], index: 6, kind: input, shape index: {}]   ;;  %s2822_s7 = inlined_call_operand.vmem [shape: f32[2,1,1024], index: 7, kind: output, shape index: {}]  }
   0x1   :  { %s2185_s26 = smov 0   ;;  %s2187_s27 = smov 0  }
   0x2   :  { %s2189_s28 = smov 0  }
   0x3 LB: > { %s26_s29 = sadd.s32 1, %s2127_s26  ;;  %s29_s30 = sadd.s32 1, %s2131_s27  ;;  %s2135_s28 = sphi %s2189_s28, %s17_s28   ;;  %s2131_s27 = sphi %s2187_s27, %s2826_s27   ;;  %s2127_s26 = sphi %s2185_s26, %s2825_s26   ;;  %s2123_s25 = sphi %s2183_s25, %s2824_s25   ;;  %s2119_s24 = sphi %s2181_s24, %s2823_s24  }
   0x4   : > { %p27_p0 = scmp.ge.s32.totalorder %s26_s29, 4  ;;  %p1891_p1 = scmp.ge.s32.totalorder %s2135_s28, 1 }
   0x5   : > { %p265_p2 = scmp.lt.s32.totalorder %s2135_s28, 9 }
   0x6   : > { %s2828_s29 = smov (%p27_p0, %s26_s29), 0  ;;  %s2830_s30 = smov (!%p27_p0, %s29_s30), %s2131_s27 }
   0x7   : > { %p266_p3 = pnand %p1891_p1, %p265_p2  ;;  %p31_p4 = scmp.ge.s32.totalorder %s2830_s30, 2 }
   0x8   : > { %s1892_s8 = sshll.u32 (!%p266_p3), %s2119_s24, 4  ;;  %p305_p5 = scmp.lt.s32.totalorder (!%p266_p3), %s2123_s25, 1 }
   0x9   : > { %s2832_s30 = smov (%p31_p4, %s2830_s30), 0  ;;  %269 = sbr.rel (%p266_p3) target bundleno = 794 (0x31a), region = 48 }
   0xa   : > { %p307_p6 = scmp.lt.s32.totalorder (!%p266_p3), %s1892_s8, 63  ;;  %p1897_p7 = scmp.ne.s32.totalorder (!%p266_p3), %s2119_s24, 0 }
   0xe   : > { %s2834_s25 = smov (!%p305_p5, %s2123_s25), 1  ;;  %s2836_s8 = smov (!%p307_p6, %s1892_s8), 63 }
   0xf   : > { %s1893_s9 = sshll.u32 %s2834_s25, 6  ;;  %s1895_s10 = sshll.u32 %s2834_s25, 1 }
  0x10   : > { %s310_s11 = sadd.s32 %s1893_s9, %s2836_s8  ;;  %s317_s14 = scalar_lea.vmem %s2816_s1, %s1895_s10 }
  0x11   : > { %s1894_s15 = sshll.u32 %s310_s11, 3  ;;  %s1896_s16 = sshll.u32 %s2834_s25, 3 }
  0x12   : > { %s2220_s19 = scalar_lea.vmem %s2815_s0, %s1894_s15  ;;  %s2225_s22 = scalar_lea.vmem %s2822_s7, %s1896_s16 }
  0x13   : > { %326 = sbr.rel (%p1897_p7) target bundleno = 26 (0x1a), region = 52 }
  0x18   : > { %v2137_v0 = vmov -inf  }
  0x19   : > { %327 = vst [vmem:[%s2225_s22] sm:$0xff] %v2137_v0 }
  0x1a PF: > { %v352_v1 = vld [vmem:[%s317_s14] sm:$0x3]  ;;  %vm385_vm0 = vcmask 1040384   ;;  %vm386_vm1 = vcmask 1041408   ;;  %v2138_v3 = vmov 65535   ;;  %v329_v5 = vld [vmem:[%s2220_s19 + $0x8] sm:$0xff] }
  0x1b   : > { %v328_v2 = vld [vmem:[%s2220_s19] sm:$0xff]  ;;  %v387_v4 = vsel %vm385_vm0, 4294967295, %v2138_v3  ;;  %vm360_vm2 = vcmask 23552   ;;  %v330_v8 = vld [vmem:[%s2220_s19 + $0x10] sm:$0xff]  ;;  %v331_v9 = vld [vmem:[%s2220_s19 + $0x18] sm:$0xff]  ;;  %vm552_vm3 = vcmask 523264  }
  0x1c   : > { %v388_v6 = vsel %vm386_vm1, %v387_v4, 0  ;;  %v344_v7 = vpack.c.bf16 %v329_v5, %v328_v2  ;;  %v332_v11 = vld [vmem:[%s2220_s19 + $0x20] sm:$0xff]  ;;  %v333_v12 = vld [vmem:[%s2220_s19 + $0x28] sm:$0xff]  ;;  %v345_v13 = vpack.c.bf16 %v331_v9, %v330_v8  ;;  %v2093_v15 = vld [vmem:[%s2818_s3 + $0x18] sm:$0xff]  }
  0x1d   : > { %v390_v10 = vand.u32 %v388_v6, %v352_v1  ;;  %v346_v14 = vpack.c.bf16 %v333_v12, %v332_v11  ;;  %2025 = vmatprep.subr.bf16.mxu1 %v2093_v15  ;;  %v334_v16 = vld [vmem:[%s2220_s19 + $0x30] sm:$0xff]  ;;  %v335_v17 = vld [vmem:[%s2220_s19 + $0x38] sm:$0xff]  ;;  %v336_v18 = vld [vmem:[%s2220_s19 + $0x40] sm:$0xff] }
  0x1e   : > { %2009 = vmatprep.mubr.msk.bf16.mxu0 %vm360_vm2, %v344_v7  ;;  %2026 = vmatpush3.bf16.msra.mxu1 %v2093_v15  ;;  %v337_v19 = vld [vmem:[%s2220_s19 + $0x48] sm:$0xff]  ;;  %v347_v20 = vpack.c.bf16 %v335_v17, %v334_v16  ;;  %v338_v22 = vld [vmem:[%s2220_s19 + $0x50] sm:$0xff]  ;;  %v339_v23 = vld [vmem:[%s2220_s19 + $0x58] sm:$0xff] }
  0x1f   : > { %2007 = vmatprep.subr.bf16.mxu0 %v390_v10  ;;  %v348_v21 = vpack.c.bf16 %v337_v19, %v336_v18  ;;  %v340_v24 = vld [vmem:[%s2220_s19 + $0x60] sm:$0xff]  ;;  %v341_v25 = vld [vmem:[%s2220_s19 + $0x68] sm:$0xff]  ;;  %v349_v26 = vpack.c.bf16 %v339_v23, %v338_v22  ;;  %v342_v28 = vld [vmem:[%s2220_s19 + $0x70] sm:$0xff] }
  0x20   : > { %2008 = vmatpush3.bf16.msra.mxu0 %v390_v10  ;;  %v350_v27 = vpack.c.bf16 %v341_v25, %v340_v24  ;;  %v343_v29 = vld [vmem:[%s2220_s19 + $0x78] sm:$0xff]  ;;  %v2094_v31 = vld [vmem:[%s2818_s3 + $0x10] sm:$0xff]   ;;  %v2095_v32 = vld [vmem:[%s2818_s3 + $0x8] sm:$0xff]  }
  0x21   : > { %v351_v30 = vpack.c.bf16 %v343_v29, %v342_v28  ;;  %2027 = vmatprep.subr.bf16.mxu1 %v2094_v31  ;;  %v2096_v33 = vld [vmem:[%s2818_s3] sm:$0xff]   ;;  %v2274_v36 = vld [vmem:[%s2820_s5 + $0x1c8] sm:$0xff] }
  0x22   : > { %2028 = vmatpush3.bf16.msra.mxu1 %v2094_v31  ;;  %v754_v34 = vld [vmem:[%s2820_s5 + $0x1c0] sm:$0xff]  ;;  %v2279_v39 = vld [vmem:[%s2820_s5 + $0x1e8] sm:$0xff] }
  0x23   : > { %2010 = vmatmul.mubr.msk.bf16.vlgmr.msra.gmra.mxu0 %vm360_vm2, %v345_v13  ;;  %2029 = vmatprep.subr.bf16.mxu1 %v2095_v32  ;;  %v758_v35 = vld [vmem:[%s2820_s5 + $0x1e0] sm:$0xff]  ;;  %v1978_v42 = vcombine.low %v2274_v36, %v2279_v39  ;;  %v1979_v43 = vcombine.high %v2274_v36, %v2279_v39  ;;  %v747_v7 = vld [vmem:[%s2820_s5 + $0x188] sm:$0xff] }
  0x24   : > { %2013 = vmatprep.mubr.msk.bf16.mxu0 %vm360_vm2, %v346_v14  ;;  %v1976_v37 = vcombine.low %v754_v34, %v758_v35  ;;  %v1977_v38 = vcombine.high %v754_v34, %v758_v35  ;;  %v746_v40 = vld [vmem:[%s2820_s5 + $0x180] sm:$0xff]  ;;  %v751_v8 = vld [vmem:[%s2820_s5 + $0x1a8] sm:$0xff] }
  0x25   : > { %v750_v41 = vld [vmem:[%s2820_s5 + $0x1a0] sm:$0xff]  ;;  %v1971_v16 = vcombine.high %v747_v7, %v751_v8  ;;  %v739_v18 = vld [vmem:[%s2820_s5 + $0x148] sm:$0xff]  ;;  %v1970_v25 = vcombine.low %v747_v7, %v751_v8 }
  0x26   : > { %2030 = vmatpush3.bf16.msra.mxu1 %v2095_v32  ;;  %v1969_v44 = vcombine.high %v746_v40, %v750_v41  ;;  %v738_v45 = vld [vmem:[%s2820_s5 + $0x140] sm:$0xff]  ;;  %1124 = vmatprep.subr.bf16.mxu0 %v1977_v38  ;;  %v1968_v47 = vcombine.low %v746_v40, %v750_v41  ;;  %v743_v19 = vld [vmem:[%s2820_s5 + $0x168] sm:$0xff] }
  0x27   : > { %2031 = vmatprep.subr.bf16.mxu1 %v2096_v33  ;;  %v742_v46 = vld [vmem:[%s2820_s5 + $0x160] sm:$0xff]  ;;  %1125 = vmatpush1.bf16.msra.mxu0 %v1976_v37  ;;  %v731_v29 = vld [vmem:[%s2820_s5 + $0x108] sm:$0xff]  ;;  %v1962_v36 = vcombine.low %v739_v18, %v743_v19 }
  0x28   : > { %1126 = vmatprep.subr.bf16.mxu0 %v1969_v44  ;;  %v1961_v48 = vcombine.high %v738_v45, %v742_v46  ;;  %v730_v49 = vld [vmem:[%s2820_s5 + $0x100] sm:$0xff]  ;;  %v1960_v51 = vcombine.low %v738_v45, %v742_v46  ;;  %v723_v40 = vld [vmem:[%s2820_s5 + $0xc8] sm:$0xff] }
  0x29   : > { %v734_v50 = vld [vmem:[%s2820_s5 + $0x120] sm:$0xff]  ;;  %v727_v41 = vld [vmem:[%s2820_s5 + $0xe8] sm:$0xff] }
  0x2a   : > { %2032 = vmatpush3.bf16.msra.mxu1 %v2096_v33  ;;  %v1953_v52 = vcombine.high %v730_v49, %v734_v50  ;;  %v722_v53 = vld [vmem:[%s2820_s5 + $0xc0] sm:$0xff]  ;;  %v1952_v55 = vcombine.low %v730_v49, %v734_v50  ;;  %v1947_v49 = vcombine.high %v723_v40, %v727_v41  ;;  %v719_v7 = vld [vmem:[%s2820_s5 + $0xa8] sm:$0xff] }
  0x2b   : > { %2014 = vmatmul.mubr.msk.bf16.gmra.mxu0 %vm360_vm2, %v347_v20  ;;  %1237 = vmatprep.subr.bf16.mxu1 %v1979_v43  ;;  %v726_v54 = vld [vmem:[%s2820_s5 + $0xe0] sm:$0xff] }
  0x2c   : > { %2017 = vmatprep.mubr.msk.bf16.mxu0 %vm360_vm2, %v348_v21  ;;  %1127 = vmatpush1.bf16.msra.mxu0 %v1968_v47  ;;  %v1945_v56 = vcombine.high %v722_v53, %v726_v54  ;;  %v1944_v57 = vcombine.low %v722_v53, %v726_v54  ;;  %v2312_v60 = vld [vmem:[%s2817_s2] ss:$0 sm:$0xff] }
  0x2d   : > { %1128 = vmatprep.subr.bf16.mxu0 %v1961_v48 }
  0x30   : > { %1129 = vmatpush1.bf16.msra.mxu0 %v1960_v51 }
  0x31   : > { %1130 = vmatprep.subr.bf16.mxu0 %v1953_v52 }
  0x33   : > { %2018 = vmatmul.mubr.msk.bf16.gmra.mxu0 %vm360_vm2, %v349_v26 }
  0x34   : > { %2021 = vmatprep.mubr.msk.bf16.mxu0 %vm360_vm2, %v350_v27  ;;  %1131 = vmatpush1.bf16.msra.mxu0 %v1952_v55  ;;  %v1963_v27 = vcombine.high %v739_v18, %v743_v19  ;;  %v698_v19 = vld [vmem:[%s2820_s5] sm:$0xff] }
  0x35   : > { %1132 = vmatprep.subr.bf16.mxu0 %v1945_v56  ;;  %v1946_v56 = vcombine.low %v723_v40, %v727_v41 }
  0x38   : > { %1133 = vmatpush1.bf16.msra.mxu0 %v1944_v57 }
  0x3b   : > { %2022 = vmatmul.mubr.msk.bf16.gmra.mxu0 %vm360_vm2, %v351_v30  ;;  %v735_v30 = vld [vmem:[%s2820_s5 + $0x128] sm:$0xff] }
  0x3c   : > { %v1955_v38 = vcombine.high %v731_v29, %v735_v30  ;;  %v1954_v47 = vcombine.low %v731_v29, %v735_v30  ;;  %v760_v29 = vld [vmem:[%s2820_s5 + $0x1f0] sm:$0xff]  ;;  %v757_v30 = vld [vmem:[%s2820_s5 + $0x1d8] sm:$0xff] }
  0xe3   : > { %v2011_v58 = vpop.f32.mrf.mxu0 }
  0xe4   : > { %v435_v0 = vadd.f32 %v2011_v58, %v2312_v60 }
  0xe5   : > { %v426_v59 = vpop.f32.mrf.mxu0 }
  0xe6   : > { %v427_v62 = vadd.f32 %v2312_v60, %v426_v59  ;;  %v491_v9 = vmax.f32 %v435_v0, 0.0 }
  0xe7   : > { %v2012_v61 = vpop.f32.mrf.mxu0 }
  0xe8   : > { %v438_v63 = vadd.f32 %v2012_v61, %v2312_v60  ;;  %v489_v5 = vmax.f32 %v427_v62, 0.0 }
  0xe9   : > { %v429_v1 = vpop.f32.mrf.mxu0 }
  0xea   : > { %v430_v2 = vadd.f32 %v2312_v60, %v429_v1  ;;  %v492_v3 = vmax.f32 %v438_v63, 0.0 }
  0xeb   : > { %v2015_v4 = vpop.f32.mrf.mxu0 }
  0xec   : > { %v490_v6 = vmax.f32 %v430_v2, 0.0  ;;  %v451_v10 = vadd.f32 %v2015_v4, %v2312_v60  ;;  %v506_v14 = vpack.c.bf16 %v492_v3, %v491_v9  ;;  %v714_v4 = vld [vmem:[%s2820_s5 + $0x80] sm:$0xff] }
  0xed   : > { %v442_v11 = vpop.f32.mrf.mxu0 }
  0xee   : > { %v443_v12 = vadd.f32 %v2312_v60, %v442_v11  ;;  %v505_v13 = vpack.c.bf16 %v490_v6, %v489_v5  ;;  %v495_v20 = vmax.f32 %v451_v10, 0.0  ;;  %v718_v5 = vld [vmem:[%s2820_s5 + $0xa0] sm:$0xff] }
  0xef   : > { %v2016_v15 = vpop.f32.mrf.mxu0  ;;  %v1937_v6 = vcombine.high %v714_v4, %v718_v5  ;;  %v1936_v8 = vcombine.low %v714_v4, %v718_v5  ;;  %v706_v11 = vld [vmem:[%s2820_s5 + $0x40] sm:$0xff]  ;;  %v732_v4 = vld [vmem:[%s2820_s5 + $0x110] sm:$0xff] }
  0xf0   : > { %v454_v17 = vadd.f32 %v2016_v15, %v2312_v60  ;;  %2033 = vmatprep.mubr.msk.bf16.mxu1 %vm552_vm3, %v505_v13  ;;  %v493_v22 = vmax.f32 %v443_v12, 0.0  ;;  %v710_v12 = vld [vmem:[%s2820_s5 + $0x60] sm:$0xff]  ;;  %v707_v13 = vld [vmem:[%s2820_s5 + $0x48] sm:$0xff] }
  0xf1   : > { %v445_v21 = vpop.f32.mrf.mxu0  ;;  %2034 = vmatmul.mubr.msk.bf16.vlgmr.msra.gmra.mxu1 %vm552_vm3, %v506_v14  ;;  %1134 = vmatprep.subr.bf16.mxu0 %v1937_v6  ;;  %v1929_v14 = vcombine.high %v706_v11, %v710_v12  ;;  %v711_v15 = vld [vmem:[%s2820_s5 + $0x68] sm:$0xff]  ;;  %v733_v6 = vld [vmem:[%s2820_s5 + $0x118] sm:$0xff] }
  0xf2   : > { %v496_v23 = vmax.f32 %v454_v17, 0.0  ;;  %v446_v24 = vadd.f32 %v2312_v60, %v445_v21  ;;  %1238 = vmatpush1.bf16.msra.mxu1 %v1978_v42  ;;  %1135 = vmatpush1.bf16.msra.mxu0 %v1936_v8  ;;  %v1930_v17 = vcombine.low %v707_v13, %v711_v15  ;;  %v1931_v18 = vcombine.high %v707_v13, %v711_v15  ;;  %v699_v21 = vld [vmem:[%s2820_s5 + $0x8] sm:$0xff]  ;;  %v724_v15 = vld [vmem:[%s2820_s5 + $0xd0] sm:$0xff] }
  0xf3   : > { %v2019_v26 = vpop.f32.mrf.mxu0  ;;  %1239 = vmatprep.subr.bf16.mxu1 %v1971_v16  ;;  %v1928_v16 = vcombine.low %v706_v11, %v710_v12  ;;  %1136 = vmatprep.subr.bf16.mxu0 %v1929_v14 }
  0xf4   : > { %v494_v28 = vmax.f32 %v446_v24, 0.0  ;;  %v508_v31 = vpack.c.bf16 %v496_v23, %v495_v20  ;;  %v467_v32 = vadd.f32 %v2019_v26, %v2312_v60  ;;  %v702_v20 = vld [vmem:[%s2820_s5 + $0x20] sm:$0xff]  ;;  %v703_v23 = vld [vmem:[%s2820_s5 + $0x28] sm:$0xff] }
  0xf5   : > { %v458_v33 = vpop.f32.mrf.mxu0  ;;  %v1920_v24 = vcombine.low %v698_v19, %v702_v20  ;;  %v1923_v26 = vcombine.high %v699_v21, %v703_v23 }
  0xf6   : > { %v507_v34 = vpack.c.bf16 %v494_v28, %v493_v22  ;;  %v459_v35 = vadd.f32 %v2312_v60, %v458_v33  ;;  %1240 = vmatpush1.bf16.msra.mxu1 %v1970_v25  ;;  %v499_v42 = vmax.f32 %v467_v32, 0.0  ;;  %1137 = vmatpush1.bf16.msra.mxu0 %v1928_v16  ;;  %v1921_v22 = vcombine.high %v698_v19, %v702_v20  ;;  %v756_v28 = vld [vmem:[%s2820_s5 + $0x1d0] sm:$0xff]  ;;  %v761_v33 = vld [vmem:[%s2820_s5 + $0x1f8] sm:$0xff] }
  0xf7   : > { %v2020_v37 = vpop.f32.mrf.mxu0  ;;  %1241 = vmatprep.subr.bf16.mxu1 %v1963_v27  ;;  %v1922_v25 = vcombine.low %v699_v21, %v703_v23  ;;  %v2139_v27 = vmov 0   ;;  %v1981_v32 = vcombine.high %v756_v28, %v760_v29  ;;  %v729_v19 = vld [vmem:[%s2820_s5 + $0xf8] sm:$0xff] }
  0xf8   : > { %2037 = vmatprep.mubr.msk.bf16.mxu1 %vm552_vm3, %v507_v34  ;;  %v470_v39 = vadd.f32 %v2020_v37, %v2312_v60  ;;  %v497_v44 = vmax.f32 %v459_v35, 0.0  ;;  %1138 = vmatprep.subr.bf16.mxu0 %v1921_v22  ;;  %v1982_v34 = vcombine.low %v757_v30, %v761_v33  ;;  %v1983_v35 = vcombine.high %v757_v30, %v761_v33  ;;  %v717_v30 = vld [vmem:[%s2820_s5 + $0x98] sm:$0xff] }
  0xf9   : > { %2038 = vmatmul.mubr.msk.bf16.gmra.mxu1 %vm552_vm3, %v508_v31  ;;  %v461_v43 = vpop.f32.mrf.mxu0  ;;  %1156 = vmatprep.mubr.bf16.mxu0 %v2139_v27  ;;  %v1980_v31 = vcombine.low %v756_v28, %v760_v29  ;;  %v720_v29 = vld [vmem:[%s2820_s5 + $0xb0] sm:$0xff] }
  0xfa   : > { %v500_v45 = vmax.f32 %v470_v39, 0.0  ;;  %v462_v46 = vadd.f32 %v2312_v60, %v461_v43  ;;  %1242 = vmatpush1.bf16.msra.mxu1 %v1962_v36  ;;  %1139 = vmatpush1.bf16.msra.mxu0 %v1920_v24 }
  0xfb   : > { %v2023_v48 = vpop.f32.mrf.mxu0  ;;  %1243 = vmatprep.subr.bf16.mxu1 %v1955_v38  ;;  %1350 = vmatprep.subr.bf16.mxu0 %v1981_v32  ;;  %v2415_v38 = vld [vmem:[%s2819_s4] ss:$0 sm:$0xff] }
  0xfc   : > { %v498_v50 = vmax.f32 %v462_v46, 0.0  ;;  %v510_v51 = vpack.c.bf16 %v500_v45, %v499_v42  ;;  %v483_v52 = vadd.f32 %v2023_v48, %v2312_v60  ;;  %v749_v48 = vld [vmem:[%s2820_s5 + $0x198] sm:$0xff] }
  0xfd   : > { %v474_v53 = vpop.f32.mrf.mxu0 }
  0xfe   : > { %v509_v54 = vpack.c.bf16 %v498_v50, %v497_v44  ;;  %v475_v55 = vadd.f32 %v2312_v60, %v474_v53  ;;  %1244 = vmatpush1.bf16.msra.mxu1 %v1954_v47  ;;  %v503_v59 = vmax.f32 %v483_v52, 0.0  ;;  %v748_v44 = vld [vmem:[%s2820_s5 + $0x190] sm:$0xff] }
  0xff   : > { %v2024_v57 = vpop.f32.mrf.mxu0  ;;  %1245 = vmatprep.subr.bf16.mxu1 %v1947_v49  ;;  %v752_v47 = vld [vmem:[%s2820_s5 + $0x1b0] sm:$0xff]  ;;  %v753_v49 = vld [vmem:[%s2820_s5 + $0x1b8] sm:$0xff] }
 0x100   : > { %2041 = vmatprep.mubr.msk.bf16.mxu1 %vm552_vm3, %v509_v54  ;;  %v486_v58 = vadd.f32 %v2024_v57, %v2312_v60  ;;  %v501_v62 = vmax.f32 %v475_v55, 0.0  ;;  %v740_v53 = vld [vmem:[%s2820_s5 + $0x150] sm:$0xff]  ;;  %v1973_v55 = vcombine.high %v748_v44, %v752_v47 }
 0x101   : > { %2042 = vmatmul.mubr.msk.bf16.gmra.mxu1 %vm552_vm3, %v510_v51  ;;  %v477_v61 = vpop.f32.mrf.mxu0  ;;  %v744_v57 = vld [vmem:[%s2820_s5 + $0x170] sm:$0xff] }
 0x102   : > { %v504_v63 = vmax.f32 %v486_v58, 0.0  ;;  %v478_v0 = vadd.f32 %v2312_v60, %v477_v61  ;;  %1246 = vmatpush1.bf16.msra.mxu1 %v1946_v56  ;;  %v715_v60 = vld [vmem:[%s2820_s5 + $0x88] sm:$0xff]  ;;  %v1975_v56 = vcombine.high %v749_v48, %v753_v49  ;;  %v741_v58 = vld [vmem:[%s2820_s5 + $0x158] sm:$0xff]  ;;  %v1964_v8 = vcombine.low %v740_v53, %v744_v57 }
 0x103   : > { %v1938_v9 = vcombine.low %v715_v60, %v719_v7  ;;  %v1939_v10 = vcombine.high %v715_v60, %v719_v7  ;;  %v736_v60 = vld [vmem:[%s2820_s5 + $0x130] sm:$0xff]  ;;  %v737_v7 = vld [vmem:[%s2820_s5 + $0x138] sm:$0xff] }
 0x104   : > { %v502_v1 = vmax.f32 %v478_v0, 0.0  ;;  %v512_v2 = vpack.c.bf16 %v504_v63, %v503_v59  ;;  %v745_v59 = vld [vmem:[%s2820_s5 + $0x178] sm:$0xff]  ;;  %v1974_v63 = vcombine.low %v749_v48, %v753_v49  ;;  %v1957_v13 = vcombine.high %v732_v4, %v736_v60 }
 0x105   : > { %1247 = vmatprep.subr.bf16.mxu1 %v1939_v10  ;;  %v1966_v11 = vcombine.low %v741_v58, %v745_v59  ;;  %v1959_v14 = vcombine.high %v733_v6, %v737_v7  ;;  %v1956_v21 = vcombine.low %v732_v4, %v736_v60  ;;  %v1958_v22 = vcombine.low %v733_v6, %v737_v7 }
 0x106   : > { %v511_v3 = vpack.c.bf16 %v502_v1, %v501_v62  ;;  %1248 = vmatpush1.bf16.msra.mxu1 %v1938_v9  ;;  %v1972_v62 = vcombine.low %v748_v44, %v752_v47  ;;  %v1965_v1 = vcombine.high %v740_v53, %v744_v57  ;;  %v709_v44 = vld [vmem:[%s2820_s5 + $0x58] sm:$0xff] }
 0x107   : > { %1249 = vmatprep.subr.bf16.mxu1 %v1931_v18  ;;  %v725_v18 = vld [vmem:[%s2820_s5 + $0xd8] sm:$0xff] }
 0x108   : > { %2045 = vmatprep.mubr.msk.bf16.mxu1 %vm552_vm3, %v511_v3 }
 0x109   : > { %2046 = vmatmul.mubr.msk.bf16.gmra.mxu1 %vm552_vm3, %v512_v2  ;;  %v1967_v2 = vcombine.high %v741_v58, %v745_v59 }
 0x10a   : > { %1250 = vmatpush1.bf16.msra.mxu1 %v1930_v17  ;;  %1269 = vmatprep.mubr.bf16.mxu1 %v2139_v27  ;;  %v728_v17 = vld [vmem:[%s2820_s5 + $0xf0] sm:$0xff] }
 0x10b   : > { %1251 = vmatprep.subr.bf16.mxu1 %v1923_v26  ;;  %v1949_v24 = vcombine.high %v724_v15, %v728_v17  ;;  %v716_v26 = vld [vmem:[%s2820_s5 + $0x90] sm:$0xff]  ;;  %v1948_v32 = vcombine.low %v724_v15, %v728_v17 }
 0x10e   : > { %1252 = vmatpush1.bf16.msra.mxu1 %v1922_v25  ;;  %v1951_v25 = vcombine.high %v725_v18, %v729_v19 }
 0x10f   : > { %1463 = vmatprep.subr.bf16.mxu1 %v1983_v35  ;;  %v1950_v35 = vcombine.low %v725_v18, %v729_v19 }
 0x1b1   : > { %v2035_v36 = vpop.f32.mrf.mxu1 }
 0x1b2   : > { %v620_v61 = vadd.f32 %v2035_v36, %v2415_v38 }
 0x1b3   : > { %v611_v37 = vpop.f32.mrf.mxu1 }
 0x1b4   : > { %v612_v40 = vadd.f32 %v2415_v38, %v611_v37  ;;  %v676_v5 = vmax.f32 %v620_v61, 0.0  ;;  %v1941_v37 = vcombine.high %v716_v26, %v720_v29 }
 0x1b5   : > { %v2036_v39 = vpop.f32.mrf.mxu1 }
 0x1b6   : > { %v674_v45 = vmax.f32 %v612_v40, 0.0  ;;  %v623_v51 = vadd.f32 %v2036_v39, %v2415_v38  ;;  %v708_v40 = vld [vmem:[%s2820_s5 + $0x50] sm:$0xff] }
 0x1b7   : > { %v614_v41 = vpop.f32.mrf.mxu1 }
 0x1b8   : > { %v615_v42 = vadd.f32 %v2415_v38, %v614_v41  ;;  %v677_v0 = vmax.f32 %v623_v51, 0.0  ;;  %v700_v51 = vld [vmem:[%s2820_s5 + $0x10] sm:$0xff] }
 0x1b9   : > { %v2419_v43 = vpop.f32.mrf.mxu1 }
 0x1ba   : > { %v675_v46 = vmax.f32 %v615_v42, 0.0  ;;  %v2465_v9 = vpack.c.bf16 %v677_v0, %v676_v5  ;;  %v636_v41 = vadd.f32 %v2419_v43, %v2415_v38  ;;  %v712_v42 = vld [vmem:[%s2820_s5 + $0x70] sm:$0xff] }
 0x1bb   : > { %v627_v50 = vpop.f32.mrf.mxu1  ;;  %v1933_v49 = vcombine.high %v708_v40, %v712_v42  ;;  %v1932_v57 = vcombine.low %v708_v40, %v712_v42 }
 0x1bc   : > { %v2434_v52 = vpack.c.bf16 %v675_v46, %v674_v45  ;;  %v628_v16 = vadd.f32 %v2415_v38, %v627_v50  ;;  %v713_v45 = vld [vmem:[%s2820_s5 + $0x78] sm:$0xff]  ;;  %v1940_v46 = vcombine.low %v716_v26, %v720_v29  ;;  %v680_v53 = vmax.f32 %v636_v41, 0.0  ;;  %v2584_v26 = vld [vmem:[%s2821_s6] sm:$0xff] }
 0x1bd   : > { %v2040_v54 = vpop.f32.mrf.mxu1  ;;  %v1935_v50 = vcombine.high %v709_v44, %v713_v45  ;;  %v1934_v58 = vcombine.low %v709_v44, %v713_v45 }
 0x1be   : > { %1157 = vmatmul.mubr.bf16.vlgmr.msra.gmra.mxu0 %v2434_v52  ;;  %1270 = vmatmul.mubr.bf16.vlgmr.msra.gmra.mxu1 %v2434_v52  ;;  %v678_v28 = vmax.f32 %v628_v16, 0.0  ;;  %v639_v33 = vadd.f32 %v2040_v54, %v2415_v38  ;;  %v704_v54 = vld [vmem:[%s2820_s5 + $0x30] sm:$0xff] }
 0x1bf   : > { %1351 = vmatpush1.bf16.msra.mxu0 %v1980_v31  ;;  %1464 = vmatpush1.bf16.msra.mxu1 %v1982_v34  ;;  %v630_v3 = vpop.f32.mrf.mxu1  ;;  %v721_v31 = vld [vmem:[%s2820_s5 + $0xb8] sm:$0xff]  ;;  %v1925_v0 = vcombine.high %v700_v51, %v704_v54  ;;  %v1924_v4 = vcombine.low %v700_v51, %v704_v54 }
 0x1c0   : > { %1166 = vmatprep.mubr.bf16.mxu0 %v2139_v27  ;;  %1279 = vmatprep.mubr.bf16.mxu1 %v2139_v27  ;;  %v631_v10 = vadd.f32 %v2415_v38, %v630_v3  ;;  %v1943_v39 = vcombine.high %v717_v30, %v721_v31  ;;  %v681_v43 = vmax.f32 %v639_v33, 0.0  ;;  %v1942_v47 = vcombine.low %v717_v30, %v721_v31 }
 0x1c1   : > { %1352 = vmatprep.subr.bf16.mxu0 %v1973_v55  ;;  %1465 = vmatprep.subr.bf16.mxu1 %v1975_v56  ;;  %v2468_v12 = vpop.f32.mrf.mxu1  ;;  %v701_v55 = vld [vmem:[%s2820_s5 + $0x18] sm:$0xff] }
 0x1c2   : > { %v679_v20 = vmax.f32 %v631_v10, 0.0  ;;  %v705_v56 = vld [vmem:[%s2820_s5 + $0x38] sm:$0xff]  ;;  %v2532_v59 = vpack.c.bf16 %v681_v43, %v680_v53  ;;  %v652_v6 = vadd.f32 %v2468_v12, %v2415_v38 }
 0x1c3   : > { %1353 = vmatpush1.bf16.msra.mxu0 %v1972_v62  ;;  %1466 = vmatpush1.bf16.msra.mxu1 %v1974_v63  ;;  %v643_v23 = vpop.f32.mrf.mxu1  ;;  %v1926_v5 = vcombine.low %v701_v55, %v705_v56 }
 0x1c4   : > { %1354 = vmatprep.subr.bf16.mxu0 %v1965_v1  ;;  %1467 = vmatprep.subr.bf16.mxu1 %v1967_v2  ;;  %v2500_v34 = vpack.c.bf16 %v679_v20, %v678_v28  ;;  %v644_v61 = vadd.f32 %v2415_v38, %v643_v23  ;;  %v1927_v1 = vcombine.high %v701_v55, %v705_v56 }
 0x1c5   : > { %v2044_v36 = vpop.f32.mrf.mxu1 }
 0x1c6   : > { %1167 = vmatmul.mubr.bf16.gmra.mxu0 %v2465_v9  ;;  %1280 = vmatmul.mubr.bf16.gmra.mxu1 %v2465_v9  ;;  %v682_v2 = vmax.f32 %v644_v61, 0.0  ;;  %v655_v7 = vadd.f32 %v2044_v36, %v2415_v38 }
 0x1c7   : > { %1176 = vmatprep.mubr.bf16.mxu0 %v2139_v27  ;;  %1289 = vmatprep.mubr.bf16.mxu1 %v2139_v27  ;;  %v646_v48 = vpop.f32.mrf.mxu1 }
 0x1c8   : > { %1355 = vmatpush1.bf16.msra.mxu0 %v1964_v8  ;;  %1468 = vmatpush1.bf16.msra.mxu1 %v1966_v11  ;;  %v647_v62 = vadd.f32 %v2415_v38, %v646_v48  ;;  %v684_v11 = vmax.f32 %v652_v6, 0.0 }
 0x1c9   : > { %1356 = vmatprep.subr.bf16.mxu0 %v1957_v13  ;;  %1469 = vmatprep.subr.bf16.mxu1 %v1959_v14  ;;  %v2047_v63 = vpop.f32.mrf.mxu1  ;;  %v685_v13 = vmax.f32 %v655_v7, 0.0 }
 0x1ca   : > { %v683_v3 = vmax.f32 %v647_v62, 0.0  ;;  %v668_v19 = vadd.f32 %v2047_v63, %v2415_v38 }
 0x1cb   : > { %v659_v60 = vpop.f32.mrf.mxu1  ;;  %v695_v15 = vpack.c.bf16 %v685_v13, %v684_v11 }
 0x1cc   : > { %1357 = vmatpush1.bf16.msra.mxu0 %v1956_v21  ;;  %1470 = vmatpush1.bf16.msra.mxu1 %v1958_v22  ;;  %v694_v8 = vpack.c.bf16 %v683_v3, %v682_v2  ;;  %v660_v16 = vadd.f32 %v2415_v38, %v659_v60  ;;  %v688_v22 = vmax.f32 %v668_v19, 0.0 }
 0x1cd   : > { %1358 = vmatprep.subr.bf16.mxu0 %v1949_v24  ;;  %1471 = vmatprep.subr.bf16.mxu1 %v1951_v25  ;;  %v2048_v10 = vpop.f32.mrf.mxu1 }
 0x1ce   : > { %1177 = vmatmul.mubr.bf16.gmra.mxu0 %v2500_v34  ;;  %1290 = vmatmul.mubr.bf16.gmra.mxu1 %v2500_v34  ;;  %v686_v17 = vmax.f32 %v660_v16, 0.0  ;;  %v671_v20 = vadd.f32 %v2048_v10, %v2415_v38 }
 0x1cf   : > { %1186 = vmatprep.mubr.bf16.mxu0 %v2139_v27  ;;  %1299 = vmatprep.mubr.bf16.mxu1 %v2139_v27  ;;  %v662_v14 = vpop.f32.mrf.mxu1 }
 0x1d0   : > { %1359 = vmatpush1.bf16.msra.mxu0 %v1948_v32  ;;  %1472 = vmatpush1.bf16.msra.mxu1 %v1950_v35  ;;  %v663_v12 = vadd.f32 %v2415_v38, %v662_v14  ;;  %v689_v23 = vmax.f32 %v671_v20, 0.0  ;;  %v764_v38 = vlaneseq }
 0x1d1   : > { %1360 = vmatprep.subr.bf16.mxu0 %v1941_v37  ;;  %1473 = vmatprep.subr.bf16.mxu1 %v1943_v39 }
 0x1d2   : > { %v687_v18 = vmax.f32 %v663_v12, 0.0  ;;  %v697_v24 = vpack.c.bf16 %v689_v23, %v688_v22 }
 0x1d4   : > { %1361 = vmatpush1.bf16.msra.mxu0 %v1940_v46  ;;  %1474 = vmatpush1.bf16.msra.mxu1 %v1942_v47  ;;  %v696_v21 = vpack.c.bf16 %v687_v18, %v686_v17 }
 0x1d5   : > { %1362 = vmatprep.subr.bf16.mxu0 %v1933_v49  ;;  %1475 = vmatprep.subr.bf16.mxu1 %v1935_v50 }
 0x1d6   : > { %1187 = vmatmul.mubr.bf16.gmra.mxu0 %v2532_v59  ;;  %1300 = vmatmul.mubr.bf16.gmra.mxu1 %v2532_v59 }
 0x1d7   : > { %1196 = vmatprep.mubr.bf16.mxu0 %v2139_v27  ;;  %1309 = vmatprep.mubr.bf16.mxu1 %v2139_v27 }
 0x1d8   : > { %1363 = vmatpush1.bf16.msra.mxu0 %v1932_v57  ;;  %1476 = vmatpush1.bf16.msra.mxu1 %v1934_v58 }
 0x1d9   : > { %1364 = vmatprep.subr.bf16.mxu0 %v1925_v0  ;;  %1477 = vmatprep.subr.bf16.mxu1 %v1927_v1 }
 0x1dc   : > { %1365 = vmatpush1.bf16.msra.mxu0 %v1924_v4  ;;  %1478 = vmatpush1.bf16.msra.mxu1 %v1926_v5 }
 0x1de   : > { %1197 = vmatmul.mubr.bf16.gmra.mxu0 %v694_v8  ;;  %1310 = vmatmul.mubr.bf16.gmra.mxu1 %v694_v8 }
 0x1df   : > { %1206 = vmatprep.mubr.bf16.mxu0 %v2139_v27  ;;  %1319 = vmatprep.mubr.bf16.mxu1 %v2139_v27 }
 0x1e6   : > { %1207 = vmatmul.mubr.bf16.gmra.mxu0 %v695_v15  ;;  %1320 = vmatmul.mubr.bf16.gmra.mxu1 %v695_v15 }
 0x1e7   : > { %1216 = vmatprep.mubr.bf16.mxu0 %v2139_v27  ;;  %1329 = vmatprep.mubr.bf16.mxu1 %v2139_v27 }
 0x1ee   : > { %1217 = vmatmul.mubr.bf16.gmra.mxu0 %v696_v21  ;;  %1330 = vmatmul.mubr.bf16.gmra.mxu1 %v696_v21 }
 0x1ef   : > { %1226 = vmatprep.mubr.bf16.mxu0 %v2139_v27  ;;  %1339 = vmatprep.mubr.bf16.mxu1 %v2139_v27 }
 0x1f6   : > { %1227 = vmatmul.mubr.bf16.gmra.mxu0 %v697_v24  ;;  %1340 = vmatmul.mubr.bf16.gmra.mxu1 %v697_v24 }
 0x1f7   : > { %1382 = vmatprep.mubr.bf16.mxu0 %v2139_v27  ;;  %1495 = vmatprep.mubr.bf16.mxu1 %v2139_v27 }
 0x1fe   : > { %1383 = vmatmul.mubr.bf16.vlgmr.msra.gmra.mxu0 %v2434_v52  ;;  %1496 = vmatmul.mubr.bf16.vlgmr.msra.gmra.mxu1 %v2434_v52  ;;  %v2577_v52 = vshrl.u32 %v764_v38, 7 }
 0x1ff   : > { %1392 = vmatprep.mubr.bf16.mxu0 %v2139_v27  ;;  %1505 = vmatprep.mubr.bf16.mxu1 %v2139_v27 }
 0x200   : > { %v774_v25 = vsub.s32 2, %v2577_v52  ;;  %v770_v28 = vsub.s32 1, %v2577_v52  ;;  %v778_v29 = vsub.s32 3, %v2577_v52 }
 0x202   : > { %v2592_v32 = vrot.slane %v2584_v26, %v774_v25  ;;  %v2595_v33 = vrot.slane %v2584_v26, %v770_v28  ;;  %v2598_v35 = vrot.slane %v2584_v26, %v778_v29 }
 0x206   : > { %1393 = vmatmul.mubr.bf16.gmra.mxu0 %v2465_v9  ;;  %1506 = vmatmul.mubr.bf16.gmra.mxu1 %v2465_v9  ;;  %v766_v9 = vsub.s32 0, %v2577_v52 }
 0x207   : > { %1402 = vmatprep.mubr.bf16.mxu0 %v2139_v27  ;;  %1515 = vmatprep.mubr.bf16.mxu1 %v2139_v27 }
 0x208   : > { %v2589_v31 = vrot.slane %v2584_v26, %v766_v9 }
 0x20e   : > { %1403 = vmatmul.mubr.bf16.gmra.mxu0 %v2500_v34  ;;  %1516 = vmatmul.mubr.bf16.gmra.mxu1 %v2500_v34 }
 0x20f   : > { %1412 = vmatprep.mubr.bf16.mxu0 %v2139_v27  ;;  %1525 = vmatprep.mubr.bf16.mxu1 %v2139_v27 }
 0x216   : > { %1413 = vmatmul.mubr.bf16.gmra.mxu0 %v2532_v59  ;;  %1526 = vmatmul.mubr.bf16.gmra.mxu1 %v2532_v59 }
 0x217   : > { %1422 = vmatprep.mubr.bf16.mxu0 %v2139_v27  ;;  %1535 = vmatprep.mubr.bf16.mxu1 %v2139_v27 }
 0x21e   : > { %1423 = vmatmul.mubr.bf16.gmra.mxu0 %v694_v8  ;;  %1536 = vmatmul.mubr.bf16.gmra.mxu1 %v694_v8 }
 0x21f   : > { %1432 = vmatprep.mubr.bf16.mxu0 %v2139_v27  ;;  %1545 = vmatprep.mubr.bf16.mxu1 %v2139_v27 }
 0x226   : > { %1433 = vmatmul.mubr.bf16.gmra.mxu0 %v695_v15  ;;  %1546 = vmatmul.mubr.bf16.gmra.mxu1 %v695_v15 }
 0x227   : > { %1442 = vmatprep.mubr.bf16.mxu0 %v2139_v27  ;;  %1555 = vmatprep.mubr.bf16.mxu1 %v2139_v27 }
 0x22e   : > { %1443 = vmatmul.mubr.bf16.gmra.mxu0 %v696_v21  ;;  %1556 = vmatmul.mubr.bf16.gmra.mxu1 %v696_v21 }
 0x22f   : > { %1452 = vmatprep.mubr.bf16.mxu0 %v2139_v27  ;;  %1565 = vmatprep.mubr.bf16.mxu1 %v2139_v27 }
 0x236   : > { %1453 = vmatmul.mubr.bf16.gmra.mxu0 %v697_v24  ;;  %1566 = vmatmul.mubr.bf16.gmra.mxu1 %v697_v24 }
 0x27e   : > { %v1158_v30 = vpop.f32.mrf.mxu0  ;;  %v1271_v27 = vpop.f32.mrf.mxu1 }
 0x27f   : > { %v1159_v40 = vadd.f32 %v1158_v30, %v2589_v31  ;;  %v1272_v41 = vadd.f32 %v1271_v27, %v2592_v32 }
 0x280   : > { %v1160_v34 = vpop.f32.mrf.mxu0  ;;  %v1273_v36 = vpop.f32.mrf.mxu1 }
 0x281   : > { %v1161_v45 = vadd.f32 %v1160_v34, %v2595_v33  ;;  %v1274_v43 = vadd.f32 %v1273_v36, %v2598_v35 }
 0x282   : > { %v1162_v37 = vpop.f32.mrf.mxu0  ;;  %v1275_v39 = vpop.f32.mrf.mxu1 }
 0x283   : > { %v1163_v42 = vadd.f32 %v1162_v37, %v2589_v31  ;;  %v1276_v44 = vadd.f32 %v1275_v39, %v2592_v32 }
 0x284   : > { %v1164_v46 = vpop.f32.mrf.mxu0  ;;  %v1277_v47 = vpop.f32.mrf.mxu1 }
 0x285   : > { %v1577_v48 = vmax.f32 %v1159_v40, %v1163_v42  ;;  %v1619_v49 = vmax.f32 %v1272_v41, %v1276_v44  ;;  %v1165_v50 = vadd.f32 %v1164_v46, %v2595_v33  ;;  %v1278_v51 = vadd.f32 %v1277_v47, %v2598_v35 }
 0x286   : > { %v1168_v53 = vpop.f32.mrf.mxu0  ;;  %v1281_v54 = vpop.f32.mrf.mxu1 }
 0x287   : > { %v1598_v55 = vmax.f32 %v1161_v45, %v1165_v50  ;;  %v1640_v56 = vmax.f32 %v1274_v43, %v1278_v51  ;;  %v1169_v57 = vadd.f32 %v1168_v53, %v2589_v31  ;;  %v1282_v58 = vadd.f32 %v1281_v54, %v2592_v32 }
 0x288   : > { %v1170_v59 = vpop.f32.mrf.mxu0  ;;  %v1283_v61 = vpop.f32.mrf.mxu1 }
 0x289   : > { %v1578_v62 = vmax.f32 %v1577_v48, %v1169_v57  ;;  %v1620_v63 = vmax.f32 %v1619_v49, %v1282_v58  ;;  %v1171_v0 = vadd.f32 %v1170_v59, %v2595_v33  ;;  %v1284_v1 = vadd.f32 %v1283_v61, %v2598_v35 }
 0x28a   : > { %v1172_v2 = vpop.f32.mrf.mxu0  ;;  %v1285_v3 = vpop.f32.mrf.mxu1 }
 0x28b   : > { %v1599_v4 = vmax.f32 %v1598_v55, %v1171_v0  ;;  %v1641_v5 = vmax.f32 %v1640_v56, %v1284_v1  ;;  %v1173_v60 = vadd.f32 %v1172_v2, %v2589_v31  ;;  %v1286_v6 = vadd.f32 %v1285_v3, %v2592_v32 }
 0x28c   : > { %v1174_v7 = vpop.f32.mrf.mxu0  ;;  %v1287_v8 = vpop.f32.mrf.mxu1 }
 0x28d   : > { %v1579_v10 = vmax.f32 %v1578_v62, %v1173_v60  ;;  %v1621_v11 = vmax.f32 %v1620_v63, %v1286_v6  ;;  %v1175_v13 = vadd.f32 %v1174_v7, %v2595_v33  ;;  %v1288_v14 = vadd.f32 %v1287_v8, %v2598_v35 }
 0x28e   : > { %v1178_v15 = vpop.f32.mrf.mxu0  ;;  %v1291_v16 = vpop.f32.mrf.mxu1 }
 0x28f   : > { %v1600_v12 = vmax.f32 %v1599_v4, %v1175_v13  ;;  %v1642_v17 = vmax.f32 %v1641_v5, %v1288_v14  ;;  %v1179_v18 = vadd.f32 %v1178_v15, %v2589_v31  ;;  %v1292_v19 = vadd.f32 %v1291_v16, %v2592_v32 }
 0x290   : > { %v1180_v20 = vpop.f32.mrf.mxu0  ;;  %v1293_v21 = vpop.f32.mrf.mxu1 }
 0x291   : > { %v1580_v22 = vmax.f32 %v1579_v10, %v1179_v18  ;;  %v1622_v23 = vmax.f32 %v1621_v11, %v1292_v19  ;;  %v1181_v24 = vadd.f32 %v1180_v20, %v2595_v33  ;;  %v1294_v38 = vadd.f32 %v1293_v21, %v2598_v35 }
 0x292   : > { %v1182_v9 = vpop.f32.mrf.mxu0  ;;  %v1295_v25 = vpop.f32.mrf.mxu1 }
 0x293   : > { %v1601_v28 = vmax.f32 %v1600_v12, %v1181_v24  ;;  %v1643_v29 = vmax.f32 %v1642_v17, %v1294_v38  ;;  %v1183_v30 = vadd.f32 %v1182_v9, %v2589_v31  ;;  %v1296_v27 = vadd.f32 %v1295_v25, %v2592_v32 }
 0x294   : > { %v1184_v34 = vpop.f32.mrf.mxu0  ;;  %v1297_v36 = vpop.f32.mrf.mxu1 }
 0x295   : > { %v1581_v37 = vmax.f32 %v1580_v22, %v1183_v30  ;;  %v1623_v39 = vmax.f32 %v1622_v23, %v1296_v27  ;;  %v1185_v40 = vadd.f32 %v1184_v34, %v2595_v33  ;;  %v1298_v41 = vadd.f32 %v1297_v36, %v2598_v35 }
 0x296   : > { %v1188_v42 = vpop.f32.mrf.mxu0  ;;  %v1301_v44 = vpop.f32.mrf.mxu1 }
 0x297   : > { %v1602_v45 = vmax.f32 %v1601_v28, %v1185_v40  ;;  %v1644_v43 = vmax.f32 %v1643_v29, %v1298_v41  ;;  %v1189_v46 = vadd.f32 %v1188_v42, %v2589_v31  ;;  %v1302_v47 = vadd.f32 %v1301_v44, %v2592_v32 }
 0x298   : > { %v1190_v48 = vpop.f32.mrf.mxu0  ;;  %v1303_v49 = vpop.f32.mrf.mxu1 }
 0x299   : > { %v1582_v50 = vmax.f32 %v1581_v37, %v1189_v46  ;;  %v1624_v51 = vmax.f32 %v1623_v39, %v1302_v47  ;;  %v1191_v53 = vadd.f32 %v1190_v48, %v2595_v33  ;;  %v1304_v54 = vadd.f32 %v1303_v49, %v2598_v35 }
 0x29a   : > { %v1192_v55 = vpop.f32.mrf.mxu0  ;;  %v1305_v56 = vpop.f32.mrf.mxu1 }
 0x29b   : > { %v1603_v57 = vmax.f32 %v1602_v45, %v1191_v53  ;;  %v1645_v58 = vmax.f32 %v1644_v43, %v1304_v54  ;;  %v1193_v59 = vadd.f32 %v1192_v55, %v2589_v31  ;;  %v1306_v61 = vadd.f32 %v1305_v56, %v2592_v32 }
 0x29c   : > { %v1194_v62 = vpop.f32.mrf.mxu0  ;;  %v1307_v63 = vpop.f32.mrf.mxu1 }
 0x29d   : > { %v1583_v0 = vmax.f32 %v1582_v50, %v1193_v59  ;;  %v1625_v1 = vmax.f32 %v1624_v51, %v1306_v61  ;;  %v1195_v2 = vadd.f32 %v1194_v62, %v2595_v33  ;;  %v1308_v3 = vadd.f32 %v1307_v63, %v2598_v35 }
 0x29e   : > { %v1198_v4 = vpop.f32.mrf.mxu0  ;;  %v1311_v5 = vpop.f32.mrf.mxu1 }
 0x29f   : > { %v1604_v60 = vmax.f32 %v1603_v57, %v1195_v2  ;;  %v1646_v6 = vmax.f32 %v1645_v58, %v1308_v3  ;;  %v1199_v7 = vadd.f32 %v1198_v4, %v2589_v31  ;;  %v1312_v8 = vadd.f32 %v1311_v5, %v2592_v32 }
 0x2a0   : > { %v1200_v10 = vpop.f32.mrf.mxu0  ;;  %v1313_v11 = vpop.f32.mrf.mxu1 }
 0x2a1   : > { %v1584_v13 = vmax.f32 %v1583_v0, %v1199_v7  ;;  %v1626_v14 = vmax.f32 %v1625_v1, %v1312_v8  ;;  %v1201_v15 = vadd.f32 %v1200_v10, %v2595_v33  ;;  %v1314_v16 = vadd.f32 %v1313_v11, %v2598_v35 }
 0x2a2   : > { %v1202_v12 = vpop.f32.mrf.mxu0  ;;  %v1315_v17 = vpop.f32.mrf.mxu1 }
 0x2a3   : > { %v1605_v18 = vmax.f32 %v1604_v60, %v1201_v15  ;;  %v1647_v19 = vmax.f32 %v1646_v6, %v1314_v16  ;;  %v1203_v20 = vadd.f32 %v1202_v12, %v2589_v31  ;;  %v1316_v21 = vadd.f32 %v1315_v17, %v2592_v32 }
 0x2a4   : > { %v1204_v22 = vpop.f32.mrf.mxu0  ;;  %v1317_v23 = vpop.f32.mrf.mxu1 }
 0x2a5   : > { %v1585_v24 = vmax.f32 %v1584_v13, %v1203_v20  ;;  %v1627_v38 = vmax.f32 %v1626_v14, %v1316_v21  ;;  %v1205_v9 = vadd.f32 %v1204_v22, %v2595_v33  ;;  %v1318_v25 = vadd.f32 %v1317_v23, %v2598_v35 }
 0x2a6   : > { %v1208_v28 = vpop.f32.mrf.mxu0  ;;  %v1321_v29 = vpop.f32.mrf.mxu1 }
 0x2a7   : > { %v1606_v30 = vmax.f32 %v1605_v18, %v1205_v9  ;;  %v1648_v27 = vmax.f32 %v1647_v19, %v1318_v25  ;;  %v1209_v34 = vadd.f32 %v1208_v28, %v2589_v31  ;;  %v1322_v36 = vadd.f32 %v1321_v29, %v2592_v32 }
 0x2a8   : > { %v1210_v37 = vpop.f32.mrf.mxu0  ;;  %v1323_v39 = vpop.f32.mrf.mxu1 }
 0x2a9   : > { %v1586_v40 = vmax.f32 %v1585_v24, %v1209_v34  ;;  %v1628_v41 = vmax.f32 %v1627_v38, %v1322_v36  ;;  %v1211_v42 = vadd.f32 %v1210_v37, %v2595_v33  ;;  %v1324_v44 = vadd.f32 %v1323_v39, %v2598_v35 }
 0x2aa   : > { %v1212_v45 = vpop.f32.mrf.mxu0  ;;  %v1325_v43 = vpop.f32.mrf.mxu1 }
 0x2ab   : > { %v1607_v46 = vmax.f32 %v1606_v30, %v1211_v42  ;;  %v1649_v47 = vmax.f32 %v1648_v27, %v1324_v44  ;;  %v1213_v48 = vadd.f32 %v1212_v45, %v2589_v31  ;;  %v1326_v49 = vadd.f32 %v1325_v43, %v2592_v32 }
 0x2ac   : > { %v1214_v50 = vpop.f32.mrf.mxu0  ;;  %v1327_v51 = vpop.f32.mrf.mxu1 }
 0x2ad   : > { %v1587_v53 = vmax.f32 %v1586_v40, %v1213_v48  ;;  %v1629_v54 = vmax.f32 %v1628_v41, %v1326_v49  ;;  %v1215_v55 = vadd.f32 %v1214_v50, %v2595_v33  ;;  %v1328_v56 = vadd.f32 %v1327_v51, %v2598_v35 }
 0x2ae   : > { %v1218_v57 = vpop.f32.mrf.mxu0  ;;  %v1331_v58 = vpop.f32.mrf.mxu1 }
 0x2af   : > { %v1608_v59 = vmax.f32 %v1607_v46, %v1215_v55  ;;  %v1650_v61 = vmax.f32 %v1649_v47, %v1328_v56  ;;  %v1219_v62 = vadd.f32 %v1218_v57, %v2589_v31  ;;  %v1332_v63 = vadd.f32 %v1331_v58, %v2592_v32 }
 0x2b0   : > { %v1220_v0 = vpop.f32.mrf.mxu0  ;;  %v1333_v1 = vpop.f32.mrf.mxu1  ;;  %v2140_v57 = vmov 1966171168  }
 0x2b1   : > { %v1588_v2 = vmax.f32 %v1587_v53, %v1219_v62  ;;  %v1630_v3 = vmax.f32 %v1629_v54, %v1332_v63  ;;  %v1221_v4 = vadd.f32 %v1220_v0, %v2595_v33  ;;  %v1334_v5 = vadd.f32 %v1333_v1, %v2598_v35 }
 0x2b2   : > { %v1222_v60 = vpop.f32.mrf.mxu0  ;;  %v1335_v6 = vpop.f32.mrf.mxu1 }
 0x2b3   : > { %v1609_v7 = vmax.f32 %v1608_v59, %v1221_v4  ;;  %v1651_v8 = vmax.f32 %v1650_v61, %v1334_v5  ;;  %v1223_v10 = vadd.f32 %v1222_v60, %v2589_v31  ;;  %v1336_v11 = vadd.f32 %v1335_v6, %v2592_v32 }
 0x2b4   : > { %v1224_v13 = vpop.f32.mrf.mxu0  ;;  %v1337_v14 = vpop.f32.mrf.mxu1 }
 0x2b5   : > { %v1589_v15 = vmax.f32 %v1588_v2, %v1223_v10  ;;  %v1631_v16 = vmax.f32 %v1630_v3, %v1336_v11  ;;  %v1225_v12 = vadd.f32 %v1224_v13, %v2595_v33  ;;  %v1338_v17 = vadd.f32 %v1337_v14, %v2598_v35 }
 0x2b6   : > { %v1228_v18 = vpop.f32.mrf.mxu0  ;;  %v1341_v19 = vpop.f32.mrf.mxu1 }
 0x2b7   : > { %v1610_v20 = vmax.f32 %v1609_v7, %v1225_v12  ;;  %v1652_v21 = vmax.f32 %v1651_v8, %v1338_v17  ;;  %v1229_v22 = vadd.f32 %v1228_v18, %v2589_v31  ;;  %v1342_v23 = vadd.f32 %v1341_v19, %v2592_v32 }
 0x2b8   : > { %v1230_v24 = vpop.f32.mrf.mxu0  ;;  %v1343_v38 = vpop.f32.mrf.mxu1 }
 0x2b9   : > { %v1590_v9 = vmax.f32 %v1589_v15, %v1229_v22  ;;  %v1632_v25 = vmax.f32 %v1631_v16, %v1342_v23  ;;  %v1231_v28 = vadd.f32 %v1230_v24, %v2595_v33  ;;  %v1344_v29 = vadd.f32 %v1343_v38, %v2598_v35 }
 0x2ba   : > { %v1232_v30 = vpop.f32.mrf.mxu0  ;;  %v1345_v27 = vpop.f32.mrf.mxu1 }
 0x2bb   : > { %v1611_v34 = vmax.f32 %v1610_v20, %v1231_v28  ;;  %v1653_v36 = vmax.f32 %v1652_v21, %v1344_v29  ;;  %v1233_v37 = vadd.f32 %v1232_v30, %v2589_v31  ;;  %v1346_v39 = vadd.f32 %v1345_v27, %v2592_v32 }
 0x2bc   : > { %v1234_v40 = vpop.f32.mrf.mxu0  ;;  %v1347_v41 = vpop.f32.mrf.mxu1 }
 0x2bd   : > { %v1591_v42 = vmax.f32 %v1590_v9, %v1233_v37  ;;  %v1633_v44 = vmax.f32 %v1632_v25, %v1346_v39  ;;  %v1235_v45 = vadd.f32 %v1234_v40, %v2595_v33  ;;  %v1348_v43 = vadd.f32 %v1347_v41, %v2598_v35 }
 0x2be   : > { %v2664_v46 = vpop.f32.mrf.mxu0  ;;  %v2666_v47 = vpop.f32.mrf.mxu1  ;;  %v1758_v33 = vunpack.c.l.s4 %v2140_v57 }
 0x2bf   : > { %v1592_v48 = vrot.slane %v1591_v42, 4  ;;  %v1634_v49 = vrot.slane %v1633_v44, 4  ;;  %v1612_v50 = vmax.f32 %v1611_v34, %v1235_v45  ;;  %v1654_v51 = vmax.f32 %v1653_v36, %v1348_v43 }
 0x2c0   : > { %v2668_v53 = vpop.f32.mrf.mxu0  ;;  %v2670_v31 = vpop.f32.mrf.mxu1  ;;  %v1759_v60 = vunpack.c.0.s8 %v1758_v33  ;;  %v782_v43 = vsub.s32 4, %v2577_v52 }
 0x2c1   : > { %v1593_v32 = vmax.f32 %v1591_v42, %v1592_v48  ;;  %v1635_v54 = vmax.f32 %v1633_v44, %v1634_v49  ;;  %v1613_v55 = vrot.slane %v1612_v50, 4  ;;  %v1655_v56 = vrot.slane %v1654_v51, 4 }
 0x2c2   : > { %v1388_v58 = vpop.f32.mrf.mxu0  ;;  %v1501_v35 = vpop.f32.mrf.mxu1  ;;  %v2673_v17 = vsub.s32 %v1759_v60, %v2577_v52  ;;  %v790_v48 = vsub.s32 6, %v2577_v52  ;;  %v786_v49 = vsub.s32 5, %v2577_v52 }
 0x2c3   : > { %v1594_v59 = vrot.slane %v1593_v32, 2  ;;  %v1636_v61 = vrot.slane %v1635_v54, 2  ;;  %v1614_v62 = vmax.f32 %v1612_v50, %v1613_v55  ;;  %v1656_v63 = vmax.f32 %v1654_v51, %v1655_v56 }
 0x2c4   : > { %v1390_v0 = vpop.f32.mrf.mxu0  ;;  %v1503_v1 = vpop.f32.mrf.mxu1  ;;  %v794_v50 = vsub.s32 7, %v2577_v52  ;;  %v2696_v56 = vrot.slane %v2584_v26, %v782_v43  ;;  %v2699_v57 = vrot.slane %v2584_v26, %v790_v48  ;;  %v2702_v33 = vrot.slane %v2584_v26, %v786_v49 }
 0x2c5   : > { %v1595_v2 = vmax.f32 %v1593_v32, %v1594_v59  ;;  %v1637_v3 = vmax.f32 %v1635_v54, %v1636_v61  ;;  %v1615_v4 = vrot.slane %v1614_v62, 2  ;;  %v1657_v5 = vrot.slane %v1656_v63, 2 }
 0x2c6   : > { %v1394_v6 = vpop.f32.mrf.mxu0  ;;  %v1507_v7 = vpop.f32.mrf.mxu1  ;;  %v2705_v59 = vrot.slane %v2584_v26, %v794_v50  ;;  %v1385_v26 = vadd.f32 %v2664_v46, %v2696_v56  ;;  %v1498_v60 = vadd.f32 %v2666_v47, %v2699_v57 }
 0x2c7   : > { %v1596_v8 = vrot.slane %v1595_v2, 1  ;;  %v1638_v10 = vrot.slane %v1637_v3, 1  ;;  %v1616_v11 = vmax.f32 %v1614_v62, %v1615_v4  ;;  %v1658_v13 = vmax.f32 %v1656_v63, %v1657_v5 }
 0x2c8   : > { %v1396_v14 = vpop.f32.mrf.mxu0  ;;  %v1509_v15 = vpop.f32.mrf.mxu1  ;;  %v1389_v62 = vadd.f32 %v1388_v58, %v2696_v56  ;;  %v1502_v63 = vadd.f32 %v1501_v35, %v2699_v57  ;;  %v1508_v58 = vadd.f32 %v1507_v7, %v2699_v57  ;;  %v1387_v35 = vadd.f32 %v2668_v53, %v2702_v33 }
 0x2c9   : > { %v1617_v16 = vrot.slane %v1616_v11, 1  ;;  %v1659_v12 = vrot.slane %v1658_v13, 1  ;;  %v1597_v20 = vmax.f32 %v1595_v2, %v1596_v8  ;;  %v1639_v21 = vmax.f32 %v1637_v3, %v1638_v10 }
 0x2ca   : > { %v1398_v18 = vpop.f32.mrf.mxu0  ;;  %v1511_v19 = vpop.f32.mrf.mxu1  ;;  %v1391_v2 = vadd.f32 %v1390_v0, %v2702_v33  ;;  %v1504_v3 = vadd.f32 %v1503_v1, %v2705_v59  ;;  %v1395_v8 = vadd.f32 %v1394_v6, %v2696_v56  ;;  %v1500_v0 = vadd.f32 %v2670_v31, %v2705_v59 }
 0x2cb   : > { %v1618_v22 = vmax.f32 %v1616_v11, %v1617_v16  ;;  %v1660_v23 = vmax.f32 %v1658_v13, %v1659_v12  ;;  %v1397_v1 = vadd.f32 %v1396_v14, %v2702_v33  ;;  %v1510_v10 = vadd.f32 %v1509_v15, %v2705_v59 }
 0x2cc   : > { %v1400_v24 = vpop.f32.mrf.mxu0  ;;  %v1513_v38 = vpop.f32.mrf.mxu1  ;;  %v1661_v46 = vmax.f32 %v1385_v26, %v1389_v62  ;;  %v1703_v16 = vmax.f32 %v1498_v60, %v1502_v63  ;;  %v1399_v47 = vadd.f32 %v1398_v18, %v2696_v56  ;;  %v1512_v6 = vadd.f32 %v1511_v19, %v2699_v57 }
 0x2cd   : > { %v1753_v9 = vcombine.low %v1597_v20, %v1618_v22  ;;  %v1754_v25 = vcombine.low %v1639_v21, %v1660_v23  ;;  %v1682_v12 = vmax.f32 %v1387_v35, %v1391_v2  ;;  %v1724_v7 = vmax.f32 %v1500_v0, %v1504_v3 }
 0x2ce   : > { %v1404_v28 = vpop.f32.mrf.mxu0  ;;  %v1517_v29 = vpop.f32.mrf.mxu1  ;;  %v1401_v20 = vadd.f32 %v1400_v24, %v2702_v33  ;;  %v1514_v53 = vadd.f32 %v1513_v38, %v2705_v59  ;;  %v1662_v22 = vmax.f32 %v1661_v46, %v1395_v8  ;;  %v1704_v14 = vmax.f32 %v1703_v16, %v1508_v58 }
 0x2cf   : > { %v2676_v30 = vrot.slane %v1753_v9, %v2673_v17  ;;  %v2679_v27 = vrot.slane %v1754_v25, %v2673_v17  ;;  %v1405_v15 = vadd.f32 %v1404_v28, %v2696_v56  ;;  %v1518_v23 = vadd.f32 %v1517_v29, %v2699_v57 }
 0x2d0   : > { %v1406_v34 = vpop.f32.mrf.mxu0  ;;  %v1519_v36 = vpop.f32.mrf.mxu1  ;;  %v1683_v9 = vmax.f32 %v1682_v12, %v1397_v1  ;;  %v1725_v25 = vmax.f32 %v1724_v7, %v1510_v10  ;;  %v1663_v49 = vmax.f32 %v1662_v22, %v1399_v47  ;;  %v1705_v24 = vmax.f32 %v1704_v14, %v1512_v6 }
 0x2d1   : > { %v1785_v37 = vcombine.low %v2676_v30, %v2679_v27  ;;  %v1407_v18 = vadd.f32 %v1406_v34, %v2702_v33  ;;  %v1520_v19 = vadd.f32 %v1519_v36, %v2705_v59 }
 0x2d2   : > { %v1408_v39 = vpop.f32.mrf.mxu0  ;;  %v1521_v40 = vpop.f32.mrf.mxu1  ;;  %v1684_v62 = vmax.f32 %v1683_v9, %v1401_v20  ;;  %v1726_v63 = vmax.f32 %v1725_v25, %v1514_v53  ;;  %v1664_v26 = vmax.f32 %v1663_v49, %v1405_v15  ;;  %v1706_v34 = vmax.f32 %v1705_v24, %v1518_v23 }
 0x2d3   : > { %v1409_v38 = vadd.f32 %v1408_v39, %v2696_v56  ;;  %v1522_v50 = vadd.f32 %v1521_v40, %v2699_v57 }
 0x2d4   : > { %v1410_v41 = vpop.f32.mrf.mxu0  ;;  %v1523_v42 = vpop.f32.mrf.mxu1  ;;  %v1685_v8 = vmax.f32 %v1684_v62, %v1407_v18  ;;  %v1727_v39 = vmax.f32 %v1726_v63, %v1520_v19 }
 0x2d5   : > { %v1411_v28 = vadd.f32 %v1410_v41, %v2702_v33  ;;  %v1524_v29 = vadd.f32 %v1523_v42, %v2705_v59  ;;  %v1665_v0 = vmax.f32 %v1664_v26, %v1409_v38  ;;  %v1707_v42 = vmax.f32 %v1706_v34, %v1522_v50 }
 0x2d6   : > { %v2683_v44 = vpop.f32.mrf.mxu0  ;;  %v2685_v45 = vpop.f32.mrf.mxu1 }
 0x2d7   : > { %v1415_v36 = vadd.f32 %v2683_v44, %v2696_v56  ;;  %v1528_v60 = vadd.f32 %v2685_v45, %v2699_v57  ;;  %v1686_v44 = vmax.f32 %v1685_v8, %v1411_v28  ;;  %v1728_v46 = vmax.f32 %v1727_v39, %v1524_v29 }
 0x2d8   : > { %v1416_v51 = vpop.f32.mrf.mxu0  ;;  %v1529_v32 = vpop.f32.mrf.mxu1 }
 0x2d9   : > { %v1417_v40 = vadd.f32 %v1416_v51, %v2702_v33  ;;  %v1530_v58 = vadd.f32 %v1529_v32, %v2705_v59  ;;  %v1666_v47 = vmax.f32 %v1665_v0, %v1415_v36  ;;  %v1708_v6 = vmax.f32 %v1707_v42, %v1528_v60 }
 0x2da   : > { %v2691_v54 = vpop.f32.mrf.mxu0  ;;  %v2693_v55 = vpop.f32.mrf.mxu1 }
 0x2db   : > { %v1419_v1 = vadd.f32 %v2691_v54, %v2696_v56  ;;  %v1532_v10 = vadd.f32 %v2693_v55, %v2699_v57  ;;  %v1687_v7 = vmax.f32 %v1686_v44, %v1417_v40  ;;  %v1729_v55 = vmax.f32 %v1728_v46, %v1530_v58 }
 0x2dc   : > { %v2707_v61 = vpop.f32.mrf.mxu0  ;;  %v2709_v52 = vpop.f32.mrf.mxu1 }
 0x2dd   : > { %v1421_v45 = vadd.f32 %v2707_v61, %v2702_v33  ;;  %v1534_v51 = vadd.f32 %v2709_v52, %v2705_v59  ;;  %v1667_v14 = vmax.f32 %v1666_v47, %v1419_v1  ;;  %v1709_v52 = vmax.f32 %v1708_v6, %v1532_v10 }
 0x2de   : > { %v2715_v4 = vpop.f32.mrf.mxu0  ;;  %v2717_v5 = vpop.f32.mrf.mxu1 }
 0x2df   : > { %v1425_v12 = vadd.f32 %v2715_v4, %v2696_v56  ;;  %v1538_v54 = vadd.f32 %v2717_v5, %v2699_v57  ;;  %v1688_v9 = vmax.f32 %v1687_v7, %v1421_v45  ;;  %v1730_v25 = vmax.f32 %v1729_v55, %v1534_v51 }
 0x2e0   : > { %v1426_v11 = vpop.f32.mrf.mxu0  ;;  %v1539_v13 = vpop.f32.mrf.mxu1 }
 0x2e1   : > { %v1427_v20 = vadd.f32 %v1426_v11, %v2702_v33  ;;  %v1540_v53 = vadd.f32 %v1539_v13, %v2705_v59  ;;  %v1668_v49 = vmax.f32 %v1667_v14, %v1425_v12  ;;  %v1710_v11 = vmax.f32 %v1709_v52, %v1538_v54 }
 0x2e2   : > { %v1428_v21 = vpop.f32.mrf.mxu0  ;;  %v1541_v31 = vpop.f32.mrf.mxu1 }
 0x2e3   : > { %v1429_v15 = vadd.f32 %v1428_v21, %v2696_v56  ;;  %v1542_v23 = vadd.f32 %v1541_v31, %v2699_v57  ;;  %v1689_v38 = vmax.f32 %v1688_v9, %v1427_v20  ;;  %v1731_v50 = vmax.f32 %v1730_v25, %v1540_v53 }
 0x2e4   : > { %v1430_v43 = vpop.f32.mrf.mxu0  ;;  %v1543_v48 = vpop.f32.mrf.mxu1 }
 0x2e5   : > { %v1431_v4 = vadd.f32 %v1430_v43, %v2702_v33  ;;  %v1544_v5 = vadd.f32 %v1543_v48, %v2705_v59  ;;  %v1669_v28 = vmax.f32 %v1668_v49, %v1429_v15  ;;  %v1711_v43 = vmax.f32 %v1710_v11, %v1542_v23 }
 0x2e6   : > { %v1434_v2 = vpop.f32.mrf.mxu0  ;;  %v1547_v3 = vpop.f32.mrf.mxu1 }
 0x2e7   : > { %v1435_v13 = vadd.f32 %v1434_v2, %v2696_v56  ;;  %v1548_v24 = vadd.f32 %v1547_v3, %v2699_v57  ;;  %v1690_v26 = vmax.f32 %v1689_v38, %v1431_v4  ;;  %v1732_v34 = vmax.f32 %v1731_v50, %v1544_v5 }
 0x2e8   : > { %v1436_v35 = vpop.f32.mrf.mxu0  ;;  %v1549_v41 = vpop.f32.mrf.mxu1 }
 0x2e9   : > { %v1437_v21 = vadd.f32 %v1436_v35, %v2702_v33  ;;  %v1550_v31 = vadd.f32 %v1549_v41, %v2705_v59  ;;  %v1670_v8 = vmax.f32 %v1669_v28, %v1435_v13  ;;  %v1712_v39 = vmax.f32 %v1711_v43, %v1548_v24 }
 0x2ea   : > { %v1438_v16 = vpop.f32.mrf.mxu0  ;;  %v1551_v32 = vpop.f32.mrf.mxu1 }
 0x2eb   : > { %v1439_v48 = vadd.f32 %v1438_v16, %v2696_v56  ;;  %v1552_v29 = vadd.f32 %v1551_v32, %v2699_v57  ;;  %v1691_v35 = vmax.f32 %v1690_v26, %v1437_v21  ;;  %v1733_v41 = vmax.f32 %v1732_v34, %v1550_v31 }
 0x2ec   : > { %v1440_v61 = vpop.f32.mrf.mxu0  ;;  %v1553_v22 = vpop.f32.mrf.mxu1 }
 0x2ed   : > { %v1441_v2 = vadd.f32 %v1440_v61, %v2702_v33  ;;  %v1554_v3 = vadd.f32 %v1553_v22, %v2705_v59  ;;  %v1671_v44 = vmax.f32 %v1670_v8, %v1439_v48  ;;  %v1713_v46 = vmax.f32 %v1712_v39, %v1552_v29 }
 0x2ee   : > { %v1444_v18 = vpop.f32.mrf.mxu0  ;;  %v1557_v19 = vpop.f32.mrf.mxu1 }
 0x2ef   : > { %v1445_v40 = vadd.f32 %v1444_v18, %v2696_v56  ;;  %v1558_v58 = vadd.f32 %v1557_v19, %v2699_v57  ;;  %v1692_v16 = vmax.f32 %v1691_v35, %v1441_v2  ;;  %v1734_v32 = vmax.f32 %v1733_v41, %v1554_v3 }
 0x2f0   : > { %v1446_v62 = vpop.f32.mrf.mxu0  ;;  %v1559_v63 = vpop.f32.mrf.mxu1 }
 0x2f1   : > { %v1447_v0 = vadd.f32 %v1446_v62, %v2702_v33  ;;  %v1560_v42 = vadd.f32 %v1559_v63, %v2705_v59  ;;  %v1672_v7 = vmax.f32 %v1671_v44, %v1445_v40  ;;  %v1714_v55 = vmax.f32 %v1713_v46, %v1558_v58 }
 0x2f2   : > { %v1448_v36 = vpop.f32.mrf.mxu0  ;;  %v1561_v60 = vpop.f32.mrf.mxu1 }
 0x2f3   : > { %v1449_v45 = vadd.f32 %v1448_v36, %v2696_v56  ;;  %v1562_v51 = vadd.f32 %v1561_v60, %v2699_v57  ;;  %v1693_v61 = vmax.f32 %v1692_v16, %v1447_v0  ;;  %v1735_v22 = vmax.f32 %v1734_v32, %v1560_v42 }
 0x2f4   : > { %v1450_v1 = vpop.f32.mrf.mxu0  ;;  %v1563_v10 = vpop.f32.mrf.mxu1 }
 0x2f5   : > { %v1451_v47 = vadd.f32 %v1450_v1, %v2702_v33  ;;  %v1564_v6 = vadd.f32 %v1563_v10, %v2705_v59  ;;  %v1673_v15 = vmax.f32 %v1672_v7, %v1449_v45  ;;  %v1715_v23 = vmax.f32 %v1714_v55, %v1562_v51  ;;  %v1576_v55 = vld [vmem:[%s2225_s22] sm:$0xff] }
 0x2f6   : > { %v1454_v12 = vpop.f32.mrf.mxu0  ;;  %v1567_v54 = vpop.f32.mrf.mxu1 }
 0x2f7   : > { %v1455_v20 = vadd.f32 %v1454_v12, %v2696_v56  ;;  %v1568_v53 = vadd.f32 %v1567_v54, %v2699_v57  ;;  %v1694_v4 = vmax.f32 %v1693_v61, %v1451_v47  ;;  %v1736_v5 = vmax.f32 %v1735_v22, %v1564_v6 }
 0x2f8   : > { %v1456_v14 = vpop.f32.mrf.mxu0  ;;  %v1569_v52 = vpop.f32.mrf.mxu1  ;;  %v1793_v54 = vrot.slane %v1785_v37, %v2673_v17 }
 0x2f9   : > { %v1457_v9 = vadd.f32 %v1456_v14, %v2702_v33  ;;  %v1570_v25 = vadd.f32 %v1569_v52, %v2705_v59  ;;  %v1674_v49 = vmax.f32 %v1673_v15, %v1455_v20  ;;  %v1716_v11 = vmax.f32 %v1715_v23, %v1568_v53 }
 0x2fa   : > { %v1458_v18 = vpop.f32.mrf.mxu0  ;;  %v1571_v19 = vpop.f32.mrf.mxu1 }
 0x2fb   : > { %v1459_v13 = vadd.f32 %v1458_v18, %v2696_v56  ;;  %v1572_v24 = vadd.f32 %v1571_v19, %v2699_v57  ;;  %v1695_v38 = vmax.f32 %v1694_v4, %v1457_v9  ;;  %v1737_v50 = vmax.f32 %v1736_v5, %v1570_v25 }
 0x2fc   : > { %v1460_v21 = vpop.f32.mrf.mxu0  ;;  %v1573_v31 = vpop.f32.mrf.mxu1 }
 0x2fd   : > { %v1675_v62 = vmax.f32 %v1674_v49, %v1459_v13  ;;  %v1717_v63 = vmax.f32 %v1716_v11, %v1572_v24  ;;  %v1461_v28 = vadd.f32 %v1460_v21, %v2702_v33  ;;  %v1574_v43 = vadd.f32 %v1573_v31, %v2705_v59 }
 0x2ff   : > { %v1676_v48 = vrot.slane %v1675_v62, 4  ;;  %v1718_v29 = vrot.slane %v1717_v63, 4  ;;  %v1696_v26 = vmax.f32 %v1695_v38, %v1461_v28  ;;  %v1738_v34 = vmax.f32 %v1737_v50, %v1574_v43 }
 0x301   : > { %v1677_v2 = vmax.f32 %v1675_v62, %v1676_v48  ;;  %v1719_v3 = vmax.f32 %v1717_v63, %v1718_v29  ;;  %v1697_v36 = vrot.slane %v1696_v26, 4  ;;  %v1739_v56 = vrot.slane %v1738_v34, 4 }
 0x303   : > { %v1678_v60 = vrot.slane %v1677_v2, 2  ;;  %v1720_v57 = vrot.slane %v1719_v3, 2  ;;  %v1698_v8 = vmax.f32 %v1696_v26, %v1697_v36  ;;  %v1740_v39 = vmax.f32 %v1738_v34, %v1739_v56 }
 0x305   : > { %v1679_v40 = vmax.f32 %v1677_v2, %v1678_v60  ;;  %v1721_v58 = vmax.f32 %v1719_v3, %v1720_v57  ;;  %v1699_v35 = vrot.slane %v1698_v8, 2  ;;  %v1741_v41 = vrot.slane %v1740_v39, 2 }
 0x307   : > { %v1680_v0 = vrot.slane %v1679_v40, 1  ;;  %v1722_v33 = vrot.slane %v1721_v58, 1  ;;  %v1700_v59 = vmax.f32 %v1698_v8, %v1699_v35  ;;  %v1742_v42 = vmax.f32 %v1740_v39, %v1741_v41 }
 0x309   : > { %v1701_v1 = vrot.slane %v1700_v59, 1  ;;  %v1743_v10 = vrot.slane %v1742_v42, 1  ;;  %v1681_v44 = vmax.f32 %v1679_v40, %v1680_v0  ;;  %v1723_v46 = vmax.f32 %v1721_v58, %v1722_v33 }
 0x30b   : > { %v1702_v45 = vmax.f32 %v1700_v59, %v1701_v1  ;;  %v1744_v51 = vmax.f32 %v1742_v42, %v1743_v10 }
 0x30d   : > { %v1755_v16 = vcombine.low %v1681_v44, %v1702_v45  ;;  %v1756_v32 = vcombine.low %v1723_v46, %v1744_v51 }
 0x30f   : > { %v1777_v47 = vrot.slane %v1755_v16, %v2673_v17  ;;  %v1784_v6 = vrot.slane %v1756_v32, %v2673_v17 }
 0x311   : > { %v1786_v12 = vcombine.low %v1777_v47, %v1784_v6 }
 0x313   : > { %v1800_v7 = vrot.slane %v1786_v12, %v2673_v17 }
 0x315   : > { %v1801_v20 = vcombine.low %v1793_v54, %v1800_v7 }
 0x317   : > { %v1803_v53 = vmax.f32 %v1576_v55, %v1801_v20 }
 0x319   : > { %1804 = vst [vmem:[%s2225_s22] sm:$0xff] %v1803_v53 }
 0x31a PF: > { %s17_s28 = sadd.s32 1, %s2135_s28   ;;  %s2823_s24 = smov %s2127_s26 }
 0x31b   : > { %p14_p8 = scmp.ge.s32.totalorder %s17_s28, 10   ;;  %s2824_s25 = smov %s2131_s27 }
 0x31c   : > { %s2825_s26 = smov %s2828_s29  ;;  %s2826_s27 = smov %s2832_s30 }
 0x31d   :  { %16 = sbr.rel (!%p14_p8) target bundleno = 3 (0x3), region = 85 }

// kernel: _lambda_.4
= control target key start
LH: loop header
LB: loop body
LE: loop exit
PB: predicated region body
PF: predicated region fallthrough
CT: control target
= control target key end

     0   :  { %12 = vsyncpa [#allocation3], 0  ;;  %s2005_s0 = inlined_call_operand.vmem [shape: f32[2,1024], index: 0, kind: input, shape index: {}]   ;;  %s2006_s1 = inlined_call_operand.hbm [shape: f32[1024,512], index: 1, kind: input, shape index: {}]   ;;  %s2007_s2 = inlined_call_operand.hbm [shape: f32[1,512], index: 2, kind: input, shape index: {}]   ;;  %s2008_s3 = inlined_call_operand.hbm [shape: f32[512,256], index: 3, kind: input, shape index: {}]   ;;  %s2009_s4 = inlined_call_operand.hbm [shape: f32[1,256], index: 4, kind: input, shape index: {}]   ;;  %s2010_s5 = inlined_call_operand.hbm [shape: f32[256,128], index: 5, kind: input, shape index: {}]   ;;  %s2011_s6 = inlined_call_operand.hbm [shape: f32[1,128], index: 6, kind: input, shape index: {}]   ;;  %s2012_s7 = inlined_call_operand.vmem [shape: f32[2,128], index: 7, kind: output, shape index: {}]  }
   0x1   :  { %13 = vsyncpa [#allocation5], 0 }
   0x2   :  { %14 = vsyncpa [#allocation8], 0 }
   0x3   :  { %15 = vsyncpa [#allocation11], 0  ;;  %s1855_s24 = smov [#allocation4]   ;;  %s1856_s26 = smov [#allocation7]  }
   0x4   :  { %s36_s25 = sshll.u32 %s1855_s24, 4  ;;  %s58_s27 = sshll.u32 %s1856_s26, 4  ;;  %s37_s25 = int_to_ptr.vmem [resolvable:$true] %s36_s25  ;;  %s59_s27 = int_to_ptr.vmem [resolvable:$true] %s58_s27 }
   0x5   :  { %s1735_s28 = scalar_lea.vmem %s37_s25, 64  ;;  %p1740_p1 = scmp.lt.s32.totalorder %s37_s25, %s37_s25 }
   0x6   :  { %p1736_p0 = scmp.ne.s32.totalorder %s37_s25, %s1735_s28  ;;  %p1741_p2 = scmp.lt.s32.totalorder %s1735_s28, %s1735_s28 }
   0x8   :  { %p1742_p3 = por %p1741_p2, %p1740_p1 }
   0xa   :  { %p1743_p4 = pnand %p1742_p3, %p1736_p0 }
   0xc   :  { %1746 = shalt.err (!%p1743_p4)
}
   0xd   :  { %39 = dma.hbm_to_vmem [thread:$0]  %s2007_s2, 64, %s37_s25, [#allocation5]  }
   0xe   :  { %s1755_s8 = scalar_lea.vmem %s59_s27, 32  ;;  %p1760_p6 = scmp.lt.s32.totalorder %s59_s27, %s59_s27 }
   0xf   :  { %p1756_p5 = scmp.ne.s32.totalorder %s59_s27, %s1755_s8  ;;  %p1761_p7 = scmp.lt.s32.totalorder %s1755_s8, %s1755_s8 }
  0x11   :  { %p1762_p8 = por %p1761_p7, %p1760_p6 }
  0x13   :  { %p1763_p9 = pnand %p1762_p8, %p1756_p5 }
  0x15   :  { %1766 = shalt.err (!%p1763_p9)
}
  0x16   :  { %61 = dma.hbm_to_vmem [thread:$0]  %s2009_s4, 32, %s59_s27, [#allocation8]  }
  0x17   :  { %s1857_s11 = smov [#allocation2]  }
  0x18   :  { %s23_s12 = sshll.u32 %s1857_s11, 4  ;;  %s24_s12 = int_to_ptr.vmem [resolvable:$true] %s23_s12 }
  0x19   :  { %s1775_s13 = scalar_lea.vmem %s24_s12, 65536  ;;  %p1780_p11 = scmp.lt.s32.totalorder %s24_s12, %s24_s12 }
  0x1a   :  { %p1776_p10 = scmp.ne.s32.totalorder %s24_s12, %s1775_s13  ;;  %p1781_p12 = scmp.lt.s32.totalorder %s1775_s13, %s1775_s13 }
  0x1c   :  { %p1782_p13 = por %p1781_p12, %p1780_p11 }
  0x1e   :  { %p1783_p0 = pnand %p1782_p13, %p1776_p10 }
  0x20   :  { %1786 = shalt.err (!%p1783_p0)
}
  0x21   :  { %s1858_s2 = smov 512   ;;  %s1859_s14 = smov 32  }
  0x22   :  { %29 = dma.hbm_to_vmem [thread:$0]  %s2006_s1, 65536, %s24_s12, [#allocation3], %s1858_s2, %s1858_s2, %s1859_s14  }
  0x23   :  { %s1860_s17 = smov [#allocation6]  }
  0x24   :  { %s45_s18 = sshll.u32 %s1860_s17, 4  ;;  %s46_s18 = int_to_ptr.vmem [resolvable:$true] %s45_s18 }
  0x25   :  { %s1795_s4 = scalar_lea.vmem %s46_s18, 16384  ;;  %p1800_p2 = scmp.lt.s32.totalorder %s46_s18, %s46_s18 }
  0x26   :  { %p1796_p1 = scmp.ne.s32.totalorder %s46_s18, %s1795_s4  ;;  %p1801_p3 = scmp.lt.s32.totalorder %s1795_s4, %s1795_s4 }
  0x28   :  { %p1802_p4 = por %p1801_p3, %p1800_p2 }
  0x2a   :  { %p1803_p5 = pnand %p1802_p4, %p1796_p1 }
  0x2c   :  { %1806 = shalt.err (!%p1803_p5)
}
  0x2d   :  { %s1861_s19 = smov 256   ;;  %s1862_s20 = smov 16  }
  0x2e   :  { %51 = dma.hbm_to_vmem [thread:$0]  %s2008_s3, 16384, %s46_s18, [#allocation5], %s1861_s19, %s1861_s19, %s1862_s20  }
  0x2f   :  { %s1863_s23 = smov [#allocation9]  }
  0x30   :  { %s67_s24 = sshll.u32 %s1863_s23, 4  ;;  %s68_s24 = int_to_ptr.vmem [resolvable:$true] %s67_s24 }
  0x31   :  { %s1815_s1 = scalar_lea.vmem %s68_s24, 4096  ;;  %p1820_p7 = scmp.lt.s32.totalorder %s68_s24, %s68_s24 }
  0x32   :  { %p1816_p6 = scmp.ne.s32.totalorder %s68_s24, %s1815_s1  ;;  %p1821_p8 = scmp.lt.s32.totalorder %s1815_s1, %s1815_s1 }
  0x34   :  { %p1822_p9 = por %p1821_p8, %p1820_p7 }
  0x36   :  { %p1823_p10 = pnand %p1822_p9, %p1816_p6 }
  0x38   :  { %1826 = shalt.err (!%p1823_p10)
}
  0x39   :  { %s1864_s25 = smov 128   ;;  %s1865_s26 = smov 8  }
  0x3a   :  { %73 = dma.hbm_to_vmem [thread:$0]  %s2010_s5, 4096, %s68_s24, [#allocation8], %s1864_s25, %s1864_s25, %s1865_s26  }
  0x3b   :  { %s1866_s29 = smov [#allocation10]  }
  0x3c   :  { %s80_s30 = sshll.u32 %s1866_s29, 4  ;;  %s81_s30 = int_to_ptr.vmem [resolvable:$true] %s80_s30 }
  0x3d   :  { %s1835_s3 = scalar_lea.vmem %s81_s30, 16  ;;  %s1839_s8 = scalar_lea.vmem %s81_s30, 32 }
  0x3e   :  { %p1836_p11 = scmp.ne.s32.totalorder %s81_s30, %s1835_s3  ;;  %p1840_p12 = scmp.lt.s32.totalorder %s81_s30, %s81_s30 }
  0x3f   :  { %p1841_p13 = scmp.lt.s32.totalorder %s1839_s8, %s1835_s3 }
  0x41   :  { %p1842_p0 = por %p1841_p13, %p1840_p12 }
  0x43   :  { %p1843_p1 = pnand %p1842_p0, %p1836_p11 }
  0x45   :  { %1846 = shalt.err (!%p1843_p1)
}
  0x46   :  { %83 = dma.hbm_to_vmem [thread:$0]  %s2011_s6, 16, %s81_s30, [#allocation11]  }
  0x47   :  { %1847 = dma.done.wait [#allocation3], 65536  }
  0x48   :  { %1848 = vsyncadd [#allocation3], 4294901760 }
  0x49   :  { %1849 = dma.done.wait [#allocation5], 16448  }
  0x4a   :  { %1850 = vsyncadd [#allocation5], 4294950848 }
  0x4b   :  { %1851 = dma.done.wait [#allocation8], 4128  }
  0x4c   :  { %1852 = vsyncadd [#allocation8], 4294963168 }
  0x4d   :  { %1853 = dma.done.wait [#allocation11], 16  }
  0x4e   :  { %1854 = vsyncadd [#allocation11], 4294967280  ;;  %v165_v0 = vld [vmem:[#allocation2 + $0x1e8] sm:$0xff]  ;;  %v164_v2 = vld [vmem:[#allocation2 + $0x1e0] sm:$0xff] }
  0x4f   :  { %v293_v1 = vld [vmem:[#allocation2 + $0x5e8] sm:$0xff]  ;;  %682 = vmatprep.subr.mxu0 %v165_v0  ;;  %v292_v3 = vld [vmem:[#allocation2 + $0x5e0] sm:$0xff] }
  0x50   :  { %753 = vmatprep.subr.mxu1 %v293_v1  ;;  %v161_v4 = vld [vmem:[#allocation2 + $0x1c8] sm:$0xff]  ;;  %683 = vmatpush1.msra.mxu0 %v164_v2  ;;  %v160_v6 = vld [vmem:[#allocation2 + $0x1c0] sm:$0xff] }
  0x51   :  { %v289_v5 = vld [vmem:[#allocation2 + $0x5c8] sm:$0xff]  ;;  %754 = vmatpush1.msra.mxu1 %v292_v3  ;;  %v288_v7 = vld [vmem:[#allocation2 + $0x5c0] sm:$0xff]  ;;  %684 = vmatprep.subr.mxu0 %v161_v4 }
  0x52   :  { %v157_v8 = vld [vmem:[#allocation2 + $0x1a8] sm:$0xff]  ;;  %755 = vmatprep.subr.mxu1 %v289_v5  ;;  %v156_v10 = vld [vmem:[#allocation2 + $0x1a0] sm:$0xff]  ;;  %685 = vmatpush1.msra.mxu0 %v160_v6 }
  0x53   :  { %v285_v9 = vld [vmem:[#allocation2 + $0x5a8] sm:$0xff]  ;;  %v284_v11 = vld [vmem:[#allocation2 + $0x5a0] sm:$0xff]  ;;  %756 = vmatpush1.msra.mxu1 %v288_v7  ;;  %686 = vmatprep.subr.mxu0 %v157_v8 }
  0x54   :  { %v153_v12 = vld [vmem:[#allocation2 + $0x188] sm:$0xff]  ;;  %757 = vmatprep.subr.mxu1 %v285_v9  ;;  %v152_v14 = vld [vmem:[#allocation2 + $0x180] sm:$0xff]  ;;  %687 = vmatpush1.msra.mxu0 %v156_v10 }
  0x55   :  { %v281_v13 = vld [vmem:[#allocation2 + $0x588] sm:$0xff]  ;;  %v280_v15 = vld [vmem:[#allocation2 + $0x580] sm:$0xff]  ;;  %758 = vmatpush1.msra.mxu1 %v284_v11  ;;  %688 = vmatprep.subr.mxu0 %v153_v12 }
  0x56   :  { %v149_v16 = vld [vmem:[#allocation2 + $0x168] sm:$0xff]  ;;  %759 = vmatprep.subr.mxu1 %v281_v13  ;;  %v148_v18 = vld [vmem:[#allocation2 + $0x160] sm:$0xff]  ;;  %689 = vmatpush1.msra.mxu0 %v152_v14 }
  0x57   :  { %v277_v17 = vld [vmem:[#allocation2 + $0x568] sm:$0xff]  ;;  %v276_v19 = vld [vmem:[#allocation2 + $0x560] sm:$0xff]  ;;  %760 = vmatpush1.msra.mxu1 %v280_v15  ;;  %690 = vmatprep.subr.mxu0 %v149_v16 }
  0x58   :  { %v145_v20 = vld [vmem:[#allocation2 + $0x148] sm:$0xff]  ;;  %761 = vmatprep.subr.mxu1 %v277_v17  ;;  %v144_v22 = vld [vmem:[#allocation2 + $0x140] sm:$0xff]  ;;  %691 = vmatpush1.msra.mxu0 %v148_v18 }
  0x59   :  { %v273_v21 = vld [vmem:[#allocation2 + $0x548] sm:$0xff]  ;;  %v272_v23 = vld [vmem:[#allocation2 + $0x540] sm:$0xff]  ;;  %762 = vmatpush1.msra.mxu1 %v276_v19  ;;  %692 = vmatprep.subr.mxu0 %v145_v20 }
  0x5a   :  { %v141_v24 = vld [vmem:[#allocation2 + $0x128] sm:$0xff]  ;;  %763 = vmatprep.subr.mxu1 %v273_v21  ;;  %v140_v26 = vld [vmem:[#allocation2 + $0x120] sm:$0xff]  ;;  %693 = vmatpush1.msra.mxu0 %v144_v22 }
  0x5b   :  { %v269_v25 = vld [vmem:[#allocation2 + $0x528] sm:$0xff]  ;;  %v268_v27 = vld [vmem:[#allocation2 + $0x520] sm:$0xff]  ;;  %764 = vmatpush1.msra.mxu1 %v272_v23  ;;  %694 = vmatprep.subr.mxu0 %v141_v24 }
  0x5c   :  { %v137_v28 = vld [vmem:[#allocation2 + $0x108] sm:$0xff]  ;;  %765 = vmatprep.subr.mxu1 %v269_v25  ;;  %v136_v30 = vld [vmem:[#allocation2 + $0x100] sm:$0xff]  ;;  %695 = vmatpush1.msra.mxu0 %v140_v26 }
  0x5d   :  { %v265_v29 = vld [vmem:[#allocation2 + $0x508] sm:$0xff]  ;;  %v264_v31 = vld [vmem:[#allocation2 + $0x500] sm:$0xff]  ;;  %766 = vmatpush1.msra.mxu1 %v268_v27  ;;  %696 = vmatprep.subr.mxu0 %v137_v28 }
  0x5e   :  { %v133_v32 = vld [vmem:[#allocation2 + $0xe8] sm:$0xff]  ;;  %767 = vmatprep.subr.mxu1 %v265_v29  ;;  %v132_v34 = vld [vmem:[#allocation2 + $0xe0] sm:$0xff]  ;;  %697 = vmatpush1.msra.mxu0 %v136_v30  ;;  %v618_v30 = vlaneseq }
  0x5f   :  { %v261_v33 = vld [vmem:[#allocation2 + $0x4e8] sm:$0xff]  ;;  %v260_v35 = vld [vmem:[#allocation2 + $0x4e0] sm:$0xff]  ;;  %768 = vmatpush1.msra.mxu1 %v264_v31  ;;  %698 = vmatprep.subr.mxu0 %v133_v32  ;;  %v1867_v31 = vmov 1983009808  }
  0x60   :  { %v129_v36 = vld [vmem:[#allocation2 + $0xc8] sm:$0xff]  ;;  %769 = vmatprep.subr.mxu1 %v261_v33  ;;  %v128_v38 = vld [vmem:[#allocation2 + $0xc0] sm:$0xff]  ;;  %699 = vmatpush1.msra.mxu0 %v132_v34  ;;  %v642_v32 = vunpack.c.l.s4 %v1867_v31 }
  0x61   :  { %v257_v37 = vld [vmem:[#allocation2 + $0x4c8] sm:$0xff]  ;;  %v256_v39 = vld [vmem:[#allocation2 + $0x4c0] sm:$0xff]  ;;  %770 = vmatpush1.msra.mxu1 %v260_v35  ;;  %700 = vmatprep.subr.mxu0 %v129_v36 }
  0x62   :  { %v125_v40 = vld [vmem:[#allocation2 + $0xa8] sm:$0xff]  ;;  %771 = vmatprep.subr.mxu1 %v257_v37  ;;  %v124_v42 = vld [vmem:[#allocation2 + $0xa0] sm:$0xff]  ;;  %701 = vmatpush1.msra.mxu0 %v128_v38 }
  0x63   :  { %v253_v41 = vld [vmem:[#allocation2 + $0x4a8] sm:$0xff]  ;;  %v252_v43 = vld [vmem:[#allocation2 + $0x4a0] sm:$0xff]  ;;  %772 = vmatpush1.msra.mxu1 %v256_v39  ;;  %702 = vmatprep.subr.mxu0 %v125_v40 }
  0x64   :  { %v121_v44 = vld [vmem:[#allocation2 + $0x88] sm:$0xff]  ;;  %773 = vmatprep.subr.mxu1 %v253_v41  ;;  %v120_v46 = vld [vmem:[#allocation2 + $0x80] sm:$0xff]  ;;  %703 = vmatpush1.msra.mxu0 %v124_v42  ;;  %v1928_v41 = vshrl.u32 %v618_v30, 7  ;;  %v643_v42 = vunpack.c.0.s8 %v642_v32 }
  0x65   :  { %v249_v45 = vld [vmem:[#allocation2 + $0x488] sm:$0xff]  ;;  %v248_v47 = vld [vmem:[#allocation2 + $0x480] sm:$0xff]  ;;  %774 = vmatpush1.msra.mxu1 %v252_v43  ;;  %704 = vmatprep.subr.mxu0 %v121_v44 }
  0x66   :  { %v117_v48 = vld [vmem:[#allocation2 + $0x68] sm:$0xff]  ;;  %775 = vmatprep.subr.mxu1 %v249_v45  ;;  %v116_v50 = vld [vmem:[#allocation2 + $0x60] sm:$0xff]  ;;  %705 = vmatpush1.msra.mxu0 %v120_v46 }
  0x67   :  { %v245_v49 = vld [vmem:[#allocation2 + $0x468] sm:$0xff]  ;;  %v244_v51 = vld [vmem:[#allocation2 + $0x460] sm:$0xff]  ;;  %776 = vmatpush1.msra.mxu1 %v248_v47  ;;  %706 = vmatprep.subr.mxu0 %v117_v48 }
  0x68   :  { %v113_v52 = vld [vmem:[#allocation2 + $0x48] sm:$0xff]  ;;  %777 = vmatprep.subr.mxu1 %v245_v49  ;;  %v112_v54 = vld [vmem:[#allocation2 + $0x40] sm:$0xff]  ;;  %707 = vmatpush1.msra.mxu0 %v116_v50 }
  0x69   :  { %v241_v53 = vld [vmem:[#allocation2 + $0x448] sm:$0xff]  ;;  %v240_v55 = vld [vmem:[#allocation2 + $0x440] sm:$0xff]  ;;  %778 = vmatpush1.msra.mxu1 %v244_v51  ;;  %708 = vmatprep.subr.mxu0 %v113_v52  ;;  %v1934_v52 = vsub.s32 %v643_v42, %v1928_v41 }
  0x6a   :  { %v109_v56 = vld [vmem:[#allocation2 + $0x28] sm:$0xff]  ;;  %779 = vmatprep.subr.mxu1 %v241_v53  ;;  %v108_v58 = vld [vmem:[#allocation2 + $0x20] sm:$0xff]  ;;  %709 = vmatpush1.msra.mxu0 %v112_v54 }
  0x6b   :  { %v237_v57 = vld [vmem:[#allocation2 + $0x428] sm:$0xff]  ;;  %v236_v59 = vld [vmem:[#allocation2 + $0x420] sm:$0xff]  ;;  %780 = vmatpush1.msra.mxu1 %v240_v55  ;;  %710 = vmatprep.subr.mxu0 %v109_v56 }
  0x6c   :  { %v105_v60 = vld [vmem:[#allocation2 + $0x8] sm:$0xff]  ;;  %781 = vmatprep.subr.mxu1 %v237_v57  ;;  %v104_v62 = vld [vmem:[#allocation2] sm:$0xff]  ;;  %711 = vmatpush1.msra.mxu0 %v108_v58 }
  0x6d   :  { %v233_v61 = vld [vmem:[#allocation2 + $0x408] sm:$0xff]  ;;  %v232_v63 = vld [vmem:[#allocation2 + $0x400] sm:$0xff]  ;;  %782 = vmatpush1.msra.mxu1 %v236_v59  ;;  %712 = vmatprep.subr.mxu0 %v105_v60 }
  0x6e   :  { %v229_v0 = vld [vmem:[#allocation2 + $0x3e8] sm:$0xff]  ;;  %783 = vmatprep.subr.mxu1 %v233_v61  ;;  %v228_v2 = vld [vmem:[#allocation2 + $0x3e0] sm:$0xff]  ;;  %713 = vmatpush1.msra.mxu0 %v104_v62 }
  0x6f   :  { %v357_v1 = vld [vmem:[#allocation2 + $0x7e8] sm:$0xff]  ;;  %v356_v3 = vld [vmem:[#allocation2 + $0x7e0] sm:$0xff]  ;;  %784 = vmatpush1.msra.mxu1 %v232_v63  ;;  %714 = vmatprep.subr.mxu0 %v229_v0 }
  0x70   :  { %v225_v4 = vld [vmem:[#allocation2 + $0x3c8] sm:$0xff]  ;;  %785 = vmatprep.subr.mxu1 %v357_v1  ;;  %v224_v6 = vld [vmem:[#allocation2 + $0x3c0] sm:$0xff]  ;;  %715 = vmatpush2.msra.mxu0 %v228_v2 }
  0x71   :  { %v353_v5 = vld [vmem:[#allocation2 + $0x7c8] sm:$0xff]  ;;  %v352_v7 = vld [vmem:[#allocation2 + $0x7c0] sm:$0xff]  ;;  %786 = vmatpush2.msra.mxu1 %v356_v3  ;;  %716 = vmatprep.subr.mxu0 %v225_v4 }
  0x72   :  { %v221_v8 = vld [vmem:[#allocation2 + $0x3a8] sm:$0xff]  ;;  %787 = vmatprep.subr.mxu1 %v353_v5  ;;  %v220_v10 = vld [vmem:[#allocation2 + $0x3a0] sm:$0xff]  ;;  %717 = vmatpush2.msra.mxu0 %v224_v6 }
  0x73   :  { %v349_v9 = vld [vmem:[#allocation2 + $0x7a8] sm:$0xff]  ;;  %v348_v11 = vld [vmem:[#allocation2 + $0x7a0] sm:$0xff]  ;;  %788 = vmatpush2.msra.mxu1 %v352_v7  ;;  %718 = vmatprep.subr.mxu0 %v221_v8 }
  0x74   :  { %v217_v12 = vld [vmem:[#allocation2 + $0x388] sm:$0xff]  ;;  %789 = vmatprep.subr.mxu1 %v349_v9  ;;  %v216_v14 = vld [vmem:[#allocation2 + $0x380] sm:$0xff]  ;;  %719 = vmatpush2.msra.mxu0 %v220_v10 }
  0x75   :  { %v345_v13 = vld [vmem:[#allocation2 + $0x788] sm:$0xff]  ;;  %v344_v15 = vld [vmem:[#allocation2 + $0x780] sm:$0xff]  ;;  %790 = vmatpush2.msra.mxu1 %v348_v11  ;;  %720 = vmatprep.subr.mxu0 %v217_v12 }
  0x76   :  { %v213_v16 = vld [vmem:[#allocation2 + $0x368] sm:$0xff]  ;;  %791 = vmatprep.subr.mxu1 %v345_v13  ;;  %v212_v18 = vld [vmem:[#allocation2 + $0x360] sm:$0xff]  ;;  %721 = vmatpush2.msra.mxu0 %v216_v14 }
  0x77   :  { %v341_v17 = vld [vmem:[#allocation2 + $0x768] sm:$0xff]  ;;  %v340_v19 = vld [vmem:[#allocation2 + $0x760] sm:$0xff]  ;;  %792 = vmatpush2.msra.mxu1 %v344_v15  ;;  %722 = vmatprep.subr.mxu0 %v213_v16 }
  0x78   :  { %v209_v20 = vld [vmem:[#allocation2 + $0x348] sm:$0xff]  ;;  %793 = vmatprep.subr.mxu1 %v341_v17  ;;  %v208_v22 = vld [vmem:[#allocation2 + $0x340] sm:$0xff]  ;;  %723 = vmatpush2.msra.mxu0 %v212_v18 }
  0x79   :  { %v337_v21 = vld [vmem:[#allocation2 + $0x748] sm:$0xff]  ;;  %v336_v23 = vld [vmem:[#allocation2 + $0x740] sm:$0xff]  ;;  %794 = vmatpush2.msra.mxu1 %v340_v19  ;;  %724 = vmatprep.subr.mxu0 %v209_v20 }
  0x7a   :  { %v205_v24 = vld [vmem:[#allocation2 + $0x328] sm:$0xff]  ;;  %795 = vmatprep.subr.mxu1 %v337_v21  ;;  %v204_v26 = vld [vmem:[#allocation2 + $0x320] sm:$0xff]  ;;  %725 = vmatpush2.msra.mxu0 %v208_v22 }
  0x7b   :  { %v333_v25 = vld [vmem:[#allocation2 + $0x728] sm:$0xff]  ;;  %v332_v27 = vld [vmem:[#allocation2 + $0x720] sm:$0xff]  ;;  %796 = vmatpush2.msra.mxu1 %v336_v23  ;;  %726 = vmatprep.subr.mxu0 %v205_v24 }
  0x7c   :  { %v201_v28 = vld [vmem:[#allocation2 + $0x308] sm:$0xff]  ;;  %797 = vmatprep.subr.mxu1 %v333_v25  ;;  %v200_v33 = vld [vmem:[#allocation2 + $0x300] sm:$0xff]  ;;  %727 = vmatpush2.msra.mxu0 %v204_v26 }
  0x7d   :  { %v329_v29 = vld [vmem:[#allocation2 + $0x708] sm:$0xff]  ;;  %v328_v34 = vld [vmem:[#allocation2 + $0x700] sm:$0xff]  ;;  %798 = vmatpush2.msra.mxu1 %v332_v27  ;;  %728 = vmatprep.subr.mxu0 %v201_v28 }
  0x7e   :  { %v197_v35 = vld [vmem:[#allocation2 + $0x2e8] sm:$0xff]  ;;  %799 = vmatprep.subr.mxu1 %v329_v29  ;;  %v196_v37 = vld [vmem:[#allocation2 + $0x2e0] sm:$0xff]  ;;  %729 = vmatpush2.msra.mxu0 %v200_v33 }
  0x7f   :  { %v325_v36 = vld [vmem:[#allocation2 + $0x6e8] sm:$0xff]  ;;  %v324_v38 = vld [vmem:[#allocation2 + $0x6e0] sm:$0xff]  ;;  %800 = vmatpush2.msra.mxu1 %v328_v34  ;;  %730 = vmatprep.subr.mxu0 %v197_v35 }
  0x80   :  { %v193_v39 = vld [vmem:[#allocation2 + $0x2c8] sm:$0xff]  ;;  %801 = vmatprep.subr.mxu1 %v325_v36  ;;  %v192_v43 = vld [vmem:[#allocation2 + $0x2c0] sm:$0xff]  ;;  %731 = vmatpush2.msra.mxu0 %v196_v37 }
  0x81   :  { %v321_v40 = vld [vmem:[#allocation2 + $0x6c8] sm:$0xff]  ;;  %v320_v44 = vld [vmem:[#allocation2 + $0x6c0] sm:$0xff]  ;;  %802 = vmatpush2.msra.mxu1 %v324_v38  ;;  %732 = vmatprep.subr.mxu0 %v193_v39 }
  0x82   :  { %v189_v45 = vld [vmem:[#allocation2 + $0x2a8] sm:$0xff]  ;;  %803 = vmatprep.subr.mxu1 %v321_v40  ;;  %v188_v47 = vld [vmem:[#allocation2 + $0x2a0] sm:$0xff]  ;;  %733 = vmatpush2.msra.mxu0 %v192_v43 }
  0x83   :  { %v317_v46 = vld [vmem:[#allocation2 + $0x6a8] sm:$0xff]  ;;  %v316_v48 = vld [vmem:[#allocation2 + $0x6a0] sm:$0xff]  ;;  %804 = vmatpush2.msra.mxu1 %v320_v44  ;;  %734 = vmatprep.subr.mxu0 %v189_v45 }
  0x84   :  { %v102_v49 = vld [vmem:[%s2005_s0] sm:$0xff]  ;;  %v185_v50 = vld [vmem:[#allocation2 + $0x288] sm:$0xff]  ;;  %805 = vmatprep.subr.mxu1 %v317_v46  ;;  %735 = vmatpush2.msra.mxu0 %v188_v47 }
  0x85   :  { %v313_v51 = vld [vmem:[#allocation2 + $0x688] sm:$0xff]  ;;  %v184_v53 = vld [vmem:[#allocation2 + $0x280] sm:$0xff]  ;;  %806 = vmatpush2.msra.mxu1 %v316_v48  ;;  %v640_v57 = vcombine.high %v102_v49, %v102_v49  ;;  %736 = vmatprep.subr.mxu0 %v185_v50  ;;  %v1937_v62 = vrot.slane %v102_v49, %v1934_v52 }
  0x86   :  { %v312_v54 = vld [vmem:[#allocation2 + $0x680] sm:$0xff]  ;;  %v181_v55 = vld [vmem:[#allocation2 + $0x268] sm:$0xff]  ;;  %807 = vmatprep.subr.mxu1 %v313_v51  ;;  %737 = vmatpush2.msra.mxu0 %v184_v53 }
  0x87   :  { %v309_v56 = vld [vmem:[#allocation2 + $0x668] sm:$0xff]  ;;  %v180_v58 = vld [vmem:[#allocation2 + $0x260] sm:$0xff]  ;;  %808 = vmatpush2.msra.mxu1 %v312_v54  ;;  %738 = vmatprep.subr.mxu0 %v181_v55  ;;  %v1940_v3 = vrot.slane %v640_v57, %v1934_v52  ;;  %v1944_v8 = vcombine.high %v1937_v62, %v1937_v62 }
  0x88   :  { %v308_v59 = vld [vmem:[#allocation2 + $0x660] sm:$0xff]  ;;  %v177_v60 = vld [vmem:[#allocation2 + $0x248] sm:$0xff]  ;;  %809 = vmatprep.subr.mxu1 %v309_v56  ;;  %739 = vmatpush2.msra.mxu0 %v180_v58 }
  0x89   :  { %v305_v61 = vld [vmem:[#allocation2 + $0x648] sm:$0xff]  ;;  %v176_v63 = vld [vmem:[#allocation2 + $0x240] sm:$0xff]  ;;  %810 = vmatpush2.msra.mxu1 %v308_v59  ;;  %740 = vmatprep.subr.mxu0 %v177_v60  ;;  %v1948_v11 = vcombine.high %v1940_v3, %v1940_v3 }
  0x8a   :  { %v304_v0 = vld [vmem:[#allocation2 + $0x640] sm:$0xff]  ;;  %v173_v1 = vld [vmem:[#allocation2 + $0x228] sm:$0xff]  ;;  %811 = vmatprep.subr.mxu1 %v305_v61  ;;  %741 = vmatpush2.msra.mxu0 %v176_v63 }
  0x8b   :  { %v301_v2 = vld [vmem:[#allocation2 + $0x628] sm:$0xff]  ;;  %v172_v4 = vld [vmem:[#allocation2 + $0x220] sm:$0xff]  ;;  %812 = vmatpush2.msra.mxu1 %v304_v0  ;;  %742 = vmatprep.subr.mxu0 %v173_v1 }
  0x8c   :  { %v300_v5 = vld [vmem:[#allocation2 + $0x620] sm:$0xff]  ;;  %v169_v6 = vld [vmem:[#allocation2 + $0x208] sm:$0xff]  ;;  %813 = vmatprep.subr.mxu1 %v301_v2  ;;  %743 = vmatpush2.msra.mxu0 %v172_v4 }
  0x8d   :  { %v297_v7 = vld [vmem:[#allocation2 + $0x608] sm:$0xff]  ;;  %v168_v9 = vld [vmem:[#allocation2 + $0x200] sm:$0xff]  ;;  %814 = vmatpush2.msra.mxu1 %v300_v5  ;;  %744 = vmatprep.subr.mxu0 %v169_v6 }
  0x8e   :  { %v296_v10 = vld [vmem:[#allocation2 + $0x600] sm:$0xff]  ;;  %815 = vmatprep.subr.mxu1 %v297_v7  ;;  %v421_v12 = vld [vmem:[#allocation2 + $0x9e8] sm:$0xff]  ;;  %745 = vmatpush2.msra.mxu0 %v168_v9 }
  0x8f   :  { %746 = vmatprep.mubr.f32.mxu0 %v1944_v8  ;;  %v549_v13 = vld [vmem:[#allocation2 + $0xde8] sm:$0xff]  ;;  %816 = vmatpush2.msra.mxu1 %v296_v10  ;;  %v420_v14 = vld [vmem:[#allocation2 + $0x9e0] sm:$0xff] }
  0x90   :  { %747 = vmatmul.mubr.f32.vlgmr.msra.gmra.mxu0 %v1937_v62  ;;  %v548_v15 = vld [vmem:[#allocation2 + $0xde0] sm:$0xff]  ;;  %817 = vmatprep.mubr.f32.mxu1 %v1948_v11  ;;  %v417_v16 = vld [vmem:[#allocation2 + $0x9c8] sm:$0xff] }
  0x91   :  { %824 = vmatprep.subr.mxu0 %v421_v12  ;;  %v545_v17 = vld [vmem:[#allocation2 + $0xdc8] sm:$0xff]  ;;  %895 = vmatprep.subr.mxu1 %v549_v13  ;;  %v416_v18 = vld [vmem:[#allocation2 + $0x9c0] sm:$0xff] }
  0x92   :  { %818 = vmatmul.mubr.f32.vlgmr.msra.gmra.mxu1 %v1940_v3  ;;  %v544_v19 = vld [vmem:[#allocation2 + $0xdc0] sm:$0xff]  ;;  %825 = vmatpush1.msra.mxu0 %v420_v14  ;;  %v413_v20 = vld [vmem:[#allocation2 + $0x9a8] sm:$0xff] }
  0x93   :  { %896 = vmatpush1.msra.mxu1 %v548_v15  ;;  %v541_v21 = vld [vmem:[#allocation2 + $0xda8] sm:$0xff]  ;;  %826 = vmatprep.subr.mxu0 %v417_v16  ;;  %v412_v22 = vld [vmem:[#allocation2 + $0x9a0] sm:$0xff] }
  0x94   :  { %897 = vmatprep.subr.mxu1 %v545_v17  ;;  %v540_v23 = vld [vmem:[#allocation2 + $0xda0] sm:$0xff]  ;;  %827 = vmatpush1.msra.mxu0 %v416_v18  ;;  %v409_v24 = vld [vmem:[#allocation2 + $0x988] sm:$0xff] }
  0x95   :  { %898 = vmatpush1.msra.mxu1 %v544_v19  ;;  %v537_v25 = vld [vmem:[#allocation2 + $0xd88] sm:$0xff]  ;;  %828 = vmatprep.subr.mxu0 %v413_v20  ;;  %v408_v26 = vld [vmem:[#allocation2 + $0x980] sm:$0xff] }
  0x96   :  { %899 = vmatprep.subr.mxu1 %v541_v21  ;;  %v536_v27 = vld [vmem:[#allocation2 + $0xd80] sm:$0xff]  ;;  %829 = vmatpush1.msra.mxu0 %v412_v22  ;;  %v405_v28 = vld [vmem:[#allocation2 + $0x968] sm:$0xff] }
  0x97   :  { %900 = vmatpush1.msra.mxu1 %v540_v23  ;;  %v533_v29 = vld [vmem:[#allocation2 + $0xd68] sm:$0xff]  ;;  %830 = vmatprep.subr.mxu0 %v409_v24  ;;  %v404_v31 = vld [vmem:[#allocation2 + $0x960] sm:$0xff] }
  0x98   :  { %901 = vmatprep.subr.mxu1 %v537_v25  ;;  %v532_v32 = vld [vmem:[#allocation2 + $0xd60] sm:$0xff]  ;;  %831 = vmatpush1.msra.mxu0 %v408_v26  ;;  %v401_v33 = vld [vmem:[#allocation2 + $0x948] sm:$0xff] }
  0x99   :  { %902 = vmatpush1.msra.mxu1 %v536_v27  ;;  %v529_v34 = vld [vmem:[#allocation2 + $0xd48] sm:$0xff]  ;;  %832 = vmatprep.subr.mxu0 %v405_v28  ;;  %v400_v35 = vld [vmem:[#allocation2 + $0x940] sm:$0xff] }
  0x9a   :  { %903 = vmatprep.subr.mxu1 %v533_v29  ;;  %v528_v36 = vld [vmem:[#allocation2 + $0xd40] sm:$0xff]  ;;  %833 = vmatpush1.msra.mxu0 %v404_v31  ;;  %v397_v37 = vld [vmem:[#allocation2 + $0x928] sm:$0xff] }
  0x9b   :  { %904 = vmatpush1.msra.mxu1 %v532_v32  ;;  %v525_v38 = vld [vmem:[#allocation2 + $0xd28] sm:$0xff]  ;;  %834 = vmatprep.subr.mxu0 %v401_v33  ;;  %v396_v39 = vld [vmem:[#allocation2 + $0x920] sm:$0xff] }
  0x9c   :  { %905 = vmatprep.subr.mxu1 %v529_v34  ;;  %v524_v40 = vld [vmem:[#allocation2 + $0xd20] sm:$0xff]  ;;  %835 = vmatpush1.msra.mxu0 %v400_v35  ;;  %v393_v42 = vld [vmem:[#allocation2 + $0x908] sm:$0xff] }
  0x9d   :  { %906 = vmatpush1.msra.mxu1 %v528_v36  ;;  %v521_v43 = vld [vmem:[#allocation2 + $0xd08] sm:$0xff]  ;;  %836 = vmatprep.subr.mxu0 %v397_v37  ;;  %v392_v44 = vld [vmem:[#allocation2 + $0x900] sm:$0xff] }
  0x9e   :  { %907 = vmatprep.subr.mxu1 %v525_v38  ;;  %v520_v45 = vld [vmem:[#allocation2 + $0xd00] sm:$0xff]  ;;  %837 = vmatpush1.msra.mxu0 %v396_v39  ;;  %v389_v46 = vld [vmem:[#allocation2 + $0x8e8] sm:$0xff] }
  0x9f   :  { %908 = vmatpush1.msra.mxu1 %v524_v40  ;;  %v517_v47 = vld [vmem:[#allocation2 + $0xce8] sm:$0xff]  ;;  %838 = vmatprep.subr.mxu0 %v393_v42  ;;  %v388_v48 = vld [vmem:[#allocation2 + $0x8e0] sm:$0xff] }
  0xa0   :  { %909 = vmatprep.subr.mxu1 %v521_v43  ;;  %v516_v49 = vld [vmem:[#allocation2 + $0xce0] sm:$0xff]  ;;  %839 = vmatpush1.msra.mxu0 %v392_v44  ;;  %v385_v50 = vld [vmem:[#allocation2 + $0x8c8] sm:$0xff] }
  0xa1   :  { %910 = vmatpush1.msra.mxu1 %v520_v45  ;;  %v513_v51 = vld [vmem:[#allocation2 + $0xcc8] sm:$0xff]  ;;  %840 = vmatprep.subr.mxu0 %v389_v46  ;;  %v384_v53 = vld [vmem:[#allocation2 + $0x8c0] sm:$0xff] }
  0xa2   :  { %911 = vmatprep.subr.mxu1 %v517_v47  ;;  %v512_v54 = vld [vmem:[#allocation2 + $0xcc0] sm:$0xff]  ;;  %841 = vmatpush1.msra.mxu0 %v388_v48  ;;  %v381_v55 = vld [vmem:[#allocation2 + $0x8a8] sm:$0xff] }
  0xa3   :  { %912 = vmatpush1.msra.mxu1 %v516_v49  ;;  %v509_v56 = vld [vmem:[#allocation2 + $0xca8] sm:$0xff]  ;;  %842 = vmatprep.subr.mxu0 %v385_v50  ;;  %v380_v57 = vld [vmem:[#allocation2 + $0x8a0] sm:$0xff] }
  0xa4   :  { %913 = vmatprep.subr.mxu1 %v513_v51  ;;  %v508_v58 = vld [vmem:[#allocation2 + $0xca0] sm:$0xff]  ;;  %843 = vmatpush1.msra.mxu0 %v384_v53  ;;  %v377_v59 = vld [vmem:[#allocation2 + $0x888] sm:$0xff] }
  0xa5   :  { %914 = vmatpush1.msra.mxu1 %v512_v54  ;;  %v505_v60 = vld [vmem:[#allocation2 + $0xc88] sm:$0xff]  ;;  %844 = vmatprep.subr.mxu0 %v381_v55  ;;  %v376_v61 = vld [vmem:[#allocation2 + $0x880] sm:$0xff] }
  0xa6   :  { %915 = vmatprep.subr.mxu1 %v509_v56  ;;  %v504_v63 = vld [vmem:[#allocation2 + $0xc80] sm:$0xff]  ;;  %845 = vmatpush1.msra.mxu0 %v380_v57  ;;  %v373_v0 = vld [vmem:[#allocation2 + $0x868] sm:$0xff] }
  0xa7   :  { %916 = vmatpush1.msra.mxu1 %v508_v58  ;;  %v501_v1 = vld [vmem:[#allocation2 + $0xc68] sm:$0xff]  ;;  %846 = vmatprep.subr.mxu0 %v377_v59  ;;  %v372_v2 = vld [vmem:[#allocation2 + $0x860] sm:$0xff] }
  0xa8   :  { %917 = vmatprep.subr.mxu1 %v505_v60  ;;  %v500_v4 = vld [vmem:[#allocation2 + $0xc60] sm:$0xff]  ;;  %847 = vmatpush1.msra.mxu0 %v376_v61  ;;  %v369_v5 = vld [vmem:[#allocation2 + $0x848] sm:$0xff] }
  0xa9   :  { %918 = vmatpush1.msra.mxu1 %v504_v63  ;;  %v497_v6 = vld [vmem:[#allocation2 + $0xc48] sm:$0xff]  ;;  %848 = vmatprep.subr.mxu0 %v373_v0  ;;  %v368_v7 = vld [vmem:[#allocation2 + $0x840] sm:$0xff] }
  0xaa   :  { %919 = vmatprep.subr.mxu1 %v501_v1  ;;  %v496_v9 = vld [vmem:[#allocation2 + $0xc40] sm:$0xff]  ;;  %849 = vmatpush1.msra.mxu0 %v372_v2  ;;  %v365_v10 = vld [vmem:[#allocation2 + $0x828] sm:$0xff] }
  0xab   :  { %920 = vmatpush1.msra.mxu1 %v500_v4  ;;  %v493_v12 = vld [vmem:[#allocation2 + $0xc28] sm:$0xff]  ;;  %850 = vmatprep.subr.mxu0 %v369_v5  ;;  %v364_v13 = vld [vmem:[#allocation2 + $0x820] sm:$0xff] }
  0xac   :  { %921 = vmatprep.subr.mxu1 %v497_v6  ;;  %v492_v14 = vld [vmem:[#allocation2 + $0xc20] sm:$0xff]  ;;  %851 = vmatpush1.msra.mxu0 %v368_v7  ;;  %v361_v15 = vld [vmem:[#allocation2 + $0x808] sm:$0xff] }
  0xad   :  { %922 = vmatpush1.msra.mxu1 %v496_v9  ;;  %v489_v16 = vld [vmem:[#allocation2 + $0xc08] sm:$0xff]  ;;  %852 = vmatprep.subr.mxu0 %v365_v10  ;;  %v360_v17 = vld [vmem:[#allocation2 + $0x800] sm:$0xff] }
  0xae   :  { %923 = vmatprep.subr.mxu1 %v493_v12  ;;  %v488_v18 = vld [vmem:[#allocation2 + $0xc00] sm:$0xff]  ;;  %853 = vmatpush1.msra.mxu0 %v364_v13  ;;  %v485_v19 = vld [vmem:[#allocation2 + $0xbe8] sm:$0xff] }
  0xaf   :  { %924 = vmatpush1.msra.mxu1 %v492_v14  ;;  %v613_v20 = vld [vmem:[#allocation2 + $0xfe8] sm:$0xff]  ;;  %854 = vmatprep.subr.mxu0 %v361_v15  ;;  %v484_v21 = vld [vmem:[#allocation2 + $0xbe0] sm:$0xff] }
  0xb0   :  { %925 = vmatprep.subr.mxu1 %v489_v16  ;;  %v612_v22 = vld [vmem:[#allocation2 + $0xfe0] sm:$0xff]  ;;  %855 = vmatpush1.msra.mxu0 %v360_v17  ;;  %v481_v23 = vld [vmem:[#allocation2 + $0xbc8] sm:$0xff] }
  0xb1   :  { %926 = vmatpush1.msra.mxu1 %v488_v18  ;;  %v609_v24 = vld [vmem:[#allocation2 + $0xfc8] sm:$0xff]  ;;  %856 = vmatprep.subr.mxu0 %v485_v19  ;;  %v480_v25 = vld [vmem:[#allocation2 + $0xbc0] sm:$0xff] }
  0xb2   :  { %927 = vmatprep.subr.mxu1 %v613_v20  ;;  %v608_v26 = vld [vmem:[#allocation2 + $0xfc0] sm:$0xff]  ;;  %857 = vmatpush2.msra.mxu0 %v484_v21  ;;  %v477_v27 = vld [vmem:[#allocation2 + $0xba8] sm:$0xff] }
  0xb3   :  { %928 = vmatpush2.msra.mxu1 %v612_v22  ;;  %v605_v28 = vld [vmem:[#allocation2 + $0xfa8] sm:$0xff]  ;;  %858 = vmatprep.subr.mxu0 %v481_v23  ;;  %v476_v29 = vld [vmem:[#allocation2 + $0xba0] sm:$0xff] }
  0xb4   :  { %929 = vmatprep.subr.mxu1 %v609_v24  ;;  %v604_v31 = vld [vmem:[#allocation2 + $0xfa0] sm:$0xff]  ;;  %859 = vmatpush2.msra.mxu0 %v480_v25  ;;  %v473_v32 = vld [vmem:[#allocation2 + $0xb88] sm:$0xff] }
  0xb5   :  { %930 = vmatpush2.msra.mxu1 %v608_v26  ;;  %v601_v33 = vld [vmem:[#allocation2 + $0xf88] sm:$0xff]  ;;  %860 = vmatprep.subr.mxu0 %v477_v27  ;;  %v472_v34 = vld [vmem:[#allocation2 + $0xb80] sm:$0xff] }
  0xb6   :  { %931 = vmatprep.subr.mxu1 %v605_v28  ;;  %v600_v35 = vld [vmem:[#allocation2 + $0xf80] sm:$0xff]  ;;  %861 = vmatpush2.msra.mxu0 %v476_v29  ;;  %v469_v36 = vld [vmem:[#allocation2 + $0xb68] sm:$0xff] }
  0xb7   :  { %932 = vmatpush2.msra.mxu1 %v604_v31  ;;  %v597_v37 = vld [vmem:[#allocation2 + $0xf68] sm:$0xff]  ;;  %862 = vmatprep.subr.mxu0 %v473_v32  ;;  %v468_v38 = vld [vmem:[#allocation2 + $0xb60] sm:$0xff]  ;;  %v167_v32 = vld [vmem:[#allocation2 + $0x1f8] sm:$0xff] }
  0xb8   :  { %933 = vmatprep.subr.mxu1 %v601_v33  ;;  %v596_v39 = vld [vmem:[#allocation2 + $0xf60] sm:$0xff]  ;;  %863 = vmatpush2.msra.mxu0 %v472_v34  ;;  %v465_v40 = vld [vmem:[#allocation2 + $0xb48] sm:$0xff]  ;;  %v295_v33 = vld [vmem:[#allocation2 + $0x5f8] sm:$0xff] }
  0xb9   :  { %934 = vmatpush2.msra.mxu1 %v600_v35  ;;  %v593_v42 = vld [vmem:[#allocation2 + $0xf48] sm:$0xff]  ;;  %864 = vmatprep.subr.mxu0 %v469_v36  ;;  %v464_v43 = vld [vmem:[#allocation2 + $0xb40] sm:$0xff]  ;;  %v166_v34 = vld [vmem:[#allocation2 + $0x1f0] sm:$0xff] }
  0xba   :  { %935 = vmatprep.subr.mxu1 %v597_v37  ;;  %v592_v44 = vld [vmem:[#allocation2 + $0xf40] sm:$0xff]  ;;  %865 = vmatpush2.msra.mxu0 %v468_v38  ;;  %v461_v45 = vld [vmem:[#allocation2 + $0xb28] sm:$0xff]  ;;  %v294_v35 = vld [vmem:[#allocation2 + $0x5f0] sm:$0xff] }
  0xbb   :  { %936 = vmatpush2.msra.mxu1 %v596_v39  ;;  %v589_v46 = vld [vmem:[#allocation2 + $0xf28] sm:$0xff]  ;;  %866 = vmatprep.subr.mxu0 %v465_v40  ;;  %v460_v47 = vld [vmem:[#allocation2 + $0xb20] sm:$0xff]  ;;  %v163_v36 = vld [vmem:[#allocation2 + $0x1d8] sm:$0xff] }
  0xbc   :  { %937 = vmatprep.subr.mxu1 %v593_v42  ;;  %v588_v48 = vld [vmem:[#allocation2 + $0xf20] sm:$0xff]  ;;  %867 = vmatpush2.msra.mxu0 %v464_v43  ;;  %v457_v49 = vld [vmem:[#allocation2 + $0xb08] sm:$0xff]  ;;  %v291_v37 = vld [vmem:[#allocation2 + $0x5d8] sm:$0xff] }
  0xbd   :  { %938 = vmatpush2.msra.mxu1 %v592_v44  ;;  %v585_v50 = vld [vmem:[#allocation2 + $0xf08] sm:$0xff]  ;;  %868 = vmatprep.subr.mxu0 %v461_v45  ;;  %v456_v51 = vld [vmem:[#allocation2 + $0xb00] sm:$0xff]  ;;  %v162_v38 = vld [vmem:[#allocation2 + $0x1d0] sm:$0xff] }
  0xbe   :  { %939 = vmatprep.subr.mxu1 %v589_v46  ;;  %v584_v53 = vld [vmem:[#allocation2 + $0xf00] sm:$0xff]  ;;  %869 = vmatpush2.msra.mxu0 %v460_v47  ;;  %v453_v54 = vld [vmem:[#allocation2 + $0xae8] sm:$0xff]  ;;  %v290_v39 = vld [vmem:[#allocation2 + $0x5d0] sm:$0xff] }
  0xbf   :  { %940 = vmatpush2.msra.mxu1 %v588_v48  ;;  %v581_v55 = vld [vmem:[#allocation2 + $0xee8] sm:$0xff]  ;;  %870 = vmatprep.subr.mxu0 %v457_v49  ;;  %v452_v56 = vld [vmem:[#allocation2 + $0xae0] sm:$0xff]  ;;  %v159_v40 = vld [vmem:[#allocation2 + $0x1b8] sm:$0xff] }
  0xc0   :  { %941 = vmatprep.subr.mxu1 %v585_v50  ;;  %v580_v57 = vld [vmem:[#allocation2 + $0xee0] sm:$0xff]  ;;  %871 = vmatpush2.msra.mxu0 %v456_v51  ;;  %v449_v58 = vld [vmem:[#allocation2 + $0xac8] sm:$0xff]  ;;  %v287_v42 = vld [vmem:[#allocation2 + $0x5b8] sm:$0xff] }
  0xc1   :  { %942 = vmatpush2.msra.mxu1 %v584_v53  ;;  %v577_v59 = vld [vmem:[#allocation2 + $0xec8] sm:$0xff]  ;;  %872 = vmatprep.subr.mxu0 %v453_v54  ;;  %v448_v60 = vld [vmem:[#allocation2 + $0xac0] sm:$0xff]  ;;  %v158_v43 = vld [vmem:[#allocation2 + $0x1b0] sm:$0xff] }
  0xc2   :  { %943 = vmatprep.subr.mxu1 %v581_v55  ;;  %v576_v61 = vld [vmem:[#allocation2 + $0xec0] sm:$0xff]  ;;  %873 = vmatpush2.msra.mxu0 %v452_v56  ;;  %v445_v63 = vld [vmem:[#allocation2 + $0xaa8] sm:$0xff]  ;;  %v286_v44 = vld [vmem:[#allocation2 + $0x5b0] sm:$0xff] }
  0xc3   :  { %944 = vmatpush2.msra.mxu1 %v580_v57  ;;  %v573_v0 = vld [vmem:[#allocation2 + $0xea8] sm:$0xff]  ;;  %874 = vmatprep.subr.mxu0 %v449_v58  ;;  %v444_v1 = vld [vmem:[#allocation2 + $0xaa0] sm:$0xff]  ;;  %v155_v45 = vld [vmem:[#allocation2 + $0x198] sm:$0xff] }
  0xc4   :  { %945 = vmatprep.subr.mxu1 %v577_v59  ;;  %v572_v2 = vld [vmem:[#allocation2 + $0xea0] sm:$0xff]  ;;  %v103_v4 = vld [vmem:[%s2005_s0 + $0x8] sm:$0xff]  ;;  %875 = vmatpush2.msra.mxu0 %v448_v60  ;;  %v283_v46 = vld [vmem:[#allocation2 + $0x598] sm:$0xff] }
  0xc5   :  { %946 = vmatpush2.msra.mxu1 %v576_v61  ;;  %v441_v5 = vld [vmem:[#allocation2 + $0xa88] sm:$0xff]  ;;  %876 = vmatprep.subr.mxu0 %v445_v63  ;;  %v440_v7 = vld [vmem:[#allocation2 + $0xa80] sm:$0xff]  ;;  %v657_v13 = vcombine.high %v103_v4, %v103_v4  ;;  %v1958_v18 = vrot.slane %v103_v4, %v1934_v52  ;;  %v154_v47 = vld [vmem:[#allocation2 + $0x190] sm:$0xff] }
  0xc6   :  { %v569_v6 = vld [vmem:[#allocation2 + $0xe88] sm:$0xff]  ;;  %947 = vmatprep.subr.mxu1 %v573_v0  ;;  %v568_v9 = vld [vmem:[#allocation2 + $0xe80] sm:$0xff]  ;;  %877 = vmatpush2.msra.mxu0 %v444_v1  ;;  %v282_v48 = vld [vmem:[#allocation2 + $0x590] sm:$0xff] }
  0xc7   :  { %948 = vmatpush2.msra.mxu1 %v572_v2  ;;  %v437_v10 = vld [vmem:[#allocation2 + $0xa68] sm:$0xff]  ;;  %878 = vmatprep.subr.mxu0 %v441_v5  ;;  %v436_v14 = vld [vmem:[#allocation2 + $0xa60] sm:$0xff]  ;;  %v1961_v23 = vrot.slane %v657_v13, %v1934_v52  ;;  %v1965_v28 = vcombine.high %v1958_v18, %v1958_v18  ;;  %v151_v49 = vld [vmem:[#allocation2 + $0x178] sm:$0xff] }
  0xc8   :  { %v565_v12 = vld [vmem:[#allocation2 + $0xe68] sm:$0xff]  ;;  %949 = vmatprep.subr.mxu1 %v569_v6  ;;  %v564_v15 = vld [vmem:[#allocation2 + $0xe60] sm:$0xff]  ;;  %879 = vmatpush2.msra.mxu0 %v440_v7  ;;  %v279_v50 = vld [vmem:[#allocation2 + $0x578] sm:$0xff] }
  0xc9   :  { %950 = vmatpush2.msra.mxu1 %v568_v9  ;;  %v433_v16 = vld [vmem:[#allocation2 + $0xa48] sm:$0xff]  ;;  %880 = vmatprep.subr.mxu0 %v437_v10  ;;  %v432_v19 = vld [vmem:[#allocation2 + $0xa40] sm:$0xff]  ;;  %v1969_v52 = vcombine.high %v1961_v23, %v1961_v23  ;;  %v150_v51 = vld [vmem:[#allocation2 + $0x170] sm:$0xff] }
  0xca   :  { %v561_v17 = vld [vmem:[#allocation2 + $0xe48] sm:$0xff]  ;;  %951 = vmatprep.subr.mxu1 %v565_v12  ;;  %v560_v20 = vld [vmem:[#allocation2 + $0xe40] sm:$0xff]  ;;  %881 = vmatpush2.msra.mxu0 %v436_v14  ;;  %v278_v53 = vld [vmem:[#allocation2 + $0x570] sm:$0xff] }
  0xcb   :  { %952 = vmatpush2.msra.mxu1 %v564_v15  ;;  %v429_v21 = vld [vmem:[#allocation2 + $0xa28] sm:$0xff]  ;;  %882 = vmatprep.subr.mxu0 %v433_v16  ;;  %v428_v24 = vld [vmem:[#allocation2 + $0xa20] sm:$0xff]  ;;  %v147_v54 = vld [vmem:[#allocation2 + $0x158] sm:$0xff] }
  0xcc   :  { %v557_v22 = vld [vmem:[#allocation2 + $0xe28] sm:$0xff]  ;;  %953 = vmatprep.subr.mxu1 %v561_v17  ;;  %v556_v25 = vld [vmem:[#allocation2 + $0xe20] sm:$0xff]  ;;  %883 = vmatpush2.msra.mxu0 %v432_v19  ;;  %v275_v55 = vld [vmem:[#allocation2 + $0x558] sm:$0xff] }
  0xcd   :  { %954 = vmatpush2.msra.mxu1 %v560_v20  ;;  %v425_v26 = vld [vmem:[#allocation2 + $0xa08] sm:$0xff]  ;;  %884 = vmatprep.subr.mxu0 %v429_v21  ;;  %v424_v29 = vld [vmem:[#allocation2 + $0xa00] sm:$0xff]  ;;  %v146_v56 = vld [vmem:[#allocation2 + $0x150] sm:$0xff] }
  0xce   :  { %v553_v27 = vld [vmem:[#allocation2 + $0xe08] sm:$0xff]  ;;  %955 = vmatprep.subr.mxu1 %v557_v22  ;;  %885 = vmatpush2.msra.mxu0 %v428_v24  ;;  %v552_v31 = vld [vmem:[#allocation2 + $0xe00] sm:$0xff]  ;;  %v274_v57 = vld [vmem:[#allocation2 + $0x550] sm:$0xff] }
  0xcf   :  { %956 = vmatpush2.msra.mxu1 %v556_v25  ;;  %886 = vmatprep.subr.mxu0 %v425_v26  ;;  %v143_v58 = vld [vmem:[#allocation2 + $0x138] sm:$0xff]  ;;  %v142_v60 = vld [vmem:[#allocation2 + $0x130] sm:$0xff] }
  0xd0   :  { %957 = vmatprep.subr.mxu1 %v553_v27  ;;  %887 = vmatpush2.msra.mxu0 %v424_v29  ;;  %v271_v59 = vld [vmem:[#allocation2 + $0x538] sm:$0xff]  ;;  %v270_v61 = vld [vmem:[#allocation2 + $0x530] sm:$0xff] }
  0xd1   :  { %888 = vmatprep.mubr.f32.mxu0 %v1965_v28  ;;  %958 = vmatpush2.msra.mxu1 %v552_v31  ;;  %v139_v63 = vld [vmem:[#allocation2 + $0x118] sm:$0xff]  ;;  %v138_v1 = vld [vmem:[#allocation2 + $0x110] sm:$0xff] }
  0xd2   :  { %889 = vmatmul.mubr.f32.vlgmr.msra.gmra.mxu0 %v1958_v18  ;;  %959 = vmatprep.mubr.f32.mxu1 %v1969_v52  ;;  %v267_v0 = vld [vmem:[#allocation2 + $0x518] sm:$0xff]  ;;  %v266_v2 = vld [vmem:[#allocation2 + $0x510] sm:$0xff] }
  0xd3   :  { %966 = vmatprep.subr.mxu0 %v167_v32  ;;  %1037 = vmatprep.subr.mxu1 %v295_v33  ;;  %v135_v4 = vld [vmem:[#allocation2 + $0xf8] sm:$0xff]  ;;  %v134_v6 = vld [vmem:[#allocation2 + $0xf0] sm:$0xff] }
  0xd4   :  { %960 = vmatmul.mubr.f32.vlgmr.msra.gmra.mxu1 %v1961_v23  ;;  %967 = vmatpush1.msra.mxu0 %v166_v34  ;;  %v263_v5 = vld [vmem:[#allocation2 + $0x4f8] sm:$0xff]  ;;  %v262_v7 = vld [vmem:[#allocation2 + $0x4f0] sm:$0xff] }
  0xd5   :  { %1038 = vmatpush1.msra.mxu1 %v294_v35  ;;  %968 = vmatprep.subr.mxu0 %v163_v36  ;;  %v131_v9 = vld [vmem:[#allocation2 + $0xd8] sm:$0xff]  ;;  %v130_v12 = vld [vmem:[#allocation2 + $0xd0] sm:$0xff] }
  0xd6   :  { %1039 = vmatprep.subr.mxu1 %v291_v37  ;;  %969 = vmatpush1.msra.mxu0 %v162_v38  ;;  %v259_v10 = vld [vmem:[#allocation2 + $0x4d8] sm:$0xff]  ;;  %v258_v13 = vld [vmem:[#allocation2 + $0x4d0] sm:$0xff] }
  0xd7   :  { %1040 = vmatpush1.msra.mxu1 %v290_v39  ;;  %970 = vmatprep.subr.mxu0 %v159_v40  ;;  %v127_v14 = vld [vmem:[#allocation2 + $0xb8] sm:$0xff]  ;;  %v126_v16 = vld [vmem:[#allocation2 + $0xb0] sm:$0xff] }
  0xd8   :  { %1041 = vmatprep.subr.mxu1 %v287_v42  ;;  %971 = vmatpush1.msra.mxu0 %v158_v43  ;;  %v255_v15 = vld [vmem:[#allocation2 + $0x4b8] sm:$0xff]  ;;  %v254_v17 = vld [vmem:[#allocation2 + $0x4b0] sm:$0xff] }
  0xd9   :  { %1042 = vmatpush1.msra.mxu1 %v286_v44  ;;  %972 = vmatprep.subr.mxu0 %v155_v45  ;;  %v123_v19 = vld [vmem:[#allocation2 + $0x98] sm:$0xff]  ;;  %v122_v21 = vld [vmem:[#allocation2 + $0x90] sm:$0xff] }
  0xda   :  { %1043 = vmatprep.subr.mxu1 %v283_v46  ;;  %973 = vmatpush1.msra.mxu0 %v154_v47  ;;  %v251_v20 = vld [vmem:[#allocation2 + $0x498] sm:$0xff]  ;;  %v250_v22 = vld [vmem:[#allocation2 + $0x490] sm:$0xff] }
  0xdb   :  { %1044 = vmatpush1.msra.mxu1 %v282_v48  ;;  %974 = vmatprep.subr.mxu0 %v151_v49  ;;  %v119_v24 = vld [vmem:[#allocation2 + $0x78] sm:$0xff]  ;;  %v118_v26 = vld [vmem:[#allocation2 + $0x70] sm:$0xff] }
  0xdc   :  { %1045 = vmatprep.subr.mxu1 %v279_v50  ;;  %975 = vmatpush1.msra.mxu0 %v150_v51  ;;  %v247_v25 = vld [vmem:[#allocation2 + $0x478] sm:$0xff]  ;;  %v246_v27 = vld [vmem:[#allocation2 + $0x470] sm:$0xff] }
  0xdd   :  { %1046 = vmatpush1.msra.mxu1 %v278_v53  ;;  %976 = vmatprep.subr.mxu0 %v147_v54  ;;  %v115_v29 = vld [vmem:[#allocation2 + $0x58] sm:$0xff]  ;;  %v114_v32 = vld [vmem:[#allocation2 + $0x50] sm:$0xff] }
  0xde   :  { %1047 = vmatprep.subr.mxu1 %v275_v55  ;;  %977 = vmatpush1.msra.mxu0 %v146_v56  ;;  %v243_v31 = vld [vmem:[#allocation2 + $0x458] sm:$0xff]  ;;  %v242_v33 = vld [vmem:[#allocation2 + $0x450] sm:$0xff] }
  0xdf   :  { %1048 = vmatpush1.msra.mxu1 %v274_v57  ;;  %978 = vmatprep.subr.mxu0 %v143_v58  ;;  %v111_v34 = vld [vmem:[#allocation2 + $0x38] sm:$0xff]  ;;  %v110_v36 = vld [vmem:[#allocation2 + $0x30] sm:$0xff] }
  0xe0   :  { %1049 = vmatprep.subr.mxu1 %v271_v59  ;;  %979 = vmatpush1.msra.mxu0 %v142_v60  ;;  %v239_v35 = vld [vmem:[#allocation2 + $0x438] sm:$0xff]  ;;  %v238_v37 = vld [vmem:[#allocation2 + $0x430] sm:$0xff] }
  0xe1   :  { %1050 = vmatpush1.msra.mxu1 %v270_v61  ;;  %980 = vmatprep.subr.mxu0 %v139_v63  ;;  %v107_v38 = vld [vmem:[#allocation2 + $0x18] sm:$0xff]  ;;  %v106_v40 = vld [vmem:[#allocation2 + $0x10] sm:$0xff] }
  0xe2   :  { %1051 = vmatprep.subr.mxu1 %v267_v0  ;;  %981 = vmatpush1.msra.mxu0 %v138_v1  ;;  %v235_v39 = vld [vmem:[#allocation2 + $0x418] sm:$0xff]  ;;  %v234_v42 = vld [vmem:[#allocation2 + $0x410] sm:$0xff] }
  0xe3   :  { %1052 = vmatpush1.msra.mxu1 %v266_v2  ;;  %982 = vmatprep.subr.mxu0 %v135_v4  ;;  %v231_v43 = vld [vmem:[#allocation2 + $0x3f8] sm:$0xff]  ;;  %v230_v45 = vld [vmem:[#allocation2 + $0x3f0] sm:$0xff] }
  0xe4   :  { %1053 = vmatprep.subr.mxu1 %v263_v5  ;;  %983 = vmatpush1.msra.mxu0 %v134_v6  ;;  %v359_v44 = vld [vmem:[#allocation2 + $0x7f8] sm:$0xff]  ;;  %v358_v46 = vld [vmem:[#allocation2 + $0x7f0] sm:$0xff] }
  0xe5   :  { %1054 = vmatpush1.msra.mxu1 %v262_v7  ;;  %984 = vmatprep.subr.mxu0 %v131_v9  ;;  %v227_v47 = vld [vmem:[#allocation2 + $0x3d8] sm:$0xff]  ;;  %v226_v49 = vld [vmem:[#allocation2 + $0x3d0] sm:$0xff] }
  0xe6   :  { %1055 = vmatprep.subr.mxu1 %v259_v10  ;;  %985 = vmatpush1.msra.mxu0 %v130_v12  ;;  %v355_v48 = vld [vmem:[#allocation2 + $0x7d8] sm:$0xff]  ;;  %v354_v50 = vld [vmem:[#allocation2 + $0x7d0] sm:$0xff] }
  0xe7   :  { %1056 = vmatpush1.msra.mxu1 %v258_v13  ;;  %986 = vmatprep.subr.mxu0 %v127_v14  ;;  %v223_v51 = vld [vmem:[#allocation2 + $0x3b8] sm:$0xff]  ;;  %v222_v54 = vld [vmem:[#allocation2 + $0x3b0] sm:$0xff] }
  0xe8   :  { %1057 = vmatprep.subr.mxu1 %v255_v15  ;;  %987 = vmatpush1.msra.mxu0 %v126_v16  ;;  %v351_v53 = vld [vmem:[#allocation2 + $0x7b8] sm:$0xff]  ;;  %v350_v55 = vld [vmem:[#allocation2 + $0x7b0] sm:$0xff] }
  0xe9   :  { %1058 = vmatpush1.msra.mxu1 %v254_v17  ;;  %988 = vmatprep.subr.mxu0 %v123_v19  ;;  %v219_v56 = vld [vmem:[#allocation2 + $0x398] sm:$0xff]  ;;  %v218_v58 = vld [vmem:[#allocation2 + $0x390] sm:$0xff] }
  0xea   :  { %1059 = vmatprep.subr.mxu1 %v251_v20  ;;  %989 = vmatpush1.msra.mxu0 %v122_v21  ;;  %v347_v57 = vld [vmem:[#allocation2 + $0x798] sm:$0xff]  ;;  %v346_v59 = vld [vmem:[#allocation2 + $0x790] sm:$0xff] }
  0xeb   :  { %1060 = vmatpush1.msra.mxu1 %v250_v22  ;;  %990 = vmatprep.subr.mxu0 %v119_v24  ;;  %v215_v60 = vld [vmem:[#allocation2 + $0x378] sm:$0xff]  ;;  %v214_v63 = vld [vmem:[#allocation2 + $0x370] sm:$0xff] }
  0xec   :  { %1061 = vmatprep.subr.mxu1 %v247_v25  ;;  %991 = vmatpush1.msra.mxu0 %v118_v26  ;;  %v343_v61 = vld [vmem:[#allocation2 + $0x778] sm:$0xff]  ;;  %v342_v0 = vld [vmem:[#allocation2 + $0x770] sm:$0xff] }
  0xed   :  { %1062 = vmatpush1.msra.mxu1 %v246_v27  ;;  %992 = vmatprep.subr.mxu0 %v115_v29  ;;  %v211_v1 = vld [vmem:[#allocation2 + $0x358] sm:$0xff]  ;;  %v210_v4 = vld [vmem:[#allocation2 + $0x350] sm:$0xff] }
  0xee   :  { %1063 = vmatprep.subr.mxu1 %v243_v31  ;;  %993 = vmatpush1.msra.mxu0 %v114_v32  ;;  %v339_v2 = vld [vmem:[#allocation2 + $0x758] sm:$0xff]  ;;  %v338_v5 = vld [vmem:[#allocation2 + $0x750] sm:$0xff] }
  0xef   :  { %1064 = vmatpush1.msra.mxu1 %v242_v33  ;;  %994 = vmatprep.subr.mxu0 %v111_v34  ;;  %v207_v6 = vld [vmem:[#allocation2 + $0x338] sm:$0xff]  ;;  %v206_v9 = vld [vmem:[#allocation2 + $0x330] sm:$0xff] }
  0xf0   :  { %1065 = vmatprep.subr.mxu1 %v239_v35  ;;  %995 = vmatpush1.msra.mxu0 %v110_v36  ;;  %v335_v7 = vld [vmem:[#allocation2 + $0x738] sm:$0xff]  ;;  %v334_v10 = vld [vmem:[#allocation2 + $0x730] sm:$0xff] }
  0xf1   :  { %1066 = vmatpush1.msra.mxu1 %v238_v37  ;;  %996 = vmatprep.subr.mxu0 %v107_v38  ;;  %v203_v12 = vld [vmem:[#allocation2 + $0x318] sm:$0xff]  ;;  %v202_v14 = vld [vmem:[#allocation2 + $0x310] sm:$0xff] }
  0xf2   :  { %1067 = vmatprep.subr.mxu1 %v235_v39  ;;  %997 = vmatpush1.msra.mxu0 %v106_v40  ;;  %v331_v13 = vld [vmem:[#allocation2 + $0x718] sm:$0xff]  ;;  %v330_v15 = vld [vmem:[#allocation2 + $0x710] sm:$0xff] }
  0xf3   :  { %1068 = vmatpush1.msra.mxu1 %v234_v42  ;;  %998 = vmatprep.subr.mxu0 %v231_v43  ;;  %v199_v16 = vld [vmem:[#allocation2 + $0x2f8] sm:$0xff]  ;;  %v198_v19 = vld [vmem:[#allocation2 + $0x2f0] sm:$0xff] }
  0xf4   :  { %1069 = vmatprep.subr.mxu1 %v359_v44  ;;  %999 = vmatpush2.msra.mxu0 %v230_v45  ;;  %v327_v17 = vld [vmem:[#allocation2 + $0x6f8] sm:$0xff]  ;;  %v326_v20 = vld [vmem:[#allocation2 + $0x6f0] sm:$0xff] }
  0xf5   :  { %1070 = vmatpush2.msra.mxu1 %v358_v46  ;;  %1000 = vmatprep.subr.mxu0 %v227_v47  ;;  %v195_v21 = vld [vmem:[#allocation2 + $0x2d8] sm:$0xff]  ;;  %v194_v24 = vld [vmem:[#allocation2 + $0x2d0] sm:$0xff] }
  0xf6   :  { %1071 = vmatprep.subr.mxu1 %v355_v48  ;;  %1001 = vmatpush2.msra.mxu0 %v226_v49  ;;  %v323_v22 = vld [vmem:[#allocation2 + $0x6d8] sm:$0xff]  ;;  %v322_v25 = vld [vmem:[#allocation2 + $0x6d0] sm:$0xff] }
  0xf7   :  { %1072 = vmatpush2.msra.mxu1 %v354_v50  ;;  %1002 = vmatprep.subr.mxu0 %v223_v51  ;;  %v191_v26 = vld [vmem:[#allocation2 + $0x2b8] sm:$0xff]  ;;  %v190_v29 = vld [vmem:[#allocation2 + $0x2b0] sm:$0xff] }
  0xf8   :  { %1073 = vmatprep.subr.mxu1 %v351_v53  ;;  %1003 = vmatpush2.msra.mxu0 %v222_v54  ;;  %v319_v27 = vld [vmem:[#allocation2 + $0x6b8] sm:$0xff]  ;;  %v318_v31 = vld [vmem:[#allocation2 + $0x6b0] sm:$0xff] }
  0xf9   :  { %1074 = vmatpush2.msra.mxu1 %v350_v55  ;;  %1004 = vmatprep.subr.mxu0 %v219_v56  ;;  %v187_v32 = vld [vmem:[#allocation2 + $0x298] sm:$0xff]  ;;  %v186_v34 = vld [vmem:[#allocation2 + $0x290] sm:$0xff] }
  0xfa   :  { %1075 = vmatprep.subr.mxu1 %v347_v57  ;;  %1005 = vmatpush2.msra.mxu0 %v218_v58  ;;  %v315_v33 = vld [vmem:[#allocation2 + $0x698] sm:$0xff]  ;;  %v314_v35 = vld [vmem:[#allocation2 + $0x690] sm:$0xff] }
  0xfb   :  { %1076 = vmatpush2.msra.mxu1 %v346_v59  ;;  %1006 = vmatprep.subr.mxu0 %v215_v60  ;;  %v183_v36 = vld [vmem:[#allocation2 + $0x278] sm:$0xff]  ;;  %v182_v38 = vld [vmem:[#allocation2 + $0x270] sm:$0xff] }
  0xfc   :  { %1077 = vmatprep.subr.mxu1 %v343_v61  ;;  %1007 = vmatpush2.msra.mxu0 %v214_v63  ;;  %v311_v37 = vld [vmem:[#allocation2 + $0x678] sm:$0xff]  ;;  %v310_v39 = vld [vmem:[#allocation2 + $0x670] sm:$0xff] }
  0xfd   :  { %1078 = vmatpush2.msra.mxu1 %v342_v0  ;;  %1008 = vmatprep.subr.mxu0 %v211_v1  ;;  %v179_v40 = vld [vmem:[#allocation2 + $0x258] sm:$0xff]  ;;  %v178_v43 = vld [vmem:[#allocation2 + $0x250] sm:$0xff] }
  0xfe   :  { %1079 = vmatprep.subr.mxu1 %v339_v2  ;;  %1009 = vmatpush2.msra.mxu0 %v210_v4  ;;  %v307_v42 = vld [vmem:[#allocation2 + $0x658] sm:$0xff]  ;;  %v306_v44 = vld [vmem:[#allocation2 + $0x650] sm:$0xff] }
  0xff   :  { %1080 = vmatpush2.msra.mxu1 %v338_v5  ;;  %1010 = vmatprep.subr.mxu0 %v207_v6  ;;  %v175_v45 = vld [vmem:[#allocation2 + $0x238] sm:$0xff]  ;;  %v174_v47 = vld [vmem:[#allocation2 + $0x230] sm:$0xff] }
 0x100   :  { %1081 = vmatprep.subr.mxu1 %v335_v7  ;;  %1011 = vmatpush2.msra.mxu0 %v206_v9  ;;  %v303_v46 = vld [vmem:[#allocation2 + $0x638] sm:$0xff]  ;;  %v302_v48 = vld [vmem:[#allocation2 + $0x630] sm:$0xff] }
 0x101   :  { %1082 = vmatpush2.msra.mxu1 %v334_v10  ;;  %1012 = vmatprep.subr.mxu0 %v203_v12  ;;  %v171_v49 = vld [vmem:[#allocation2 + $0x218] sm:$0xff]  ;;  %v170_v51 = vld [vmem:[#allocation2 + $0x210] sm:$0xff] }
 0x102   :  { %1083 = vmatprep.subr.mxu1 %v331_v13  ;;  %1013 = vmatpush2.msra.mxu0 %v202_v14  ;;  %v299_v50 = vld [vmem:[#allocation2 + $0x618] sm:$0xff]  ;;  %v298_v53 = vld [vmem:[#allocation2 + $0x610] sm:$0xff] }
 0x103   :  { %1084 = vmatpush2.msra.mxu1 %v330_v15  ;;  %1014 = vmatprep.subr.mxu0 %v199_v16  ;;  %v423_v54 = vld [vmem:[#allocation2 + $0x9f8] sm:$0xff]  ;;  %v422_v56 = vld [vmem:[#allocation2 + $0x9f0] sm:$0xff] }
 0x104   :  { %1085 = vmatprep.subr.mxu1 %v327_v17  ;;  %1015 = vmatpush2.msra.mxu0 %v198_v19  ;;  %v551_v55 = vld [vmem:[#allocation2 + $0xdf8] sm:$0xff]  ;;  %v550_v57 = vld [vmem:[#allocation2 + $0xdf0] sm:$0xff] }
 0x105   :  { %1086 = vmatpush2.msra.mxu1 %v326_v20  ;;  %1016 = vmatprep.subr.mxu0 %v195_v21  ;;  %v419_v58 = vld [vmem:[#allocation2 + $0x9d8] sm:$0xff]  ;;  %v418_v60 = vld [vmem:[#allocation2 + $0x9d0] sm:$0xff] }
 0x106   :  { %1087 = vmatprep.subr.mxu1 %v323_v22  ;;  %1017 = vmatpush2.msra.mxu0 %v194_v24  ;;  %v547_v59 = vld [vmem:[#allocation2 + $0xdd8] sm:$0xff]  ;;  %v546_v61 = vld [vmem:[#allocation2 + $0xdd0] sm:$0xff] }
 0x107   :  { %1088 = vmatpush2.msra.mxu1 %v322_v25  ;;  %1018 = vmatprep.subr.mxu0 %v191_v26  ;;  %v415_v63 = vld [vmem:[#allocation2 + $0x9b8] sm:$0xff]  ;;  %v414_v0 = vld [vmem:[#allocation2 + $0x9b0] sm:$0xff] }
 0x108   :  { %1089 = vmatprep.subr.mxu1 %v319_v27  ;;  %1019 = vmatpush2.msra.mxu0 %v190_v29  ;;  %v411_v1 = vld [vmem:[#allocation2 + $0x998] sm:$0xff]  ;;  %v410_v2 = vld [vmem:[#allocation2 + $0x990] sm:$0xff] }
 0x109   :  { %1090 = vmatpush2.msra.mxu1 %v318_v31  ;;  %1020 = vmatprep.subr.mxu0 %v187_v32  ;;  %v538_v4 = vld [vmem:[#allocation2 + $0xd90] sm:$0xff]  ;;  %v535_v5 = vld [vmem:[#allocation2 + $0xd78] sm:$0xff] }
 0x10a   :  { %1091 = vmatprep.subr.mxu1 %v315_v33  ;;  %1021 = vmatpush2.msra.mxu0 %v186_v34  ;;  %v406_v6 = vld [vmem:[#allocation2 + $0x970] sm:$0xff]  ;;  %v403_v9 = vld [vmem:[#allocation2 + $0x958] sm:$0xff] }
 0x10b   :  { %1092 = vmatpush2.msra.mxu1 %v314_v35  ;;  %1022 = vmatprep.subr.mxu0 %v183_v36  ;;  %v534_v7 = vld [vmem:[#allocation2 + $0xd70] sm:$0xff]  ;;  %v531_v10 = vld [vmem:[#allocation2 + $0xd58] sm:$0xff] }
 0x10c   :  { %1093 = vmatprep.subr.mxu1 %v311_v37  ;;  %1023 = vmatpush2.msra.mxu0 %v182_v38  ;;  %v402_v12 = vld [vmem:[#allocation2 + $0x950] sm:$0xff]  ;;  %v399_v14 = vld [vmem:[#allocation2 + $0x938] sm:$0xff] }
 0x10d   :  { %1094 = vmatpush2.msra.mxu1 %v310_v39  ;;  %1024 = vmatprep.subr.mxu0 %v179_v40  ;;  %v530_v13 = vld [vmem:[#allocation2 + $0xd50] sm:$0xff]  ;;  %v527_v15 = vld [vmem:[#allocation2 + $0xd38] sm:$0xff] }
 0x10e   :  { %1095 = vmatprep.subr.mxu1 %v307_v42  ;;  %1025 = vmatpush2.msra.mxu0 %v178_v43  ;;  %v398_v16 = vld [vmem:[#allocation2 + $0x930] sm:$0xff]  ;;  %v395_v19 = vld [vmem:[#allocation2 + $0x918] sm:$0xff] }
 0x10f   :  { %1096 = vmatpush2.msra.mxu1 %v306_v44  ;;  %1026 = vmatprep.subr.mxu0 %v175_v45  ;;  %v526_v17 = vld [vmem:[#allocation2 + $0xd30] sm:$0xff]  ;;  %v523_v20 = vld [vmem:[#allocation2 + $0xd18] sm:$0xff] }
 0x110   :  { %1097 = vmatprep.subr.mxu1 %v303_v46  ;;  %1027 = vmatpush2.msra.mxu0 %v174_v47  ;;  %v394_v21 = vld [vmem:[#allocation2 + $0x910] sm:$0xff]  ;;  %v391_v24 = vld [vmem:[#allocation2 + $0x8f8] sm:$0xff] }
 0x111   :  { %1098 = vmatpush2.msra.mxu1 %v302_v48  ;;  %1028 = vmatprep.subr.mxu0 %v171_v49  ;;  %v522_v22 = vld [vmem:[#allocation2 + $0xd10] sm:$0xff]  ;;  %v519_v25 = vld [vmem:[#allocation2 + $0xcf8] sm:$0xff] }
 0x112   :  { %1099 = vmatprep.subr.mxu1 %v299_v50  ;;  %1029 = vmatpush2.msra.mxu0 %v170_v51  ;;  %v390_v26 = vld [vmem:[#allocation2 + $0x8f0] sm:$0xff]  ;;  %v387_v29 = vld [vmem:[#allocation2 + $0x8d8] sm:$0xff] }
 0x113   :  { %1030 = vmatprep.mubr.f32.mxu0 %v1944_v8  ;;  %1100 = vmatpush2.msra.mxu1 %v298_v53  ;;  %v543_v8 = vld [vmem:[#allocation2 + $0xdb8] sm:$0xff]  ;;  %v518_v27 = vld [vmem:[#allocation2 + $0xcf0] sm:$0xff] }
 0x114   :  { %1031 = vmatmul.mubr.f32.vlgmr.msra.gmra.mxu0 %v1937_v62  ;;  %1101 = vmatprep.mubr.f32.mxu1 %v1948_v11  ;;  %v542_v62 = vld [vmem:[#allocation2 + $0xdb0] sm:$0xff]  ;;  %v539_v11 = vld [vmem:[#allocation2 + $0xd98] sm:$0xff] }
 0x115   :  { %1108 = vmatprep.subr.mxu0 %v423_v54  ;;  %1179 = vmatprep.subr.mxu1 %v551_v55  ;;  %v515_v31 = vld [vmem:[#allocation2 + $0xcd8] sm:$0xff]  ;;  %v386_v32 = vld [vmem:[#allocation2 + $0x8d0] sm:$0xff] }
 0x116   :  { %1102 = vmatmul.mubr.f32.vlgmr.msra.gmra.mxu1 %v1940_v3  ;;  %1109 = vmatpush1.msra.mxu0 %v422_v56  ;;  %v407_v3 = vld [vmem:[#allocation2 + $0x978] sm:$0xff]  ;;  %v514_v33 = vld [vmem:[#allocation2 + $0xcd0] sm:$0xff] }
 0x117   :  { %1180 = vmatpush1.msra.mxu1 %v550_v57  ;;  %1110 = vmatprep.subr.mxu0 %v419_v58  ;;  %v383_v34 = vld [vmem:[#allocation2 + $0x8b8] sm:$0xff]  ;;  %v382_v36 = vld [vmem:[#allocation2 + $0x8b0] sm:$0xff] }
 0x118   :  { %1181 = vmatprep.subr.mxu1 %v547_v59  ;;  %1111 = vmatpush1.msra.mxu0 %v418_v60  ;;  %v511_v35 = vld [vmem:[#allocation2 + $0xcb8] sm:$0xff]  ;;  %v510_v37 = vld [vmem:[#allocation2 + $0xcb0] sm:$0xff] }
 0x119   :  { %1182 = vmatpush1.msra.mxu1 %v546_v61  ;;  %1112 = vmatprep.subr.mxu0 %v415_v63  ;;  %v379_v38 = vld [vmem:[#allocation2 + $0x898] sm:$0xff]  ;;  %v378_v40 = vld [vmem:[#allocation2 + $0x890] sm:$0xff] }
 0x11a   :  { %1183 = vmatprep.subr.mxu1 %v543_v8  ;;  %1113 = vmatpush1.msra.mxu0 %v414_v0  ;;  %v507_v39 = vld [vmem:[#allocation2 + $0xc98] sm:$0xff]  ;;  %v506_v42 = vld [vmem:[#allocation2 + $0xc90] sm:$0xff] }
 0x11b   :  { %1184 = vmatpush1.msra.mxu1 %v542_v62  ;;  %1114 = vmatprep.subr.mxu0 %v411_v1  ;;  %v375_v43 = vld [vmem:[#allocation2 + $0x878] sm:$0xff]  ;;  %v374_v45 = vld [vmem:[#allocation2 + $0x870] sm:$0xff] }
 0x11c   :  { %1185 = vmatprep.subr.mxu1 %v539_v11  ;;  %1115 = vmatpush1.msra.mxu0 %v410_v2  ;;  %v503_v44 = vld [vmem:[#allocation2 + $0xc78] sm:$0xff]  ;;  %v502_v46 = vld [vmem:[#allocation2 + $0xc70] sm:$0xff] }
 0x11d   :  { %1186 = vmatpush1.msra.mxu1 %v538_v4  ;;  %1116 = vmatprep.subr.mxu0 %v407_v3  ;;  %v371_v47 = vld [vmem:[#allocation2 + $0x858] sm:$0xff]  ;;  %v370_v49 = vld [vmem:[#allocation2 + $0x850] sm:$0xff] }
 0x11e   :  { %1187 = vmatprep.subr.mxu1 %v535_v5  ;;  %1117 = vmatpush1.msra.mxu0 %v406_v6  ;;  %v499_v48 = vld [vmem:[#allocation2 + $0xc58] sm:$0xff]  ;;  %v498_v50 = vld [vmem:[#allocation2 + $0xc50] sm:$0xff] }
 0x11f   :  { %1188 = vmatpush1.msra.mxu1 %v534_v7  ;;  %1118 = vmatprep.subr.mxu0 %v403_v9  ;;  %v367_v51 = vld [vmem:[#allocation2 + $0x838] sm:$0xff]  ;;  %v366_v54 = vld [vmem:[#allocation2 + $0x830] sm:$0xff] }
 0x120   :  { %1189 = vmatprep.subr.mxu1 %v531_v10  ;;  %1119 = vmatpush1.msra.mxu0 %v402_v12  ;;  %v495_v53 = vld [vmem:[#allocation2 + $0xc38] sm:$0xff]  ;;  %v494_v55 = vld [vmem:[#allocation2 + $0xc30] sm:$0xff] }
 0x121   :  { %1190 = vmatpush1.msra.mxu1 %v530_v13  ;;  %1120 = vmatprep.subr.mxu0 %v399_v14  ;;  %v363_v56 = vld [vmem:[#allocation2 + $0x818] sm:$0xff]  ;;  %v362_v58 = vld [vmem:[#allocation2 + $0x810] sm:$0xff] }
 0x122   :  { %1191 = vmatprep.subr.mxu1 %v527_v15  ;;  %1121 = vmatpush1.msra.mxu0 %v398_v16  ;;  %v491_v57 = vld [vmem:[#allocation2 + $0xc18] sm:$0xff]  ;;  %v490_v59 = vld [vmem:[#allocation2 + $0xc10] sm:$0xff] }
 0x123   :  { %1192 = vmatpush1.msra.mxu1 %v526_v17  ;;  %1122 = vmatprep.subr.mxu0 %v395_v19  ;;  %v487_v60 = vld [vmem:[#allocation2 + $0xbf8] sm:$0xff]  ;;  %v486_v63 = vld [vmem:[#allocation2 + $0xbf0] sm:$0xff] }
 0x124   :  { %1193 = vmatprep.subr.mxu1 %v523_v20  ;;  %1123 = vmatpush1.msra.mxu0 %v394_v21  ;;  %v615_v61 = vld [vmem:[#allocation2 + $0xff8] sm:$0xff]  ;;  %v614_v8 = vld [vmem:[#allocation2 + $0xff0] sm:$0xff] }
 0x125   :  { %1194 = vmatpush1.msra.mxu1 %v522_v22  ;;  %1124 = vmatprep.subr.mxu0 %v391_v24  ;;  %v483_v0 = vld [vmem:[#allocation2 + $0xbd8] sm:$0xff]  ;;  %v482_v1 = vld [vmem:[#allocation2 + $0xbd0] sm:$0xff] }
 0x126   :  { %1195 = vmatprep.subr.mxu1 %v519_v25  ;;  %1125 = vmatpush1.msra.mxu0 %v390_v26  ;;  %v611_v62 = vld [vmem:[#allocation2 + $0xfd8] sm:$0xff]  ;;  %v610_v11 = vld [vmem:[#allocation2 + $0xfd0] sm:$0xff] }
 0x127   :  { %1196 = vmatpush1.msra.mxu1 %v518_v27  ;;  %1126 = vmatprep.subr.mxu0 %v387_v29  ;;  %v479_v2 = vld [vmem:[#allocation2 + $0xbb8] sm:$0xff]  ;;  %v478_v3 = vld [vmem:[#allocation2 + $0xbb0] sm:$0xff] }
 0x128   :  { %1197 = vmatprep.subr.mxu1 %v515_v31  ;;  %1127 = vmatpush1.msra.mxu0 %v386_v32  ;;  %v607_v4 = vld [vmem:[#allocation2 + $0xfb8] sm:$0xff]  ;;  %v606_v5 = vld [vmem:[#allocation2 + $0xfb0] sm:$0xff] }
 0x129   :  { %1198 = vmatpush1.msra.mxu1 %v514_v33  ;;  %1128 = vmatprep.subr.mxu0 %v383_v34  ;;  %v475_v6 = vld [vmem:[#allocation2 + $0xb98] sm:$0xff]  ;;  %v474_v9 = vld [vmem:[#allocation2 + $0xb90] sm:$0xff] }
 0x12a   :  { %1199 = vmatprep.subr.mxu1 %v511_v35  ;;  %1129 = vmatpush1.msra.mxu0 %v382_v36  ;;  %v603_v7 = vld [vmem:[#allocation2 + $0xf98] sm:$0xff]  ;;  %v602_v10 = vld [vmem:[#allocation2 + $0xf90] sm:$0xff] }
 0x12b   :  { %1200 = vmatpush1.msra.mxu1 %v510_v37  ;;  %1130 = vmatprep.subr.mxu0 %v379_v38  ;;  %v471_v12 = vld [vmem:[#allocation2 + $0xb78] sm:$0xff]  ;;  %v470_v14 = vld [vmem:[#allocation2 + $0xb70] sm:$0xff] }
 0x12c   :  { %1201 = vmatprep.subr.mxu1 %v507_v39  ;;  %1131 = vmatpush1.msra.mxu0 %v378_v40  ;;  %v599_v13 = vld [vmem:[#allocation2 + $0xf78] sm:$0xff]  ;;  %v598_v15 = vld [vmem:[#allocation2 + $0xf70] sm:$0xff] }
 0x12d   :  { %1202 = vmatpush1.msra.mxu1 %v506_v42  ;;  %1132 = vmatprep.subr.mxu0 %v375_v43  ;;  %v467_v16 = vld [vmem:[#allocation2 + $0xb58] sm:$0xff]  ;;  %v466_v19 = vld [vmem:[#allocation2 + $0xb50] sm:$0xff] }
 0x12e   :  { %1203 = vmatprep.subr.mxu1 %v503_v44  ;;  %1133 = vmatpush1.msra.mxu0 %v374_v45  ;;  %v595_v17 = vld [vmem:[#allocation2 + $0xf58] sm:$0xff]  ;;  %v594_v20 = vld [vmem:[#allocation2 + $0xf50] sm:$0xff] }
 0x12f   :  { %1204 = vmatpush1.msra.mxu1 %v502_v46  ;;  %1134 = vmatprep.subr.mxu0 %v371_v47  ;;  %v463_v21 = vld [vmem:[#allocation2 + $0xb38] sm:$0xff]  ;;  %v462_v24 = vld [vmem:[#allocation2 + $0xb30] sm:$0xff] }
 0x130   :  { %1205 = vmatprep.subr.mxu1 %v499_v48  ;;  %1135 = vmatpush1.msra.mxu0 %v370_v49  ;;  %v591_v22 = vld [vmem:[#allocation2 + $0xf38] sm:$0xff]  ;;  %v590_v25 = vld [vmem:[#allocation2 + $0xf30] sm:$0xff] }
 0x131   :  { %1206 = vmatpush1.msra.mxu1 %v498_v50  ;;  %1136 = vmatprep.subr.mxu0 %v367_v51  ;;  %v459_v26 = vld [vmem:[#allocation2 + $0xb18] sm:$0xff]  ;;  %v458_v29 = vld [vmem:[#allocation2 + $0xb10] sm:$0xff] }
 0x132   :  { %1207 = vmatprep.subr.mxu1 %v495_v53  ;;  %1137 = vmatpush1.msra.mxu0 %v366_v54  ;;  %v587_v27 = vld [vmem:[#allocation2 + $0xf18] sm:$0xff]  ;;  %v586_v31 = vld [vmem:[#allocation2 + $0xf10] sm:$0xff] }
 0x133   :  { %1208 = vmatpush1.msra.mxu1 %v494_v55  ;;  %1138 = vmatprep.subr.mxu0 %v363_v56  ;;  %v455_v32 = vld [vmem:[#allocation2 + $0xaf8] sm:$0xff]  ;;  %v454_v34 = vld [vmem:[#allocation2 + $0xaf0] sm:$0xff] }
 0x134   :  { %1209 = vmatprep.subr.mxu1 %v491_v57  ;;  %1139 = vmatpush1.msra.mxu0 %v362_v58  ;;  %v583_v33 = vld [vmem:[#allocation2 + $0xef8] sm:$0xff]  ;;  %v582_v35 = vld [vmem:[#allocation2 + $0xef0] sm:$0xff] }
 0x135   :  { %1210 = vmatpush1.msra.mxu1 %v490_v59  ;;  %1140 = vmatprep.subr.mxu0 %v487_v60  ;;  %v451_v36 = vld [vmem:[#allocation2 + $0xad8] sm:$0xff]  ;;  %v450_v38 = vld [vmem:[#allocation2 + $0xad0] sm:$0xff] }
 0x136   :  { %1211 = vmatprep.subr.mxu1 %v615_v61  ;;  %1141 = vmatpush2.msra.mxu0 %v486_v63  ;;  %v579_v37 = vld [vmem:[#allocation2 + $0xed8] sm:$0xff]  ;;  %v578_v39 = vld [vmem:[#allocation2 + $0xed0] sm:$0xff] }
 0x137   :  { %1212 = vmatpush2.msra.mxu1 %v614_v8  ;;  %1142 = vmatprep.subr.mxu0 %v483_v0  ;;  %v447_v40 = vld [vmem:[#allocation2 + $0xab8] sm:$0xff]  ;;  %v446_v43 = vld [vmem:[#allocation2 + $0xab0] sm:$0xff] }
 0x138   :  { %1213 = vmatprep.subr.mxu1 %v611_v62  ;;  %1143 = vmatpush2.msra.mxu0 %v482_v1  ;;  %v575_v42 = vld [vmem:[#allocation2 + $0xeb8] sm:$0xff]  ;;  %v574_v44 = vld [vmem:[#allocation2 + $0xeb0] sm:$0xff] }
 0x139   :  { %1214 = vmatpush2.msra.mxu1 %v610_v11  ;;  %1144 = vmatprep.subr.mxu0 %v479_v2  ;;  %v443_v45 = vld [vmem:[#allocation2 + $0xa98] sm:$0xff]  ;;  %v442_v47 = vld [vmem:[#allocation2 + $0xa90] sm:$0xff] }
 0x13a   :  { %1215 = vmatprep.subr.mxu1 %v607_v4  ;;  %1145 = vmatpush2.msra.mxu0 %v478_v3  ;;  %v571_v46 = vld [vmem:[#allocation2 + $0xe98] sm:$0xff]  ;;  %v570_v48 = vld [vmem:[#allocation2 + $0xe90] sm:$0xff]  ;;  %v1282_v4 = vld [vmem:[#allocation6 + $0xe0] sm:$0xff] }
 0x13b   :  { %1216 = vmatpush2.msra.mxu1 %v606_v5  ;;  %1146 = vmatprep.subr.mxu0 %v475_v6  ;;  %v439_v49 = vld [vmem:[#allocation2 + $0xa78] sm:$0xff]  ;;  %v438_v51 = vld [vmem:[#allocation2 + $0xa70] sm:$0xff] }
 0x13c   :  { %1217 = vmatprep.subr.mxu1 %v603_v7  ;;  %1147 = vmatpush2.msra.mxu0 %v474_v9  ;;  %v567_v50 = vld [vmem:[#allocation2 + $0xe78] sm:$0xff]  ;;  %v566_v53 = vld [vmem:[#allocation2 + $0xe70] sm:$0xff] }
 0x13d   :  { %1218 = vmatpush2.msra.mxu1 %v602_v10  ;;  %1148 = vmatprep.subr.mxu0 %v471_v12  ;;  %v435_v54 = vld [vmem:[#allocation2 + $0xa58] sm:$0xff]  ;;  %v434_v56 = vld [vmem:[#allocation2 + $0xa50] sm:$0xff] }
 0x13e   :  { %1219 = vmatprep.subr.mxu1 %v599_v13  ;;  %1149 = vmatpush2.msra.mxu0 %v470_v14  ;;  %v563_v55 = vld [vmem:[#allocation2 + $0xe58] sm:$0xff]  ;;  %v562_v57 = vld [vmem:[#allocation2 + $0xe50] sm:$0xff] }
 0x13f   :  { %1220 = vmatpush2.msra.mxu1 %v598_v15  ;;  %1150 = vmatprep.subr.mxu0 %v467_v16  ;;  %v431_v58 = vld [vmem:[#allocation2 + $0xa38] sm:$0xff]  ;;  %v430_v60 = vld [vmem:[#allocation2 + $0xa30] sm:$0xff]  ;;  %v1342_v15 = vld [vmem:[#allocation6 + $0x2c0] sm:$0xff] }
 0x140   :  { %1221 = vmatprep.subr.mxu1 %v595_v17  ;;  %1151 = vmatpush2.msra.mxu0 %v466_v19  ;;  %v559_v59 = vld [vmem:[#allocation2 + $0xe38] sm:$0xff]  ;;  %v558_v61 = vld [vmem:[#allocation2 + $0xe30] sm:$0xff]  ;;  %v1274_v19 = vld [vmem:[#allocation6 + $0xa0] sm:$0xff] }
 0x141   :  { %1222 = vmatpush2.msra.mxu1 %v594_v20  ;;  %1152 = vmatprep.subr.mxu0 %v463_v21  ;;  %v427_v63 = vld [vmem:[#allocation2 + $0xa18] sm:$0xff]  ;;  %v426_v0 = vld [vmem:[#allocation2 + $0xa10] sm:$0xff] }
 0x142   :  { %1223 = vmatprep.subr.mxu1 %v591_v22  ;;  %1153 = vmatpush2.msra.mxu0 %v462_v24  ;;  %v555_v8 = vld [vmem:[#allocation2 + $0xe18] sm:$0xff]  ;;  %v554_v62 = vld [vmem:[#allocation2 + $0xe10] sm:$0xff] }
 0x143   :  { %1224 = vmatpush2.msra.mxu1 %v590_v25  ;;  %1154 = vmatprep.subr.mxu0 %v459_v26  ;;  %v1285_v1 = vld [vmem:[#allocation6 + $0xf8] sm:$0xff]  ;;  %v1284_v11 = vld [vmem:[#allocation6 + $0xf0] sm:$0xff]  ;;  %v1283_v2 = vld [vmem:[#allocation6 + $0xe8] sm:$0xff] }
 0x144   :  { %1225 = vmatprep.subr.mxu1 %v587_v27  ;;  %1155 = vmatpush2.msra.mxu0 %v458_v29  ;;  %v1281_v3 = vld [vmem:[#allocation6 + $0xd8] sm:$0xff]  ;;  %v1348_v6 = vld [vmem:[#allocation6 + $0x2f0] sm:$0xff]  ;;  %v1347_v7 = vld [vmem:[#allocation6 + $0x2e8] sm:$0xff] }
 0x145   :  { %1226 = vmatpush2.msra.mxu1 %v586_v31  ;;  %1156 = vmatprep.subr.mxu0 %v455_v32  ;;  %v1349_v5 = vld [vmem:[#allocation6 + $0x2f8] sm:$0xff]  ;;  %v1280_v9 = vld [vmem:[#allocation6 + $0xd0] sm:$0xff]  ;;  %v1279_v10 = vld [vmem:[#allocation6 + $0xc8] sm:$0xff] }
 0x146   :  { %1227 = vmatprep.subr.mxu1 %v583_v33  ;;  %1157 = vmatpush2.msra.mxu0 %v454_v34  ;;  %v1277_v12 = vld [vmem:[#allocation6 + $0xb8] sm:$0xff]  ;;  %v1343_v13 = vld [vmem:[#allocation6 + $0x2c8] sm:$0xff]  ;;  %v1276_v14 = vld [vmem:[#allocation6 + $0xb0] sm:$0xff] }
 0x147   :  { %1228 = vmatpush2.msra.mxu1 %v582_v35  ;;  %1158 = vmatprep.subr.mxu0 %v451_v36  ;;  %v1275_v16 = vld [vmem:[#allocation6 + $0xa8] sm:$0xff]  ;;  %v1341_v17 = vld [vmem:[#allocation6 + $0x2b8] sm:$0xff]  ;;  %v1340_v20 = vld [vmem:[#allocation6 + $0x2b0] sm:$0xff] }
 0x148   :  { %1229 = vmatprep.subr.mxu1 %v579_v37  ;;  %1159 = vmatpush2.msra.mxu0 %v450_v38  ;;  %v1273_v21 = vld [vmem:[#allocation6 + $0x98] sm:$0xff]  ;;  %v1339_v22 = vld [vmem:[#allocation6 + $0x2a8] sm:$0xff]  ;;  %v1272_v24 = vld [vmem:[#allocation6 + $0x90] sm:$0xff] }
 0x149   :  { %1230 = vmatpush2.msra.mxu1 %v578_v39  ;;  %1160 = vmatprep.subr.mxu0 %v447_v40  ;;  %v1338_v25 = vld [vmem:[#allocation6 + $0x2a0] sm:$0xff]  ;;  %v1271_v26 = vld [vmem:[#allocation6 + $0x88] sm:$0xff]  ;;  %v1337_v27 = vld [vmem:[#allocation6 + $0x298] sm:$0xff] }
 0x14a   :  { %1231 = vmatprep.subr.mxu1 %v575_v42  ;;  %1161 = vmatpush2.msra.mxu0 %v446_v43  ;;  %v1270_v29 = vld [vmem:[#allocation6 + $0x80] sm:$0xff]  ;;  %v1336_v31 = vld [vmem:[#allocation6 + $0x290] sm:$0xff]  ;;  %v1269_v32 = vld [vmem:[#allocation6 + $0x78] sm:$0xff] }
 0x14b   :  { %1232 = vmatpush2.msra.mxu1 %v574_v44  ;;  %1162 = vmatprep.subr.mxu0 %v443_v45  ;;  %v1335_v33 = vld [vmem:[#allocation6 + $0x288] sm:$0xff]  ;;  %v1268_v34 = vld [vmem:[#allocation6 + $0x70] sm:$0xff]  ;;  %v1334_v35 = vld [vmem:[#allocation6 + $0x280] sm:$0xff] }
 0x14c   :  { %1233 = vmatprep.subr.mxu1 %v571_v46  ;;  %1163 = vmatpush2.msra.mxu0 %v442_v47  ;;  %v1267_v36 = vld [vmem:[#allocation6 + $0x68] sm:$0xff]  ;;  %v1333_v37 = vld [vmem:[#allocation6 + $0x278] sm:$0xff]  ;;  %v1266_v38 = vld [vmem:[#allocation6 + $0x60] sm:$0xff] }
 0x14d   :  { %1234 = vmatpush2.msra.mxu1 %v570_v48  ;;  %1164 = vmatprep.subr.mxu0 %v439_v49  ;;  %v1332_v39 = vld [vmem:[#allocation6 + $0x270] sm:$0xff]  ;;  %v1265_v40 = vld [vmem:[#allocation6 + $0x58] sm:$0xff]  ;;  %v1331_v42 = vld [vmem:[#allocation6 + $0x268] sm:$0xff] }
 0x14e   :  { %1235 = vmatprep.subr.mxu1 %v567_v50  ;;  %1165 = vmatpush2.msra.mxu0 %v438_v51  ;;  %v1264_v43 = vld [vmem:[#allocation6 + $0x50] sm:$0xff]  ;;  %v1330_v44 = vld [vmem:[#allocation6 + $0x260] sm:$0xff]  ;;  %v1263_v45 = vld [vmem:[#allocation6 + $0x48] sm:$0xff] }
 0x14f   :  { %1236 = vmatpush2.msra.mxu1 %v566_v53  ;;  %1166 = vmatprep.subr.mxu0 %v435_v54  ;;  %v1329_v46 = vld [vmem:[#allocation6 + $0x258] sm:$0xff]  ;;  %v1262_v47 = vld [vmem:[#allocation6 + $0x40] sm:$0xff]  ;;  %v1328_v48 = vld [vmem:[#allocation6 + $0x250] sm:$0xff] }
 0x150   :  { %1237 = vmatprep.subr.mxu1 %v563_v55  ;;  %1167 = vmatpush2.msra.mxu0 %v434_v56  ;;  %v1261_v49 = vld [vmem:[#allocation6 + $0x38] sm:$0xff]  ;;  %v1327_v50 = vld [vmem:[#allocation6 + $0x248] sm:$0xff]  ;;  %v1260_v51 = vld [vmem:[#allocation6 + $0x30] sm:$0xff] }
 0x151   :  { %1238 = vmatpush2.msra.mxu1 %v562_v57  ;;  %1168 = vmatprep.subr.mxu0 %v431_v58  ;;  %v1326_v53 = vld [vmem:[#allocation6 + $0x240] sm:$0xff]  ;;  %v1259_v54 = vld [vmem:[#allocation6 + $0x28] sm:$0xff]  ;;  %v1325_v55 = vld [vmem:[#allocation6 + $0x238] sm:$0xff] }
 0x152   :  { %1239 = vmatprep.subr.mxu1 %v559_v59  ;;  %1169 = vmatpush2.msra.mxu0 %v430_v60  ;;  %v1258_v56 = vld [vmem:[#allocation6 + $0x20] sm:$0xff]  ;;  %v1324_v57 = vld [vmem:[#allocation6 + $0x230] sm:$0xff]  ;;  %v1257_v58 = vld [vmem:[#allocation6 + $0x18] sm:$0xff] }
 0x153   :  { %1240 = vmatpush2.msra.mxu1 %v558_v61  ;;  %1170 = vmatprep.subr.mxu0 %v427_v63  ;;  %v1323_v59 = vld [vmem:[#allocation6 + $0x228] sm:$0xff]  ;;  %v1256_v60 = vld [vmem:[#allocation6 + $0x10] sm:$0xff]  ;;  %v1322_v61 = vld [vmem:[#allocation6 + $0x220] sm:$0xff] }
 0x154   :  { %1241 = vmatprep.subr.mxu1 %v555_v8  ;;  %1171 = vmatpush2.msra.mxu0 %v426_v0  ;;  %v1255_v63 = vld [vmem:[#allocation6 + $0x8] sm:$0xff]  ;;  %v1321_v8 = vld [vmem:[#allocation6 + $0x218] sm:$0xff]  ;;  %v1254_v0 = vld [vmem:[#allocation6] sm:$0xff] }
 0x155   :  { %1172 = vmatprep.mubr.f32.mxu0 %v1965_v28  ;;  %1242 = vmatpush2.msra.mxu1 %v554_v62  ;;  %v1346_v28 = vld [vmem:[#allocation6 + $0x2e0] sm:$0xff]  ;;  %v1320_v62 = vld [vmem:[#allocation6 + $0x210] sm:$0xff] }
 0x156   :  { %1243 = vmatprep.mubr.f32.mxu1 %v1969_v52  ;;  %1173 = vmatmul.mubr.f32.vlgmr.msra.gmra.mxu0 %v1958_v18  ;;  %v1345_v52 = vld [vmem:[#allocation6 + $0x2d8] sm:$0xff]  ;;  %v1278_v18 = vld [vmem:[#allocation6 + $0xc0] sm:$0xff] }
 0x157   :  { %1244 = vmatmul.mubr.f32.vlgmr.msra.gmra.mxu1 %v1961_v23  ;;  %1394 = vmatprep.subr.mxu0 %v1285_v1  ;;  %v1344_v23 = vld [vmem:[#allocation6 + $0x2d0] sm:$0xff]  ;;  %v1317_v1 = vld [vmem:[#allocation6 + $0x1f8] sm:$0xff] }
 0x158   :  { %1395 = vmatpush1.msra.mxu0 %v1284_v11  ;;  %1465 = vmatprep.subr.mxu1 %v1349_v5  ;;  %v1319_v11 = vld [vmem:[#allocation6 + $0x208] sm:$0xff]  ;;  %v1381_v5 = vld [vmem:[#allocation6 + $0x3f8] sm:$0xff] }
 0x159   :  { %1396 = vmatprep.subr.mxu0 %v1283_v2  ;;  %1466 = vmatpush1.msra.mxu1 %v1348_v6  ;;  %v1316_v2 = vld [vmem:[#allocation6 + $0x1f0] sm:$0xff]  ;;  %v1314_v6 = vld [vmem:[#allocation6 + $0x1e0] sm:$0xff] }
 0x15a   :  { %1397 = vmatpush1.msra.mxu0 %v1282_v4  ;;  %1467 = vmatprep.subr.mxu1 %v1347_v7  ;;  %v1318_v4 = vld [vmem:[#allocation6 + $0x200] sm:$0xff]  ;;  %v1380_v7 = vld [vmem:[#allocation6 + $0x3f0] sm:$0xff] }
 0x15b   :  { %1398 = vmatprep.subr.mxu0 %v1281_v3  ;;  %1468 = vmatpush1.msra.mxu1 %v1346_v28  ;;  %v1315_v3 = vld [vmem:[#allocation6 + $0x1e8] sm:$0xff] }
 0x15c   :  { %1399 = vmatpush1.msra.mxu0 %v1280_v9  ;;  %1469 = vmatprep.subr.mxu1 %v1345_v52  ;;  %v1313_v9 = vld [vmem:[#allocation6 + $0x1d8] sm:$0xff]  ;;  %v1379_v28 = vld [vmem:[#allocation6 + $0x3e8] sm:$0xff]  ;;  %v1378_v52 = vld [vmem:[#allocation6 + $0x3e0] sm:$0xff] }
 0x15d   :  { %1400 = vmatprep.subr.mxu0 %v1279_v10  ;;  %1470 = vmatpush1.msra.mxu1 %v1344_v23  ;;  %v1312_v10 = vld [vmem:[#allocation6 + $0x1d0] sm:$0xff]  ;;  %v1377_v23 = vld [vmem:[#allocation6 + $0x3d8] sm:$0xff] }
 0x15e   :  { %1401 = vmatpush1.msra.mxu0 %v1278_v18  ;;  %1471 = vmatprep.subr.mxu1 %v1343_v13  ;;  %v1311_v18 = vld [vmem:[#allocation6 + $0x1c8] sm:$0xff]  ;;  %v1376_v13 = vld [vmem:[#allocation6 + $0x3d0] sm:$0xff] }
 0x15f   :  { %1402 = vmatprep.subr.mxu0 %v1277_v12  ;;  %1472 = vmatpush1.msra.mxu1 %v1342_v15  ;;  %v1310_v12 = vld [vmem:[#allocation6 + $0x1c0] sm:$0xff]  ;;  %v1375_v15 = vld [vmem:[#allocation6 + $0x3c8] sm:$0xff] }
 0x160   :  { %1403 = vmatpush1.msra.mxu0 %v1276_v14  ;;  %1473 = vmatprep.subr.mxu1 %v1341_v17  ;;  %v1309_v14 = vld [vmem:[#allocation6 + $0x1b8] sm:$0xff]  ;;  %v1374_v17 = vld [vmem:[#allocation6 + $0x3c0] sm:$0xff] }
 0x161   :  { %1404 = vmatprep.subr.mxu0 %v1275_v16  ;;  %1474 = vmatpush1.msra.mxu1 %v1340_v20  ;;  %v1308_v16 = vld [vmem:[#allocation6 + $0x1b0] sm:$0xff]  ;;  %v1373_v20 = vld [vmem:[#allocation6 + $0x3b8] sm:$0xff] }
 0x162   :  { %1405 = vmatpush1.msra.mxu0 %v1274_v19  ;;  %1475 = vmatprep.subr.mxu1 %v1339_v22  ;;  %v1307_v19 = vld [vmem:[#allocation6 + $0x1a8] sm:$0xff]  ;;  %v1372_v22 = vld [vmem:[#allocation6 + $0x3b0] sm:$0xff] }
 0x163   :  { %1406 = vmatprep.subr.mxu0 %v1273_v21  ;;  %1476 = vmatpush1.msra.mxu1 %v1338_v25  ;;  %v1306_v21 = vld [vmem:[#allocation6 + $0x1a0] sm:$0xff]  ;;  %v1371_v25 = vld [vmem:[#allocation6 + $0x3a8] sm:$0xff] }
 0x164   :  { %1407 = vmatpush1.msra.mxu0 %v1272_v24  ;;  %1477 = vmatprep.subr.mxu1 %v1337_v27  ;;  %v1305_v24 = vld [vmem:[#allocation6 + $0x198] sm:$0xff]  ;;  %v1370_v27 = vld [vmem:[#allocation6 + $0x3a0] sm:$0xff] }
 0x165   :  { %1408 = vmatprep.subr.mxu0 %v1271_v26  ;;  %1478 = vmatpush1.msra.mxu1 %v1336_v31  ;;  %v1304_v26 = vld [vmem:[#allocation6 + $0x190] sm:$0xff]  ;;  %v1369_v31 = vld [vmem:[#allocation6 + $0x398] sm:$0xff] }
 0x166   :  { %1409 = vmatpush1.msra.mxu0 %v1270_v29  ;;  %1479 = vmatprep.subr.mxu1 %v1335_v33  ;;  %v1303_v29 = vld [vmem:[#allocation6 + $0x188] sm:$0xff]  ;;  %v1368_v33 = vld [vmem:[#allocation6 + $0x390] sm:$0xff] }
 0x167   :  { %1410 = vmatprep.subr.mxu0 %v1269_v32  ;;  %1480 = vmatpush1.msra.mxu1 %v1334_v35  ;;  %v1302_v32 = vld [vmem:[#allocation6 + $0x180] sm:$0xff]  ;;  %v1301_v35 = vld [vmem:[#allocation6 + $0x178] sm:$0xff] }
 0x168   :  { %1411 = vmatpush1.msra.mxu0 %v1268_v34  ;;  %1481 = vmatprep.subr.mxu1 %v1333_v37  ;;  %v620_v34 = vsub.s32 0, %v1928_v41  ;;  %v1984_v37 = vld [vmem:[#allocation4] sm:$0xf] }
 0x169   :  { %1412 = vmatprep.subr.mxu0 %v1267_v36  ;;  %1482 = vmatpush1.msra.mxu1 %v1332_v39  ;;  %v1367_v36 = vld [vmem:[#allocation6 + $0x388] sm:$0xff]  ;;  %v1366_v39 = vld [vmem:[#allocation6 + $0x380] sm:$0xff] }
 0x16a   :  { %1413 = vmatpush1.msra.mxu0 %v1266_v38  ;;  %1483 = vmatprep.subr.mxu1 %v1331_v42  ;;  %v1300_v38 = vld [vmem:[#allocation6 + $0x170] sm:$0xff]  ;;  %v1299_v42 = vld [vmem:[#allocation6 + $0x168] sm:$0xff] }
 0x16b   :  { %1414 = vmatprep.subr.mxu0 %v1265_v40  ;;  %1484 = vmatpush1.msra.mxu1 %v1330_v44  ;;  %v624_v40 = vsub.s32 1, %v1928_v41  ;;  %v748_v44 = vpop.f32.mrf.mxu0 }
 0x16c   :  { %1415 = vmatpush1.msra.mxu0 %v1264_v43  ;;  %1485 = vmatprep.subr.mxu1 %v1329_v46  ;;  %v1365_v43 = vld [vmem:[#allocation6 + $0x378] sm:$0xff]  ;;  %v1364_v46 = vld [vmem:[#allocation6 + $0x370] sm:$0xff] }
 0x16d   :  { %1416 = vmatprep.subr.mxu0 %v1263_v45  ;;  %1486 = vmatpush1.msra.mxu1 %v1328_v48  ;;  %v1298_v45 = vld [vmem:[#allocation6 + $0x160] sm:$0xff]  ;;  %v1297_v48 = vld [vmem:[#allocation6 + $0x158] sm:$0xff] }
 0x16e   :  { %1417 = vmatpush1.msra.mxu0 %v1262_v47  ;;  %1487 = vmatprep.subr.mxu1 %v1327_v50  ;;  %v621_v47 = vrot.slane %v1984_v37, %v620_v34  ;;  %v1296_v50 = vld [vmem:[#allocation6 + $0x150] sm:$0xff] }
 0x16f   :  { %1418 = vmatprep.subr.mxu0 %v1261_v49  ;;  %1488 = vmatpush1.msra.mxu1 %v1326_v53  ;;  %v1363_v49 = vld [vmem:[#allocation6 + $0x368] sm:$0xff]  ;;  %v625_v53 = vrot.slane %v1984_v37, %v624_v40 }
 0x170   :  { %1419 = vmatpush1.msra.mxu0 %v1260_v51  ;;  %1489 = vmatprep.subr.mxu1 %v1325_v55  ;;  %v1362_v51 = vld [vmem:[#allocation6 + $0x360] sm:$0xff]  ;;  %v1361_v55 = vld [vmem:[#allocation6 + $0x358] sm:$0xff] }
 0x171   :  { %1420 = vmatprep.subr.mxu0 %v1259_v54  ;;  %1490 = vmatpush1.msra.mxu1 %v1324_v57  ;;  %v1295_v54 = vld [vmem:[#allocation6 + $0x148] sm:$0xff]  ;;  %v750_v57 = vpop.f32.mrf.mxu0 }
 0x172   :  { %1421 = vmatpush1.msra.mxu0 %v1258_v56  ;;  %1491 = vmatprep.subr.mxu1 %v1323_v59  ;;  %v819_v56 = vpop.f32.mrf.mxu1  ;;  %v1360_v59 = vld [vmem:[#allocation6 + $0x350] sm:$0xff] }
 0x173   :  { %1422 = vmatprep.subr.mxu0 %v1257_v58  ;;  %1492 = vmatpush1.msra.mxu1 %v1322_v61  ;;  %v1294_v58 = vld [vmem:[#allocation6 + $0x140] sm:$0xff]  ;;  %v1293_v61 = vld [vmem:[#allocation6 + $0x138] sm:$0xff] }
 0x174   :  { %1423 = vmatpush1.msra.mxu0 %v1256_v60  ;;  %1493 = vmatprep.subr.mxu1 %v1321_v8  ;;  %v749_v60 = vadd.f32 %v748_v44, %v621_v47  ;;  %v751_v8 = vadd.f32 %v750_v57, %v625_v53  ;;  %v1548_v44 = vld [vmem:[#allocation9 + $0x50] sm:$0xff]  ;;  %v1562_v47 = vld [vmem:[#allocation9 + $0xc0] sm:$0xff] }
 0x175   :  { %1424 = vmatprep.subr.mxu0 %v1255_v63  ;;  %1494 = vmatpush1.msra.mxu1 %v1320_v62  ;;  %v1292_v63 = vld [vmem:[#allocation6 + $0x130] sm:$0xff]  ;;  %v821_v62 = vpop.f32.mrf.mxu1  ;;  %v1542_v57 = vld [vmem:[#allocation9 + $0x20] sm:$0xff] }
 0x176   :  { %1425 = vmatpush1.msra.mxu0 %v1254_v0  ;;  %1495 = vmatprep.subr.mxu1 %v1319_v11  ;;  %v1291_v0 = vld [vmem:[#allocation6 + $0x128] sm:$0xff]  ;;  %v820_v11 = vadd.f32 %v819_v56, %v749_v60  ;;  %v1544_v53 = vld [vmem:[#allocation9 + $0x30] sm:$0xff] }
 0x177   :  { %1426 = vmatprep.subr.mxu0 %v1317_v1  ;;  %1496 = vmatpush1.msra.mxu1 %v1318_v4  ;;  %v1290_v1 = vld [vmem:[#allocation6 + $0x120] sm:$0xff] }
 0x178   :  { %1427 = vmatpush2.msra.mxu0 %v1316_v2  ;;  %1497 = vmatprep.subr.mxu1 %v1381_v5  ;;  %v1289_v2 = vld [vmem:[#allocation6 + $0x118] sm:$0xff]  ;;  %v822_v5 = vadd.f32 %v821_v62, %v751_v8  ;;  %v1558_v56 = vld [vmem:[#allocation9 + $0xa0] sm:$0xff] }
 0x179   :  { %1428 = vmatprep.subr.mxu0 %v1315_v3  ;;  %1498 = vmatpush2.msra.mxu1 %v1380_v7  ;;  %v1288_v3 = vld [vmem:[#allocation6 + $0x110] sm:$0xff]  ;;  %v1287_v7 = vld [vmem:[#allocation6 + $0x108] sm:$0xff] }
 0x17a   :  { %1429 = vmatpush2.msra.mxu0 %v1314_v6  ;;  %1499 = vmatprep.subr.mxu1 %v1379_v28 }
 0x17b   :  { %1430 = vmatprep.subr.mxu0 %v1313_v9  ;;  %1500 = vmatpush2.msra.mxu1 %v1378_v52 }
 0x17c   :  { %1431 = vmatpush2.msra.mxu0 %v1312_v10  ;;  %1501 = vmatprep.subr.mxu1 %v1377_v23  ;;  %v1286_v10 = vld [vmem:[#allocation6 + $0x100] sm:$0xff] }
 0x17d   :  { %1432 = vmatprep.subr.mxu0 %v1311_v18  ;;  %1502 = vmatpush2.msra.mxu1 %v1376_v13 }
 0x17e   :  { %1433 = vmatpush2.msra.mxu0 %v1310_v12  ;;  %1503 = vmatprep.subr.mxu1 %v1375_v15  ;;  %v1359_v12 = vld [vmem:[#allocation6 + $0x348] sm:$0xff]  ;;  %v1357_v15 = vld [vmem:[#allocation6 + $0x338] sm:$0xff] }
 0x17f   :  { %1434 = vmatprep.subr.mxu0 %v1309_v14  ;;  %1504 = vmatpush2.msra.mxu1 %v1374_v17  ;;  %v1358_v14 = vld [vmem:[#allocation6 + $0x340] sm:$0xff]  ;;  %v1356_v17 = vld [vmem:[#allocation6 + $0x330] sm:$0xff] }
 0x180   :  { %1435 = vmatpush2.msra.mxu0 %v1308_v16  ;;  %1505 = vmatprep.subr.mxu1 %v1373_v20  ;;  %v1355_v20 = vld [vmem:[#allocation6 + $0x328] sm:$0xff] }
 0x181   :  { %1436 = vmatprep.subr.mxu0 %v1307_v19  ;;  %1506 = vmatpush2.msra.mxu1 %v1372_v22  ;;  %v1353_v22 = vld [vmem:[#allocation6 + $0x318] sm:$0xff] }
 0x182   :  { %1437 = vmatpush2.msra.mxu0 %v1306_v21  ;;  %1507 = vmatprep.subr.mxu1 %v1371_v25  ;;  %v1354_v21 = vld [vmem:[#allocation6 + $0x320] sm:$0xff]  ;;  %v1351_v25 = vld [vmem:[#allocation6 + $0x308] sm:$0xff] }
 0x183   :  { %1438 = vmatprep.subr.mxu0 %v1305_v24  ;;  %1508 = vmatpush2.msra.mxu1 %v1370_v27  ;;  %v1352_v24 = vld [vmem:[#allocation6 + $0x310] sm:$0xff]  ;;  %v1569_v27 = vld [vmem:[#allocation9 + $0xf8] sm:$0xff] }
 0x184   :  { %1439 = vmatpush2.msra.mxu0 %v1304_v26  ;;  %1509 = vmatprep.subr.mxu1 %v1369_v31  ;;  %v1350_v26 = vld [vmem:[#allocation6 + $0x300] sm:$0xff]  ;;  %v1568_v31 = vld [vmem:[#allocation9 + $0xf0] sm:$0xff] }
 0x185   :  { %1440 = vmatprep.subr.mxu0 %v1303_v29  ;;  %1510 = vmatpush2.msra.mxu1 %v1368_v33  ;;  %v1553_v29 = vld [vmem:[#allocation9 + $0x78] sm:$0xff]  ;;  %v1567_v33 = vld [vmem:[#allocation9 + $0xe8] sm:$0xff] }
 0x186   :  { %1441 = vmatpush2.msra.mxu0 %v1302_v32  ;;  %1511 = vmatprep.subr.mxu1 %v1367_v36  ;;  %v1552_v32 = vld [vmem:[#allocation9 + $0x70] sm:$0xff]  ;;  %v1566_v36 = vld [vmem:[#allocation9 + $0xe0] sm:$0xff] }
 0x187   :  { %1442 = vmatprep.subr.mxu0 %v1301_v35  ;;  %1512 = vmatpush2.msra.mxu1 %v1366_v39  ;;  %v1551_v35 = vld [vmem:[#allocation9 + $0x68] sm:$0xff]  ;;  %v1565_v39 = vld [vmem:[#allocation9 + $0xd8] sm:$0xff] }
 0x188   :  { %1443 = vmatpush2.msra.mxu0 %v1300_v38  ;;  %1513 = vmatprep.subr.mxu1 %v1365_v43  ;;  %v1550_v38 = vld [vmem:[#allocation9 + $0x60] sm:$0xff]  ;;  %v1564_v43 = vld [vmem:[#allocation9 + $0xd0] sm:$0xff] }
 0x189   :  { %1444 = vmatprep.subr.mxu0 %v1299_v42  ;;  %1514 = vmatpush2.msra.mxu1 %v1364_v46  ;;  %v1549_v42 = vld [vmem:[#allocation9 + $0x58] sm:$0xff]  ;;  %v1547_v46 = vld [vmem:[#allocation9 + $0x48] sm:$0xff] }
 0x18a   :  { %1445 = vmatpush2.msra.mxu0 %v1298_v45  ;;  %1515 = vmatprep.subr.mxu1 %v1363_v49  ;;  %v1563_v45 = vld [vmem:[#allocation9 + $0xc8] sm:$0xff]  ;;  %v1561_v49 = vld [vmem:[#allocation9 + $0xb8] sm:$0xff] }
 0x18b   :  { %1446 = vmatprep.subr.mxu0 %v1297_v48  ;;  %1516 = vmatpush2.msra.mxu1 %v1362_v51  ;;  %v1546_v48 = vld [vmem:[#allocation9 + $0x40] sm:$0xff]  ;;  %v1560_v51 = vld [vmem:[#allocation9 + $0xb0] sm:$0xff] }
 0x18c   :  { %1447 = vmatpush2.msra.mxu0 %v1296_v50  ;;  %1517 = vmatprep.subr.mxu1 %v1361_v55  ;;  %v1545_v50 = vld [vmem:[#allocation9 + $0x38] sm:$0xff]  ;;  %v1543_v55 = vld [vmem:[#allocation9 + $0x28] sm:$0xff] }
 0x18d   :  { %1448 = vmatprep.subr.mxu0 %v1295_v54  ;;  %1518 = vmatpush2.msra.mxu1 %v1360_v59  ;;  %v1559_v54 = vld [vmem:[#allocation9 + $0xa8] sm:$0xff]  ;;  %v632_v59 = vsub.s32 3, %v1928_v41 }
 0x18e   :  { %1449 = vmatpush2.msra.mxu0 %v1294_v58  ;;  %1519 = vmatprep.subr.mxu1 %v1359_v12  ;;  %v628_v58 = vsub.s32 2, %v1928_v41  ;;  %v1541_v12 = vld [vmem:[#allocation9 + $0x18] sm:$0xff]  ;;  %v1675_v41 = vld [vmem:[#allocation10] ss:$0 sm:$0xff] }
 0x18f   :  { %1450 = vmatprep.subr.mxu0 %v1293_v61  ;;  %1520 = vmatpush2.msra.mxu1 %v1358_v14  ;;  %v1540_v14 = vld [vmem:[#allocation9 + $0x10] sm:$0xff] }
 0x190   :  { %1451 = vmatpush2.msra.mxu0 %v1292_v63  ;;  %1521 = vmatprep.subr.mxu1 %v1357_v15  ;;  %v629_v61 = vrot.slane %v1984_v37, %v628_v58  ;;  %v633_v63 = vrot.slane %v1984_v37, %v632_v59  ;;  %v1557_v37 = vld [vmem:[#allocation9 + $0x98] sm:$0xff]  ;;  %v1555_v15 = vld [vmem:[#allocation9 + $0x88] sm:$0xff] }
 0x191   :  { %1452 = vmatprep.subr.mxu0 %v1291_v0  ;;  %1522 = vmatpush2.msra.mxu1 %v1356_v17  ;;  %v1554_v17 = vld [vmem:[#allocation9 + $0x80] sm:$0xff] }
 0x192   :  { %v890_v4 = vpop.f32.mrf.mxu0  ;;  %1453 = vmatpush2.msra.mxu0 %v1290_v1  ;;  %1523 = vmatprep.subr.mxu1 %v1355_v20  ;;  %v1382_v20 = vld [vmem:[#allocation7] sm:$0x3] }
 0x193   :  { %v891_v6 = vadd.f32 %v890_v4, %v820_v11  ;;  %1454 = vmatprep.subr.mxu0 %v1289_v2  ;;  %1524 = vmatpush2.msra.mxu1 %v1354_v21 }
 0x194   :  { %v961_v9 = vpop.f32.mrf.mxu1  ;;  %v892_v28 = vpop.f32.mrf.mxu0  ;;  %1455 = vmatpush2.msra.mxu0 %v1288_v3  ;;  %1525 = vmatprep.subr.mxu1 %v1353_v22  ;;  %v1387_v22 = vrot.slane %v1382_v20, %v620_v34 }
 0x195   :  { %v893_v52 = vadd.f32 %v892_v28, %v822_v5  ;;  %v962_v18 = vadd.f32 %v961_v9, %v891_v6  ;;  %1456 = vmatprep.subr.mxu0 %v1287_v7  ;;  %1526 = vmatpush2.msra.mxu1 %v1352_v24  ;;  %v1391_v24 = vrot.slane %v1382_v20, %v624_v40 }
 0x196   :  { %v963_v23 = vpop.f32.mrf.mxu1  ;;  %1457 = vmatpush2.msra.mxu0 %v1286_v10  ;;  %1527 = vmatprep.subr.mxu1 %v1351_v25 }
 0x197   :  { %v964_v13 = vadd.f32 %v963_v23, %v893_v52  ;;  %v1250_v19 = vmax.f32 %v962_v18, 0.0  ;;  %1528 = vmatpush2.msra.mxu1 %v1350_v26  ;;  %1676 = vmatprep.subr.mxu0 %v1569_v27 }
 0x199   :  { %v1251_v16 = vmax.f32 %v964_v13, 0.0  ;;  %v1556_v13 = vld [vmem:[#allocation9 + $0x90] sm:$0xff] }
 0x19b   :  { %1458 = vmatprep.mubr.f32.mxu0 %v1251_v16  ;;  %v1539_v16 = vld [vmem:[#allocation9 + $0x8] sm:$0xff] }
 0x19c   :  { %1459 = vmatmul.mubr.f32.vlgmr.msra.gmra.mxu0 %v1250_v19  ;;  %v1538_v19 = vld [vmem:[#allocation9] sm:$0xff] }
 0x19d   :  { %1677 = vmatpush3.msra.mxu0 %v1553_v29 }
 0x19e   :  { %1678 = vmatprep.subr.mxu0 %v1568_v31 }
 0x19f   :  { %1679 = vmatpush3.msra.mxu0 %v1552_v32 }
 0x1a0   :  { %1680 = vmatprep.subr.mxu0 %v1567_v33 }
 0x1a1   :  { %1681 = vmatpush3.msra.mxu0 %v1551_v35 }
 0x1a2   :  { %1682 = vmatprep.subr.mxu0 %v1566_v36 }
 0x1a3   :  { %1683 = vmatpush3.msra.mxu0 %v1550_v38  ;;  %v1648_v38 = vand.u32 127, %v618_v30 }
 0x1a4   :  { %1684 = vmatprep.subr.mxu0 %v1565_v39 }
 0x1a5   :  { %1685 = vmatpush3.msra.mxu0 %v1549_v42  ;;  %v1653_v39 = vand.u32 3, %v1648_v38  ;;  %vm1662_vm1 = vcmp.lt.s32.totalorder %v1648_v38, 9 }
 0x1a6   :  { %1686 = vmatprep.subr.mxu0 %v1564_v43  ;;  %v1868_v43 = vmov 0.0  }
 0x1a7   :  { %1687 = vmatpush3.msra.mxu0 %v1548_v44  ;;  %vm1661_vm0 = vcmp.eq.s32.totalorder %v1653_v39, 0 }
 0x1a8   :  { %1688 = vmatprep.subr.mxu0 %v1563_v45  ;;  %vm1663_vm2 = vmand %vm1661_vm0, %vm1662_vm1 }
 0x1a9   :  { %1689 = vmatpush3.msra.mxu0 %v1547_v46  ;;  %v1664_v44 = vsel %vm1663_vm2, 1.0, %v1868_v43 }
 0x1aa   :  { %1690 = vmatprep.subr.mxu0 %v1562_v47 }
 0x1ab   :  { %1691 = vmatpush3.msra.mxu0 %v1546_v48 }
 0x1ac   :  { %1692 = vmatprep.subr.mxu0 %v1561_v49 }
 0x1ad   :  { %1693 = vmatpush3.msra.mxu0 %v1545_v50 }
 0x1ae   :  { %1694 = vmatprep.subr.mxu0 %v1560_v51 }
 0x1af   :  { %1695 = vmatpush3.msra.mxu0 %v1544_v53 }
 0x1b0   :  { %1696 = vmatprep.subr.mxu0 %v1559_v54 }
 0x1b1   :  { %1697 = vmatpush3.msra.mxu0 %v1543_v55 }
 0x1b2   :  { %1698 = vmatprep.subr.mxu0 %v1558_v56 }
 0x1b3   :  { %1699 = vmatpush3.msra.mxu0 %v1542_v57 }
 0x1b4   :  { %1700 = vmatprep.subr.mxu0 %v1557_v37 }
 0x1b5   :  { %1701 = vmatpush3.msra.mxu0 %v1541_v12 }
 0x1b6   :  { %1702 = vmatprep.subr.mxu0 %v1556_v13 }
 0x1b7   :  { %1703 = vmatpush3.msra.mxu0 %v1540_v14 }
 0x1b8   :  { %1704 = vmatprep.subr.mxu0 %v1555_v15 }
 0x1b9   :  { %1705 = vmatpush3.msra.mxu0 %v1539_v16 }
 0x1ba   :  { %1706 = vmatprep.subr.mxu0 %v1554_v17 }
 0x1bb   :  { %1707 = vmatpush3.msra.mxu0 %v1538_v19 }
 0x1d4   :  { %v1032_v60 = vpop.f32.mrf.mxu0 }
 0x1d5   :  { %v1033_v62 = vadd.f32 %v1032_v60, %v629_v61 }
 0x1d6   :  { %v1103_v8 = vpop.f32.mrf.mxu1  ;;  %v1034_v0 = vpop.f32.mrf.mxu0 }
 0x1d7   :  { %v1035_v1 = vadd.f32 %v1034_v0, %v633_v63  ;;  %v1104_v2 = vadd.f32 %v1103_v8, %v1033_v62 }
 0x1d8   :  { %v1105_v11 = vpop.f32.mrf.mxu1 }
 0x1d9   :  { %v1106_v5 = vadd.f32 %v1105_v11, %v1035_v1 }
 0x216   :  { %v1174_v4 = vpop.f32.mrf.mxu0 }
 0x217   :  { %v1245_v3 = vpop.f32.mrf.mxu1  ;;  %v1175_v6 = vadd.f32 %v1174_v4, %v1104_v2 }
 0x218   :  { %v1176_v7 = vpop.f32.mrf.mxu0 }
 0x219   :  { %v1177_v9 = vadd.f32 %v1176_v7, %v1106_v5  ;;  %v1246_v28 = vadd.f32 %v1245_v3, %v1175_v6  ;;  %v1247_v10 = vpop.f32.mrf.mxu1 }
 0x21b   :  { %v1248_v52 = vadd.f32 %v1247_v10, %v1177_v9  ;;  %v1252_v23 = vmax.f32 %v1246_v28, 0.0 }
 0x21d   :  { %v1253_v18 = vmax.f32 %v1248_v52, 0.0 }
 0x21f   :  { %1529 = vmatprep.mubr.f32.mxu1 %v1253_v18 }
 0x220   :  { %1530 = vmatmul.mubr.f32.vlgmr.msra.gmra.mxu1 %v1252_v23 }
 0x25c   :  { %v1460_v21 = vpop.f32.mrf.mxu0 }
 0x25d   :  { %v1461_v26 = vadd.f32 %v1460_v21, %v1387_v22 }
 0x25e   :  { %v1462_v25 = vpop.f32.mrf.mxu0 }
 0x25f   :  { %v1463_v29 = vadd.f32 %v1462_v25, %v1391_v24 }
 0x2e0   :  { %v1531_v27 = vpop.f32.mrf.mxu1 }
 0x2e1   :  { %v1532_v31 = vadd.f32 %v1531_v27, %v1461_v26 }
 0x2e2   :  { %v1533_v32 = vpop.f32.mrf.mxu1 }
 0x2e3   :  { %v1534_v33 = vadd.f32 %v1533_v32, %v1463_v29  ;;  %v1536_v36 = vmax.f32 %v1532_v31, 0.0 }
 0x2e5   :  { %v1537_v35 = vmax.f32 %v1534_v33, 0.0 }
 0x2e7   :  { %1641 = vmatprep.mubr.f32.mxu0 %v1537_v35 }
 0x2e8   :  { %1642 = vmatmul.mubr.f32.vlgmr.msra.gmra.mxu0 %v1536_v36 }
 0x3a8   :  { %v1708_v34 = vpop.f32.mrf.mxu0 }
 0x3aa   :  { %v1709_v40 = vpop.f32.mrf.mxu0 }
 0x3ab   :  { %v1710_v42 = vadd.f32 %v1709_v40, %v1708_v34 }
 0x3ad   :  { %v1644_v45 = vadd.f32 %v1710_v42, %v1675_v41 }
 0x3af   :  { %v1665_v46 = vadd.f32 %v1664_v44, %v1644_v45 }
 0x3b1   :  { %1666 = vst [vmem:[%s2012_s7] sm:$0x3] %v1665_v46 }
 0x3b2   :  { %1671 = vsyncpa [#allocation3], 1 }
 0x3b3   :  { %1672 = vsyncpa [#allocation5], 1 }
 0x3b4   :  { %1673 = vsyncpa [#allocation8], 1 }
 0x3b5   :  { %1674 = vsyncpa [#allocation11], 1 }

</bundles_post_ra>
